<compile_context>
chip_gen: v5e
topology: v5e:2x2
jax: 0.10.0
libtpu: 0.0.40
codegen_flags: <defaults>
</compile_context>

<pallas_src>
import functools

import jax
import jax.numpy as jnp
from jax import lax
from jax.experimental import pallas as pl
from jax.experimental.pallas import tpu as pltpu

# Conservative scoped-VMEM request; valid on v5e / v6e / v7x for the tile
# budgets chosen below (tiles are a few hundred KiB each).
_VMEM_LIMIT_BYTES = 32 * 1024 * 1024


def _pick_tile(dim, cap, align):
    """Largest tile t <= cap with dim % t == 0 and t % align == 0, else full dim."""
    if dim <= cap:
        return dim
    t = (cap // align) * align
    while t >= align:
        if dim % t == 0:
            return t
        t -= align
    return dim


# --------------------------------------------------------------------------
# Tiled linear kernels (K-accumulating matmul, f32 accumulator)
# --------------------------------------------------------------------------
def _matmul_kernel(x_ref, w_ref, o_ref, acc_ref, *, compute_dtype):
    @pl.when(pl.program_id(2) == 0)
    def _():
        acc_ref[...] = jnp.zeros_like(acc_ref)

    acc_ref[...] += jnp.dot(
        x_ref[...].astype(compute_dtype),
        w_ref[...].astype(compute_dtype),
        preferred_element_type=jnp.float32,
    )

    @pl.when(pl.program_id(2) == pl.num_programs(2) - 1)
    def _():
        o_ref[...] = acc_ref[...].astype(o_ref.dtype)


def _matmul_bias_kernel(x_ref, w_ref, b_ref, o_ref, acc_ref, *, compute_dtype):
    @pl.when(pl.program_id(2) == 0)
    def _():
        acc_ref[...] = jnp.zeros_like(acc_ref)

    acc_ref[...] += jnp.dot(
        x_ref[...].astype(compute_dtype),
        w_ref[...].astype(compute_dtype),
        preferred_element_type=jnp.float32,
    )

    @pl.when(pl.program_id(2) == pl.num_programs(2) - 1)
    def _():
        o_ref[...] = (acc_ref[...] + b_ref[...].astype(jnp.float32)).astype(o_ref.dtype)


def pallas_linear(x2d, w, b=None, *, compute_dtype=None,
                  tm_cap=256, tn_cap=256, tk_cap=512):
    """y = x2d @ w (+ b), tiled over (M, Nout, K) with f32 accumulation."""
    M, K = x2d.shape
    Kw, Nout = w.shape
    assert K == Kw
    cd = jnp.dtype(compute_dtype) if compute_dtype is not None else jnp.dtype(x2d.dtype)

    tm = _pick_tile(M, tm_cap, 8)
    tn = _pick_tile(Nout, tn_cap, 128)
    tk = _pick_tile(K, tk_cap, 128)
    grid = (M // tm, Nout // tn, K // tk)   # K-reduction axis last ("arbitrary")

    in_specs = [
        pl.BlockSpec((tm, tk), lambda i, j, k: (i, k)),
        pl.BlockSpec((tk, tn), lambda i, j, k: (k, j)),
    ]
    args = [x2d, w]
    if b is None:
        kernel = functools.partial(_matmul_kernel, compute_dtype=cd)
    else:
        in_specs.append(pl.BlockSpec((1, tn), lambda i, j, k: (0, j)))
        args.append(b.reshape(1, Nout))
        kernel = functools.partial(_matmul_bias_kernel, compute_dtype=cd)

    itemsize = jnp.dtype(x2d.dtype).itemsize
    cost = pl.CostEstimate(
        flops=2 * M * K * Nout,
        transcendentals=0,
        bytes_accessed=itemsize * (M * K + K * Nout + M * Nout),
    )

    return pl.pallas_call(
        kernel,
        out_shape=jax.ShapeDtypeStruct((M, Nout), x2d.dtype),
        grid=grid,
        in_specs=in_specs,
        out_specs=pl.BlockSpec((tm, tn), lambda i, j, k: (i, j)),
        scratch_shapes=[pltpu.VMEM((tm, tn), jnp.float32)],
        compiler_params=pltpu.CompilerParams(
            dimension_semantics=("parallel", "parallel", "arbitrary"),
            vmem_limit_bytes=_VMEM_LIMIT_BYTES,
        ),
        cost_estimate=cost,
    )(*args)


# --------------------------------------------------------------------------
# Fused multi-head flash attention kernel
# --------------------------------------------------------------------------
def _flash_mhsa_kernel(q_ref, k_ref, v_ref, o_ref, acc_sc, m_sc, l_sc, *,
                       scale, num_heads, head_dim, compute_dtype):
    # q_ref: (1, tq, C) slice of the fused QKV tensor (channels [0, C))
    # k_ref/v_ref: (1, tk, C) slices (channels [C, 2C) / [2C, 3C))
    # o_ref: (1, tq, C) block of the merged-head (B, N, C) output.
    ki = pl.program_id(2)

    @pl.when(ki == 0)
    def _():
        acc_sc[...] = jnp.zeros_like(acc_sc)
        m_sc[...] = jnp.full_like(m_sc, -jnp.inf)
        l_sc[...] = jnp.zeros_like(l_sc)

    new_acc = []
    for h in range(num_heads):          # static head loop, channel-sliced in-kernel
        lo, hi = h * head_dim, (h + 1) * head_dim
        # Fold the softmax scale into q: touches tq*D elements instead of tq*tk.
        q = (q_ref[0, :, lo:hi].astype(jnp.float32) * scale).astype(compute_dtype)
        k = k_ref[0, :, lo:hi].astype(compute_dtype)
        v = v_ref[0, :, lo:hi].astype(compute_dtype)

        # q @ k^T, contracting the last dims directly (no explicit transpose).
        s = lax.dot_general(q, k, (((1,), (1,)), ((), ())),
                            preferred_element_type=jnp.float32)      # (tq, tk)

        m_prev = m_sc[h, :, :]                                        # (tq, 1)
        m_new = jnp.maximum(m_prev, jnp.max(s, axis=-1, keepdims=True))
        alpha = jnp.exp(m_prev - m_new)
        p = jnp.exp(s - m_new)                                        # (tq, tk) f32
        l_sc[h, :, :] = alpha * l_sc[h, :, :] + jnp.sum(p, axis=-1, keepdims=True)
        m_sc[h, :, :] = m_new

        pv = jnp.dot(p.astype(compute_dtype), v,
                     preferred_element_type=jnp.float32)              # (tq, D)
        new_acc.append(alpha * acc_sc[:, lo:hi] + pv)

    # One lane-dense (tq, C) scratch update per KV step.
    acc_sc[...] = jnp.concatenate(new_acc, axis=-1)

    @pl.when(ki == pl.num_programs(2) - 1)
    def _():
        approx = jnp.dtype(compute_dtype) != jnp.dtype(jnp.float32)
        cols = []
        for h in range(num_heads):
            lo, hi = h * head_dim, (h + 1) * head_dim
            l_h = l_sc[h, :, :]
            inv = pl.reciprocal(l_h, approx=True) if approx else 1.0 / l_h
            cols.append(acc_sc[:, lo:hi] * inv)
        # Single lane-dense store, already in merged-head (B, N, C) layout.
        o_ref[0] = jnp.concatenate(cols, axis=-1).astype(o_ref.dtype)


def pallas_flash_mhsa(qkv, num_heads, scale, *, compute_dtype=None,
                      tq_cap=256, tk_cap=256):
    """qkv: (B, N, 3C) fused projection output -> (B, N, C) attention output."""
    B, N, C3 = qkv.shape
    C = C3 // 3
    head_dim = C // num_heads
    assert C % 128 == 0, "fused q/k/v channel slicing needs C to be a multiple of 128"
    cd = jnp.dtype(compute_dtype) if compute_dtype is not None else jnp.dtype(qkv.dtype)

    tq = _pick_tile(N, tq_cap, 8)
    tk = _pick_tile(N, tk_cap, 8)
    grid = (B, N // tq, N // tk)        # KV-reduction axis last ("arbitrary")

    # q / k / v are channel-blocks 0 / 1 / 2 of the fused (B, N, 3C) tensor:
    # no HBM transpose / unbind is ever materialized.
    q_spec = pl.BlockSpec((1, tq, C), lambda b, qi, ki: (b, qi, 0))
    k_spec = pl.BlockSpec((1, tk, C), lambda b, qi, ki: (b, ki, 1))
    v_spec = pl.BlockSpec((1, tk, C), lambda b, qi, ki: (b, ki, 2))
    o_spec = pl.BlockSpec((1, tq, C), lambda b, qi, ki: (b, qi, 0))

    itemsize = jnp.dtype(qkv.dtype).itemsize
    cost = pl.CostEstimate(
        flops=4 * B * N * N * C,                       # QK^T + PV
        transcendentals=B * num_heads * N * N,         # exp
        bytes_accessed=itemsize * (B * N * 3 * C + B * N * C),
    )
    kernel = functools.partial(
        _flash_mhsa_kernel, scale=scale, num_heads=num_heads,
        head_dim=head_dim, compute_dtype=cd)

    return pl.pallas_call(
        kernel,
        out_shape=jax.ShapeDtypeStruct((B, N, C), qkv.dtype),
        grid=grid,
        in_specs=[q_spec, k_spec, v_spec],
        out_specs=o_spec,
        scratch_shapes=[
            pltpu.VMEM((tq, C), jnp.float32),             # output accumulator
            pltpu.VMEM((num_heads, tq, 1), jnp.float32),  # running max per head
            pltpu.VMEM((num_heads, tq, 1), jnp.float32),  # running sum per head
        ],
        compiler_params=pltpu.CompilerParams(
            dimension_semantics=("parallel", "parallel", "arbitrary"),
            vmem_limit_bytes=_VMEM_LIMIT_BYTES,
        ),
        cost_estimate=cost,
    )(qkv, qkv, qkv)


# --------------------------------------------------------------------------
# Full module forward
# --------------------------------------------------------------------------
def attention_forward(x, params, num_heads, *, compute_dtype=None):
    B, N, C = x.shape
    assert C % num_heads == 0
    head_dim = C // num_heads
    scale = head_dim ** (-0.5)

    # --- QKV projection (qkv_bias=False) ---
    qkv = pallas_linear(x.reshape(B * N, C), params["w_qkv"],
                        compute_dtype=compute_dtype)            # (B*N, 3C)
    qkv = qkv.reshape(B, N, 3 * C)                              # metadata-only reshape

    # --- Fused multi-head flash attention, output directly in (B, N, C) ---
    out = pallas_flash_mhsa(qkv, num_heads, scale, compute_dtype=compute_dtype)

    # --- Output projection (with bias) ---
    out = pallas_linear(out.reshape(B * N, C), params["w_proj"], params["b_proj"],
                        compute_dtype=compute_dtype)
    # TODO(synk): attn_dropout / projection_dropout are identity (inference mode).
    return out.reshape(B, N, C)


# --------------------------------------------------------------------------
# Pure-JAX reference for sanity check
# --------------------------------------------------------------------------
def attention_reference(x, params, num_heads):
    B, N, C = x.shape
    head_dim = C // num_heads
    scale = head_dim ** (-0.5)
    qkv = x @ params["w_qkv"]
    qkv = qkv.reshape(B, N, 3, num_heads, head_dim).transpose(2, 0, 3, 1, 4)
    q, k, v = qkv[0], qkv[1], qkv[2]
    attn = jnp.einsum("bhnd,bhmd->bhnm", q, k) * scale
    attn = jax.nn.softmax(attn, axis=-1)
    out = jnp.einsum("bhnm,bhmd->bhnd", attn, v)
    out = out.transpose(0, 2, 1, 3).reshape(B, N, C)
    return out @ params["w_proj"] + params["b_proj"]


# --------------------------------------------------------------------------
# Main
# --------------------------------------------------------------------------
if __name__ == "__main__":
    B, N, dim, num_heads = 2, 128, 128, 2   # small but (8,128)-aligned shapes

    key = jax.random.PRNGKey(0)
    kx, kq, kp, kb = jax.random.split(key, 4)

    x = jax.random.normal(kx, (B, N, dim), dtype=jnp.float32)

    # Deterministic parameter init (PyTorch Linear-like uniform bound 1/sqrt(fan_in)).
    bound = 1.0 / (dim ** 0.5)
    params = {
        # stored as (in, out) so the kernels do x @ W directly
        "w_qkv": jax.random.uniform(kq, (dim, 3 * dim), jnp.float32, -bound, bound),
        "w_proj": jax.random.uniform(kp, (dim, dim), jnp.float32, -bound, bound),
        "b_proj": jax.random.uniform(kb, (dim,), jnp.float32, -bound, bound),
    }

    ref = attention_reference(x, params, num_heads)

    # f32 compute path (v5e-friendly), checked tightly against the reference.
    fwd_f32 = jax.jit(functools.partial(attention_forward, num_heads=num_heads))
    out = jax.block_until_ready(fwd_f32(x, params))
    assert out.shape == (B, N, dim)
    assert jnp.allclose(out, ref, atol=1e-3, rtol=1e-3), "f32 mismatch vs reference"

    # bf16 MXU compute path (v6e/v7x fast path), f32 accumulation; looser check.
    fwd_bf16 = jax.jit(functools.partial(attention_forward, num_heads=num_heads,
                                         compute_dtype=jnp.bfloat16))
    out_bf16 = jax.block_until_ready(fwd_bf16(x, params))
    assert out_bf16.shape == (B, N, dim)
    assert float(jnp.max(jnp.abs(out_bf16 - ref))) < 0.25, "bf16 mismatch vs reference"

    print("KERNEL_OK")
</pallas_src>

<mosaic_0001>
module attributes {stable_mosaic.version = 11 : i64} {
  func.func @_matmul_kernel(%arg0: i32, %arg1: i32, %arg2: i32, %arg3: memref<256x128xf32, #tpu.memory_space<vmem>>, %arg4: memref<128x128xf32, #tpu.memory_space<vmem>>, %arg5: memref<256x128xf32, #tpu.memory_space<vmem>>, %arg6: memref<256x128xf32, #tpu.memory_space<vmem>>) attributes {dimension_semantics = [#tpu.dimension_semantics<parallel>, #tpu.dimension_semantics<parallel>, #tpu.dimension_semantics<arbitrary>], iteration_bounds = array<i64: 1, 3, 1>, scalar_prefetch = 0 : i64, scratch_operands = 1 : i64, tpu.core_type = #tpu.core_type<tc>, window_params = [{transform_indices = @transform_0, window_bounds = array<i64: 256, 128>}, {transform_indices = @transform_1, window_bounds = array<i64: 128, 128>}, {transform_indices = @transform_2, window_bounds = array<i64: 256, 128>}]} {
    %c0_i32 = arith.constant 0 : i32
    %0 = arith.cmpi eq, %arg2, %c0_i32 : i32
    %1 = arith.extui %0 : i1 to i32
    %c0_i32_0 = arith.constant 0 : i32
    %2 = arith.cmpi ne, %1, %c0_i32_0 : i32
    scf.if %2 {
      %cst_10 = arith.constant 0.000000e+00 : f32
      %12 = vector.broadcast %cst_10 : f32 to vector<256x128xf32>
      %c0_11 = arith.constant 0 : index
      %c0_12 = arith.constant 0 : index
      %13 = vector.load %arg6[%c0_11, %c0_12] : memref<256x128xf32, #tpu.memory_space<vmem>>, vector<256x128xf32>
      tpu.vector_store %arg6[%c0_11, %c0_12], %12 {strides = array<i32>} : memref<256x128xf32, #tpu.memory_space<vmem>>, vector<256x128xf32>,
    } else {
    }
    %c0 = arith.constant 0 : index
    %c0_1 = arith.constant 0 : index
    %3 = vector.load %arg6[%c0, %c0_1] : memref<256x128xf32, #tpu.memory_space<vmem>>, vector<256x128xf32>
    %c0_2 = arith.constant 0 : index
    %c0_3 = arith.constant 0 : index
    %4 = vector.load %arg3[%c0_2, %c0_3] : memref<256x128xf32, #tpu.memory_space<vmem>>, vector<256x128xf32>
    %c0_4 = arith.constant 0 : index
    %c0_5 = arith.constant 0 : index
    %5 = vector.load %arg4[%c0_4, %c0_5] : memref<128x128xf32, #tpu.memory_space<vmem>>, vector<128x128xf32>
    %cst = arith.constant dense<0.000000e+00> : vector<256x128xf32>
    %6 = tpu.matmul %4, %5, %cst {dimension_numbers = #tpu.dot_dimension_numbers<[1], [0], [0], [1], [0, 0, 1, 1], [], []>} : vector<256x128xf32>, vector<128x128xf32>, vector<256x128xf32> -> vector<256x128xf32>
    %7 = arith.addf %3, %6 : vector<256x128xf32>
    %c0_6 = arith.constant 0 : index
    %c0_7 = arith.constant 0 : index
    %8 = vector.load %arg6[%c0_6, %c0_7] : memref<256x128xf32, #tpu.memory_space<vmem>>, vector<256x128xf32>
    tpu.vector_store %arg6[%c0_6, %c0_7], %7 {strides = array<i32>} : memref<256x128xf32, #tpu.memory_space<vmem>>, vector<256x128xf32>,
    %c0_i32_8 = arith.constant 0 : i32
    %9 = arith.cmpi eq, %arg2, %c0_i32_8 : i32
    %10 = arith.extui %9 : i1 to i32
    %c0_i32_9 = arith.constant 0 : i32
    %11 = arith.cmpi ne, %10, %c0_i32_9 : i32
    scf.if %11 {
      %c0_10 = arith.constant 0 : index
      %c0_11 = arith.constant 0 : index
      %12 = vector.load %arg6[%c0_10, %c0_11] : memref<256x128xf32, #tpu.memory_space<vmem>>, vector<256x128xf32>
      %c0_12 = arith.constant 0 : index
      %c0_13 = arith.constant 0 : index
      %13 = vector.load %arg5[%c0_12, %c0_13] : memref<256x128xf32, #tpu.memory_space<vmem>>, vector<256x128xf32>
      tpu.vector_store %arg5[%c0_12, %c0_13], %12 {strides = array<i32>} : memref<256x128xf32, #tpu.memory_space<vmem>>, vector<256x128xf32>,
    } else {
    }
    return
  }
  func.func @transform_0(%arg0: i32, %arg1: i32, %arg2: i32) -> (i32, i32) {
    %c0_i32 = arith.constant 0 : i32
    return %arg0, %arg2 : i32, i32
  }
  func.func @transform_1(%arg0: i32, %arg1: i32, %arg2: i32) -> (i32, i32) {
    %c0_i32 = arith.constant 0 : i32
    return %arg2, %arg1 : i32, i32
  }
  func.func @transform_2(%arg0: i32, %arg1: i32, %arg2: i32) -> (i32, i32) {
    %c0_i32 = arith.constant 0 : i32
    return %arg0, %arg1 : i32, i32
  }
}

module attributes {stable_mosaic.version = 11 : i64} {
  func.func @_matmul_bias_kernel(%arg0: i32, %arg1: i32, %arg2: i32, %arg3: memref<256x128xf32, #tpu.memory_space<vmem>>, %arg4: memref<128x128xf32, #tpu.memory_space<vmem>>, %arg5: memref<1x128xf32, #tpu.memory_space<vmem>>, %arg6: memref<256x128xf32, #tpu.memory_space<vmem>>, %arg7: memref<256x128xf32, #tpu.memory_space<vmem>>) attributes {dimension_semantics = [#tpu.dimension_semantics<parallel>, #tpu.dimension_semantics<parallel>, #tpu.dimension_semantics<arbitrary>], iteration_bounds = array<i64: 1, 1, 1>, scalar_prefetch = 0 : i64, scratch_operands = 1 : i64, tpu.core_type = #tpu.core_type<tc>, window_params = [{transform_indices = @transform_0, window_bounds = array<i64: 256, 128>}, {transform_indices = @transform_1, window_bounds = array<i64: 128, 128>}, {transform_indices = @transform_2, window_bounds = array<i64: 1, 128>}, {transform_indices = @transform_3, window_bounds = array<i64: 256, 128>}]} {
    %c0_i32 = arith.constant 0 : i32
    %0 = arith.cmpi eq, %arg2, %c0_i32 : i32
    %1 = arith.extui %0 : i1 to i32
    %c0_i32_0 = arith.constant 0 : i32
    %2 = arith.cmpi ne, %1, %c0_i32_0 : i32
    scf.if %2 {
      %cst_10 = arith.constant 0.000000e+00 : f32
      %12 = vector.broadcast %cst_10 : f32 to vector<256x128xf32>
      %c0_11 = arith.constant 0 : index
      %c0_12 = arith.constant 0 : index
      %13 = vector.load %arg7[%c0_11, %c0_12] : memref<256x128xf32, #tpu.memory_space<vmem>>, vector<256x128xf32>
      tpu.vector_store %arg7[%c0_11, %c0_12], %12 {strides = array<i32>} : memref<256x128xf32, #tpu.memory_space<vmem>>, vector<256x128xf32>,
    } else {
    }
    %c0 = arith.constant 0 : index
    %c0_1 = arith.constant 0 : index
    %3 = vector.load %arg7[%c0, %c0_1] : memref<256x128xf32, #tpu.memory_space<vmem>>, vector<256x128xf32>
    %c0_2 = arith.constant 0 : index
    %c0_3 = arith.constant 0 : index
    %4 = vector.load %arg3[%c0_2, %c0_3] : memref<256x128xf32, #tpu.memory_space<vmem>>, vector<256x128xf32>
    %c0_4 = arith.constant 0 : index
    %c0_5 = arith.constant 0 : index
    %5 = vector.load %arg4[%c0_4, %c0_5] : memref<128x128xf32, #tpu.memory_space<vmem>>, vector<128x128xf32>
    %cst = arith.constant dense<0.000000e+00> : vector<256x128xf32>
    %6 = tpu.matmul %4, %5, %cst {dimension_numbers = #tpu.dot_dimension_numbers<[1], [0], [0], [1], [0, 0, 1, 1], [], []>} : vector<256x128xf32>, vector<128x128xf32>, vector<256x128xf32> -> vector<256x128xf32>
    %7 = arith.addf %3, %6 : vector<256x128xf32>
    %c0_6 = arith.constant 0 : index
    %c0_7 = arith.constant 0 : index
    %8 = vector.load %arg7[%c0_6, %c0_7] : memref<256x128xf32, #tpu.memory_space<vmem>>, vector<256x128xf32>
    tpu.vector_store %arg7[%c0_6, %c0_7], %7 {strides = array<i32>} : memref<256x128xf32, #tpu.memory_space<vmem>>, vector<256x128xf32>,
    %c0_i32_8 = arith.constant 0 : i32
    %9 = arith.cmpi eq, %arg2, %c0_i32_8 : i32
    %10 = arith.extui %9 : i1 to i32
    %c0_i32_9 = arith.constant 0 : i32
    %11 = arith.cmpi ne, %10, %c0_i32_9 : i32
    scf.if %11 {
      %c0_10 = arith.constant 0 : index
      %c0_11 = arith.constant 0 : index
      %12 = vector.load %arg7[%c0_10, %c0_11] : memref<256x128xf32, #tpu.memory_space<vmem>>, vector<256x128xf32>
      %c0_12 = arith.constant 0 : index
      %c0_13 = arith.constant 0 : index
      %13 = vector.load %arg5[%c0_12, %c0_13] : memref<1x128xf32, #tpu.memory_space<vmem>>, vector<1x128xf32>
      %14 = vector.broadcast %13 : vector<1x128xf32> to vector<256x128xf32>
      %15 = arith.addf %12, %14 : vector<256x128xf32>
      %c0_14 = arith.constant 0 : index
      %c0_15 = arith.constant 0 : index
      %16 = vector.load %arg6[%c0_14, %c0_15] : memref<256x128xf32, #tpu.memory_space<vmem>>, vector<256x128xf32>
      tpu.vector_store %arg6[%c0_14, %c0_15], %15 {strides = array<i32>} : memref<256x128xf32, #tpu.memory_space<vmem>>, vector<256x128xf32>,
    } else {
    }
    return
  }
  func.func @transform_0(%arg0: i32, %arg1: i32, %arg2: i32) -> (i32, i32) {
    %c0_i32 = arith.constant 0 : i32
    return %arg0, %arg2 : i32, i32
  }
  func.func @transform_1(%arg0: i32, %arg1: i32, %arg2: i32) -> (i32, i32) {
    %c0_i32 = arith.constant 0 : i32
    return %arg2, %arg1 : i32, i32
  }
  func.func @transform_2(%arg0: i32, %arg1: i32, %arg2: i32) -> (i32, i32) {
    %c0_i32 = arith.constant 0 : i32
    %c0_i32_0 = arith.constant 0 : i32
    return %c0_i32, %arg1 : i32, i32
  }
  func.func @transform_3(%arg0: i32, %arg1: i32, %arg2: i32) -> (i32, i32) {
    %c0_i32 = arith.constant 0 : i32
    return %arg0, %arg1 : i32, i32
  }
}

module attributes {stable_mosaic.version = 11 : i64} {
  func.func @_flash_mhsa_kernel(%arg0: i32, %arg1: i32, %arg2: i32, %arg3: memref<1x128x128xf32, #tpu.memory_space<vmem>>, %arg4: memref<1x128x128xf32, #tpu.memory_space<vmem>>, %arg5: memref<1x128x128xf32, #tpu.memory_space<vmem>>, %arg6: memref<1x128x128xf32, #tpu.memory_space<vmem>>, %arg7: memref<128x128xf32, #tpu.memory_space<vmem>>, %arg8: memref<2x128x1xf32, #tpu.memory_space<vmem>>, %arg9: memref<2x128x1xf32, #tpu.memory_space<vmem>>) attributes {dimension_semantics = [#tpu.dimension_semantics<parallel>, #tpu.dimension_semantics<parallel>, #tpu.dimension_semantics<arbitrary>], iteration_bounds = array<i64: 2, 1, 1>, scalar_prefetch = 0 : i64, scratch_operands = 3 : i64, tpu.core_type = #tpu.core_type<tc>, window_params = [{transform_indices = @transform_0, window_bounds = array<i64: 1, 128, 128>}, {transform_indices = @transform_1, window_bounds = array<i64: 1, 128, 128>}, {transform_indices = @transform_2, window_bounds = array<i64: 1, 128, 128>}, {transform_indices = @transform_3, window_bounds = array<i64: 1, 128, 128>}]} {
    %c0_i32 = arith.constant 0 : i32
    %0 = arith.cmpi eq, %arg2, %c0_i32 : i32
    %1 = arith.extui %0 : i1 to i32
    %c0_i32_0 = arith.constant 0 : i32
    %2 = arith.cmpi ne, %1, %c0_i32_0 : i32
    scf.if %2 {
      %cst_57 = arith.constant 0.000000e+00 : f32
      %80 = vector.broadcast %cst_57 : f32 to vector<128x128xf32>
      %c0_58 = arith.constant 0 : index
      %c0_59 = arith.constant 0 : index
      %81 = vector.load %arg7[%c0_58, %c0_59] : memref<128x128xf32, #tpu.memory_space<vmem>>, vector<128x128xf32>
      tpu.vector_store %arg7[%c0_58, %c0_59], %80 {strides = array<i32>} : memref<128x128xf32, #tpu.memory_space<vmem>>, vector<128x128xf32>,
      %cst_60 = arith.constant 0xFF800000 : f32
      %82 = vector.broadcast %cst_60 : f32 to vector<2x128x1xf32>
      %c0_61 = arith.constant 0 : index
      %c0_62 = arith.constant 0 : index
      %c0_63 = arith.constant 0 : index
      %83 = vector.load %arg8[%c0_61, %c0_62, %c0_63] : memref<2x128x1xf32, #tpu.memory_space<vmem>>, vector<2x128x1xf32>
      tpu.vector_store %arg8[%c0_61, %c0_62, %c0_63], %82 {strides = array<i32>} : memref<2x128x1xf32, #tpu.memory_space<vmem>>, vector<2x128x1xf32>,
      %cst_64 = arith.constant 0.000000e+00 : f32
      %84 = vector.broadcast %cst_64 : f32 to vector<2x128x1xf32>
      %c0_65 = arith.constant 0 : index
      %c0_66 = arith.constant 0 : index
      %c0_67 = arith.constant 0 : index
      %85 = vector.load %arg9[%c0_65, %c0_66, %c0_67] : memref<2x128x1xf32, #tpu.memory_space<vmem>>, vector<2x128x1xf32>
      tpu.vector_store %arg9[%c0_65, %c0_66, %c0_67], %84 {strides = array<i32>} : memref<2x128x1xf32, #tpu.memory_space<vmem>>, vector<2x128x1xf32>,
    } else {
    }
    %c0 = arith.constant 0 : index
    %c0_1 = arith.constant 0 : index
    %c0_2 = arith.constant 0 : index
    %3 = vector.load %arg3[%c0, %c0_1, %c0_2] : memref<1x128x128xf32, #tpu.memory_space<vmem>>, vector<1x128x64xf32>
    %4 = vector.shape_cast %3 : vector<1x128x64xf32> to vector<128x64xf32>
    %cst = arith.constant 1.250000e-01 : f32
    %5 = vector.broadcast %cst : f32 to vector<128x64xf32>
    %6 = arith.mulf %4, %5 : vector<128x64xf32>
    %c0_3 = arith.constant 0 : index
    %c0_4 = arith.constant 0 : index
    %c0_5 = arith.constant 0 : index
    %7 = vector.load %arg4[%c0_3, %c0_4, %c0_5] : memref<1x128x128xf32, #tpu.memory_space<vmem>>, vector<1x128x64xf32>
    %8 = vector.shape_cast %7 : vector<1x128x64xf32> to vector<128x64xf32>
    %c0_6 = arith.constant 0 : index
    %c0_7 = arith.constant 0 : index
    %c0_8 = arith.constant 0 : index
    %9 = vector.load %arg5[%c0_6, %c0_7, %c0_8] : memref<1x128x128xf32, #tpu.memory_space<vmem>>, vector<1x128x64xf32>
    %10 = vector.shape_cast %9 : vector<1x128x64xf32> to vector<128x64xf32>
    %cst_9 = arith.constant dense<0.000000e+00> : vector<128x128xf32>
    %11 = tpu.matmul %6, %8, %cst_9 {dimension_numbers = #tpu.dot_dimension_numbers<[1], [1], [0], [0], [0, 0, 1, 0], [], []>} : vector<128x64xf32>, vector<128x64xf32>, vector<128x128xf32> -> vector<128x128xf32>
    %c0_10 = arith.constant 0 : index
    %c0_11 = arith.constant 0 : index
    %c0_12 = arith.constant 0 : index
    %12 = vector.load %arg8[%c0_10, %c0_11, %c0_12] : memref<2x128x1xf32, #tpu.memory_space<vmem>>, vector<1x128x1xf32>
    %13 = vector.shape_cast %12 : vector<1x128x1xf32> to vector<128x1xf32>
    %cst_13 = arith.constant dense<0xFF800000> : vector<128xf32>
    %14 = vector.multi_reduction <maximumf>, %11, %cst_13 [1] : vector<128x128xf32> to vector<128xf32>
    %15 = vector.shape_cast %14 : vector<128xf32> to vector<128x1xf32>
    %16 = arith.maximumf %13, %15 : vector<128x1xf32>
    %17 = arith.subf %13, %16 : vector<128x1xf32>
    %18 = math.exp %17 : vector<128x1xf32>
    %19 = vector.broadcast %16 : vector<128x1xf32> to vector<128x128xf32>
    %20 = arith.subf %11, %19 : vector<128x128xf32>
    %21 = math.exp %20 : vector<128x128xf32>
    %c0_14 = arith.constant 0 : index
    %c0_15 = arith.constant 0 : index
    %c0_16 = arith.constant 0 : index
    %22 = vector.load %arg9[%c0_14, %c0_15, %c0_16] : memref<2x128x1xf32, #tpu.memory_space<vmem>>, vector<1x128x1xf32>
    %23 = vector.shape_cast %22 : vector<1x128x1xf32> to vector<128x1xf32>
    %24 = arith.mulf %18, %23 : vector<128x1xf32>
    %cst_17 = arith.constant dense<0.000000e+00> : vector<128xf32>
    %25 = vector.multi_reduction <add>, %21, %cst_17 [1] : vector<128x128xf32> to vector<128xf32>
    %26 = vector.shape_cast %25 : vector<128xf32> to vector<128x1xf32>
    %27 = arith.addf %24, %26 : vector<128x1xf32>
    %c0_18 = arith.constant 0 : index
    %c0_19 = arith.constant 0 : index
    %c0_20 = arith.constant 0 : index
    %28 = vector.load %arg9[%c0_18, %c0_19, %c0_20] : memref<2x128x1xf32, #tpu.memory_space<vmem>>, vector<1x128x1xf32>
    %29 = vector.shape_cast %28 : vector<1x128x1xf32> to vector<128x1xf32>
    %30 = vector.shape_cast %27 : vector<128x1xf32> to vector<1x128x1xf32>
    tpu.vector_store %arg9[%c0_18, %c0_19, %c0_20], %30 {strides = array<i32>} : memref<2x128x1xf32, #tpu.memory_space<vmem>>, vector<1x128x1xf32>,
    %c0_21 = arith.constant 0 : index
    %c0_22 = arith.constant 0 : index
    %c0_23 = arith.constant 0 : index
    %31 = vector.load %arg8[%c0_21, %c0_22, %c0_23] : memref<2x128x1xf32, #tpu.memory_space<vmem>>, vector<1x128x1xf32>
    %32 = vector.shape_cast %31 : vector<1x128x1xf32> to vector<128x1xf32>
    %33 = vector.shape_cast %16 : vector<128x1xf32> to vector<1x128x1xf32>
    tpu.vector_store %arg8[%c0_21, %c0_22, %c0_23], %33 {strides = array<i32>} : memref<2x128x1xf32, #tpu.memory_space<vmem>>, vector<1x128x1xf32>,
    %cst_24 = arith.constant dense<0.000000e+00> : vector<128x64xf32>
    %34 = tpu.matmul %21, %10, %cst_24 {dimension_numbers = #tpu.dot_dimension_numbers<[1], [0], [0], [1], [0, 0, 1, 1], [], []>} : vector<128x128xf32>, vector<128x64xf32>, vector<128x64xf32> -> vector<128x64xf32>
    %c0_25 = arith.constant 0 : index
    %c0_26 = arith.constant 0 : index
    %35 = vector.load %arg7[%c0_25, %c0_26] : memref<128x128xf32, #tpu.memory_space<vmem>>, vector<128x64xf32>
    %36 = vector.broadcast %18 : vector<128x1xf32> to vector<128x64xf32>
    %37 = arith.mulf %36, %35 : vector<128x64xf32>
    %38 = arith.addf %37, %34 : vector<128x64xf32>
    %c0_27 = arith.constant 0 : index
    %c0_28 = arith.constant 0 : index
    %c64 = arith.constant 64 : index
    %39 = vector.load %arg3[%c0_27, %c0_28, %c64] : memref<1x128x128xf32, #tpu.memory_space<vmem>>, vector<1x128x64xf32>
    %40 = vector.shape_cast %39 : vector<1x128x64xf32> to vector<128x64xf32>
    %cst_29 = arith.constant 1.250000e-01 : f32
    %41 = vector.broadcast %cst_29 : f32 to vector<128x64xf32>
    %42 = arith.mulf %40, %41 : vector<128x64xf32>
    %c0_30 = arith.constant 0 : index
    %c0_31 = arith.constant 0 : index
    %c64_32 = arith.constant 64 : index
    %43 = vector.load %arg4[%c0_30, %c0_31, %c64_32] : memref<1x128x128xf32, #tpu.memory_space<vmem>>, vector<1x128x64xf32>
    %44 = vector.shape_cast %43 : vector<1x128x64xf32> to vector<128x64xf32>
    %c0_33 = arith.constant 0 : index
    %c0_34 = arith.constant 0 : index
    %c64_35 = arith.constant 64 : index
    %45 = vector.load %arg5[%c0_33, %c0_34, %c64_35] : memref<1x128x128xf32, #tpu.memory_space<vmem>>, vector<1x128x64xf32>
    %46 = vector.shape_cast %45 : vector<1x128x64xf32> to vector<128x64xf32>
    %cst_36 = arith.constant dense<0.000000e+00> : vector<128x128xf32>
    %47 = tpu.matmul %42, %44, %cst_36 {dimension_numbers = #tpu.dot_dimension_numbers<[1], [1], [0], [0], [0, 0, 1, 0], [], []>} : vector<128x64xf32>, vector<128x64xf32>, vector<128x128xf32> -> vector<128x128xf32>
    %c1 = arith.constant 1 : index
    %c0_37 = arith.constant 0 : index
    %c0_38 = arith.constant 0 : index
    %48 = vector.load %arg8[%c1, %c0_37, %c0_38] : memref<2x128x1xf32, #tpu.memory_space<vmem>>, vector<1x128x1xf32>
    %49 = vector.shape_cast %48 : vector<1x128x1xf32> to vector<128x1xf32>
    %cst_39 = arith.constant dense<0xFF800000> : vector<128xf32>
    %50 = vector.multi_reduction <maximumf>, %47, %cst_39 [1] : vector<128x128xf32> to vector<128xf32>
    %51 = vector.shape_cast %50 : vector<128xf32> to vector<128x1xf32>
    %52 = arith.maximumf %49, %51 : vector<128x1xf32>
    %53 = arith.subf %49, %52 : vector<128x1xf32>
    %54 = math.exp %53 : vector<128x1xf32>
    %55 = vector.broadcast %52 : vector<128x1xf32> to vector<128x128xf32>
    %56 = arith.subf %47, %55 : vector<128x128xf32>
    %57 = math.exp %56 : vector<128x128xf32>
    %c1_40 = arith.constant 1 : index
    %c0_41 = arith.constant 0 : index
    %c0_42 = arith.constant 0 : index
    %58 = vector.load %arg9[%c1_40, %c0_41, %c0_42] : memref<2x128x1xf32, #tpu.memory_space<vmem>>, vector<1x128x1xf32>
    %59 = vector.shape_cast %58 : vector<1x128x1xf32> to vector<128x1xf32>
    %60 = arith.mulf %54, %59 : vector<128x1xf32>
    %cst_43 = arith.constant dense<0.000000e+00> : vector<128xf32>
    %61 = vector.multi_reduction <add>, %57, %cst_43 [1] : vector<128x128xf32> to vector<128xf32>
    %62 = vector.shape_cast %61 : vector<128xf32> to vector<128x1xf32>
    %63 = arith.addf %60, %62 : vector<128x1xf32>
    %c1_44 = arith.constant 1 : index
    %c0_45 = arith.constant 0 : index
    %c0_46 = arith.constant 0 : index
    %64 = vector.load %arg9[%c1_44, %c0_45, %c0_46] : memref<2x128x1xf32, #tpu.memory_space<vmem>>, vector<1x128x1xf32>
    %65 = vector.shape_cast %64 : vector<1x128x1xf32> to vector<128x1xf32>
    %66 = vector.shape_cast %63 : vector<128x1xf32> to vector<1x128x1xf32>
    tpu.vector_store %arg9[%c1_44, %c0_45, %c0_46], %66 {strides = array<i32>} : memref<2x128x1xf32, #tpu.memory_space<vmem>>, vector<1x128x1xf32>,
    %c1_47 = arith.constant 1 : index
    %c0_48 = arith.constant 0 : index
    %c0_49 = arith.constant 0 : index
    %67 = vector.load %arg8[%c1_47, %c0_48, %c0_49] : memref<2x128x1xf32, #tpu.memory_space<vmem>>, vector<1x128x1xf32>
    %68 = vector.shape_cast %67 : vector<1x128x1xf32> to vector<128x1xf32>
    %69 = vector.shape_cast %52 : vector<128x1xf32> to vector<1x128x1xf32>
    tpu.vector_store %arg8[%c1_47, %c0_48, %c0_49], %69 {strides = array<i32>} : memref<2x128x1xf32, #tpu.memory_space<vmem>>, vector<1x128x1xf32>,
    %cst_50 = arith.constant dense<0.000000e+00> : vector<128x64xf32>
    %70 = tpu.matmul %57, %46, %cst_50 {dimension_numbers = #tpu.dot_dimension_numbers<[1], [0], [0], [1], [0, 0, 1, 1], [], []>} : vector<128x128xf32>, vector<128x64xf32>, vector<128x64xf32> -> vector<128x64xf32>
    %c0_51 = arith.constant 0 : index
    %c64_52 = arith.constant 64 : index
    %71 = vector.load %arg7[%c0_51, %c64_52] : memref<128x128xf32, #tpu.memory_space<vmem>>, vector<128x64xf32>
    %72 = vector.broadcast %54 : vector<128x1xf32> to vector<128x64xf32>
    %73 = arith.mulf %72, %71 : vector<128x64xf32>
    %74 = arith.addf %73, %70 : vector<128x64xf32>
    %75 = tpu.concatenate %38, %74 in 1 : vector<128x64xf32>, vector<128x64xf32> -> vector<128x128xf32>
    %c0_53 = arith.constant 0 : index
    %c0_54 = arith.constant 0 : index
    %76 = vector.load %arg7[%c0_53, %c0_54] : memref<128x128xf32, #tpu.memory_space<vmem>>, vector<128x128xf32>
    tpu.vector_store %arg7[%c0_53, %c0_54], %75 {strides = array<i32>} : memref<128x128xf32, #tpu.memory_space<vmem>>, vector<128x128xf32>,
    %c0_i32_55 = arith.constant 0 : i32
    %77 = arith.cmpi eq, %arg2, %c0_i32_55 : i32
    %78 = arith.extui %77 : i1 to i32
    %c0_i32_56 = arith.constant 0 : i32
    %79 = arith.cmpi ne, %78, %c0_i32_56 : i32
    scf.if %79 {
      %c0_57 = arith.constant 0 : index
      %c0_58 = arith.constant 0 : index
      %c0_59 = arith.constant 0 : index
      %80 = vector.load %arg9[%c0_57, %c0_58, %c0_59] : memref<2x128x1xf32, #tpu.memory_space<vmem>>, vector<1x128x1xf32>
      %81 = vector.shape_cast %80 : vector<1x128x1xf32> to vector<128x1xf32>
      %cst_60 = arith.constant 1.000000e+00 : f32
      %82 = vector.broadcast %cst_60 : f32 to vector<128x1xf32>
      %83 = arith.divf %82, %81 : vector<128x1xf32>
      %c0_61 = arith.constant 0 : index
      %c0_62 = arith.constant 0 : index
      %84 = vector.load %arg7[%c0_61, %c0_62] : memref<128x128xf32, #tpu.memory_space<vmem>>, vector<128x64xf32>
      %85 = vector.broadcast %83 : vector<128x1xf32> to vector<128x64xf32>
      %86 = arith.mulf %84, %85 : vector<128x64xf32>
      %c1_63 = arith.constant 1 : index
      %c0_64 = arith.constant 0 : index
      %c0_65 = arith.constant 0 : index
      %87 = vector.load %arg9[%c1_63, %c0_64, %c0_65] : memref<2x128x1xf32, #tpu.memory_space<vmem>>, vector<1x128x1xf32>
      %88 = vector.shape_cast %87 : vector<1x128x1xf32> to vector<128x1xf32>
      %cst_66 = arith.constant 1.000000e+00 : f32
      %89 = vector.broadcast %cst_66 : f32 to vector<128x1xf32>
      %90 = arith.divf %89, %88 : vector<128x1xf32>
      %c0_67 = arith.constant 0 : index
      %c64_68 = arith.constant 64 : index
      %91 = vector.load %arg7[%c0_67, %c64_68] : memref<128x128xf32, #tpu.memory_space<vmem>>, vector<128x64xf32>
      %92 = vector.broadcast %90 : vector<128x1xf32> to vector<128x64xf32>
      %93 = arith.mulf %91, %92 : vector<128x64xf32>
      %94 = tpu.concatenate %86, %93 in 1 : vector<128x64xf32>, vector<128x64xf32> -> vector<128x128xf32>
      %c0_69 = arith.constant 0 : index
      %c0_70 = arith.constant 0 : index
      %c0_71 = arith.constant 0 : index
      %95 = vector.load %arg6[%c0_69, %c0_70, %c0_71] : memref<1x128x128xf32, #tpu.memory_space<vmem>>, vector<1x128x128xf32>
      %96 = vector.shape_cast %95 : vector<1x128x128xf32> to vector<128x128xf32>
      %97 = vector.shape_cast %94 : vector<128x128xf32> to vector<1x128x128xf32>
      tpu.vector_store %arg6[%c0_69, %c0_70, %c0_71], %97 {strides = array<i32>} : memref<1x128x128xf32, #tpu.memory_space<vmem>>, vector<1x128x128xf32>,
    } else {
    }
    return
  }
  func.func @transform_0(%arg0: i32, %arg1: i32, %arg2: i32) -> (i32, i32, i32) {
    %c0_i32 = arith.constant 0 : i32
    %c0_i32_0 = arith.constant 0 : i32
    return %arg0, %arg1, %c0_i32 : i32, i32, i32
  }
  func.func @transform_1(%arg0: i32, %arg1: i32, %arg2: i32) -> (i32, i32, i32) {
    %c1_i32 = arith.constant 1 : i32
    %c0_i32 = arith.constant 0 : i32
    return %arg0, %arg2, %c1_i32 : i32, i32, i32
  }
  func.func @transform_2(%arg0: i32, %arg1: i32, %arg2: i32) -> (i32, i32, i32) {
    %c2_i32 = arith.constant 2 : i32
    %c0_i32 = arith.constant 0 : i32
    return %arg0, %arg2, %c2_i32 : i32, i32, i32
  }
  func.func @transform_3(%arg0: i32, %arg1: i32, %arg2: i32) -> (i32, i32, i32) {
    %c0_i32 = arith.constant 0 : i32
    %c0_i32_0 = arith.constant 0 : i32
    return %arg0, %arg1, %c0_i32 : i32, i32, i32
  }
}

</mosaic_0001>

<bundles_post_ra>
// kernel: attention_forward.5
= control target key start
LH: loop header
LB: loop body
LE: loop exit
PB: predicated region body
PF: predicated region fallthrough
CT: control target
= control target key end

     0   :  { %s714_s0 = inlined_call_operand.vmem [shape: f32[256,128], index: 0, kind: input, shape index: {}]   ;;  %s715_s1 = inlined_call_operand.vmem [shape: f32[128,128], index: 1, kind: input, shape index: {}]   ;;  %s716_s2 = inlined_call_operand.vmem [shape: f32[1,128], index: 2, kind: input, shape index: {}]   ;;  %s717_s3 = inlined_call_operand.hbm [shape: f32[256,128], index: 3, kind: output, shape index: {}]  }
   0x1   :  { %v130_v0 = vld [vmem:[%s715_s1 + $0x78] sm:$0xff]  ;;  %v129_v1 = vld [vmem:[%s715_s1 + $0x70] sm:$0xff]  ;;  %v128_v2 = vld [vmem:[%s715_s1 + $0x68] sm:$0xff] }
   0x2   :  { %430 = vmatpush.msra.mxu2 %v130_v0  ;;  %431 = vmatpush.msra.mxu3 %v130_v0  ;;  %v127_v3 = vld [vmem:[%s715_s1 + $0x60] sm:$0xff]  ;;  %v126_v4 = vld [vmem:[%s715_s1 + $0x58] sm:$0xff] }
   0x3   :  { %131 = vmatpush.msra.mxu0 %v130_v0  ;;  %429 = vmatpush.msra.mxu1 %v130_v0 }
   0x4   :  { %433 = vmatpush.msra.mxu2 %v129_v1  ;;  %434 = vmatpush.msra.mxu3 %v129_v1 }
   0x5   :  { %132 = vmatpush.msra.mxu0 %v129_v1  ;;  %432 = vmatpush.msra.mxu1 %v129_v1 }
   0x6   :  { %436 = vmatpush.msra.mxu2 %v128_v2  ;;  %437 = vmatpush.msra.mxu3 %v128_v2 }
   0x7   :  { %133 = vmatpush.msra.mxu0 %v128_v2  ;;  %435 = vmatpush.msra.mxu1 %v128_v2 }
   0x8   :  { %439 = vmatpush.msra.mxu2 %v127_v3  ;;  %440 = vmatpush.msra.mxu3 %v127_v3 }
   0x9   :  { %8 = vsyncpa [#allocation4], 0  ;;  %v125_v5 = vld [vmem:[%s715_s1 + $0x50] sm:$0xff]  ;;  %134 = vmatpush.msra.mxu0 %v127_v3  ;;  %438 = vmatpush.msra.mxu1 %v127_v3  ;;  %v124_v6 = vld [vmem:[%s715_s1 + $0x48] sm:$0xff]  ;;  %s417_s28 = sshll.u32 %s717_s3, 4  ;;  %s508_s29 = smov 128   ;;  %s418_s28 = int_to_ptr.hbm [resolvable:$true] %s417_s28 }
   0xa   :  { %442 = vmatpush.msra.mxu2 %v126_v4  ;;  %443 = vmatpush.msra.mxu3 %v126_v4  ;;  %v123_v7 = vld [vmem:[%s715_s1 + $0x40] sm:$0xff]  ;;  %v122_v8 = vld [vmem:[%s715_s1 + $0x38] sm:$0xff]  ;;  %v121_v9 = vld [vmem:[%s715_s1 + $0x30] sm:$0xff]  ;;  %s509_s30 = smov 8  }
   0xb   :  { %135 = vmatpush.msra.mxu0 %v126_v4  ;;  %441 = vmatpush.msra.mxu1 %v126_v4  ;;  %v120_v10 = vld [vmem:[%s715_s1 + $0x28] sm:$0xff]  ;;  %v119_v11 = vld [vmem:[%s715_s1 + $0x20] sm:$0xff]  ;;  %v118_v12 = vld [vmem:[%s715_s1 + $0x18] sm:$0xff] }
   0xc   :  { %445 = vmatpush.msra.mxu2 %v125_v5  ;;  %446 = vmatpush.msra.mxu3 %v125_v5  ;;  %v117_v13 = vld [vmem:[%s715_s1 + $0x10] sm:$0xff]  ;;  %v116_v14 = vld [vmem:[%s715_s1 + $0x8] sm:$0xff]  ;;  %v115_v15 = vld [vmem:[%s715_s1] sm:$0xff] }
   0xd   :  { %136 = vmatpush.msra.mxu0 %v125_v5  ;;  %444 = vmatpush.msra.mxu1 %v125_v5  ;;  %v99_v16 = vld [vmem:[%s714_s0 + $0x80] sm:$0xff]  ;;  %v100_v20 = vld [vmem:[%s714_s0 + $0x88] sm:$0xff]  ;;  %v101_v24 = vld [vmem:[%s714_s0 + $0x90] sm:$0xff] }
   0xe   :  { %448 = vmatpush.msra.mxu2 %v124_v6  ;;  %449 = vmatpush.msra.mxu3 %v124_v6  ;;  %v107_v17 = vld [vmem:[%s714_s0 + $0xc0] sm:$0xff]  ;;  %v108_v21 = vld [vmem:[%s714_s0 + $0xc8] sm:$0xff]  ;;  %v109_v25 = vld [vmem:[%s714_s0 + $0xd0] sm:$0xff] }
   0xf   :  { %137 = vmatpush.msra.mxu0 %v124_v6  ;;  %447 = vmatpush.msra.mxu1 %v124_v6  ;;  %v83_v18 = vld [vmem:[%s714_s0] sm:$0xff]  ;;  %v84_v22 = vld [vmem:[%s714_s0 + $0x8] sm:$0xff]  ;;  %v85_v26 = vld [vmem:[%s714_s0 + $0x10] sm:$0xff] }
  0x10   :  { %451 = vmatpush.msra.mxu2 %v123_v7  ;;  %452 = vmatpush.msra.mxu3 %v123_v7  ;;  %v91_v19 = vld [vmem:[%s714_s0 + $0x40] sm:$0xff]  ;;  %v92_v23 = vld [vmem:[%s714_s0 + $0x48] sm:$0xff]  ;;  %v93_v27 = vld [vmem:[%s714_s0 + $0x50] sm:$0xff] }
  0x11   :  { %138 = vmatpush.msra.mxu0 %v123_v7  ;;  %450 = vmatpush.msra.mxu1 %v123_v7  ;;  %v102_v28 = vld [vmem:[%s714_s0 + $0x98] sm:$0xff]  ;;  %v103_v32 = vld [vmem:[%s714_s0 + $0xa0] sm:$0xff]  ;;  %v104_v36 = vld [vmem:[%s714_s0 + $0xa8] sm:$0xff] }
  0x12   :  { %454 = vmatpush.msra.mxu2 %v122_v8  ;;  %455 = vmatpush.msra.mxu3 %v122_v8  ;;  %v110_v29 = vld [vmem:[%s714_s0 + $0xd8] sm:$0xff]  ;;  %v111_v33 = vld [vmem:[%s714_s0 + $0xe0] sm:$0xff]  ;;  %v112_v37 = vld [vmem:[%s714_s0 + $0xe8] sm:$0xff] }
  0x13   :  { %139 = vmatpush.msra.mxu0 %v122_v8  ;;  %453 = vmatpush.msra.mxu1 %v122_v8  ;;  %v86_v30 = vld [vmem:[%s714_s0 + $0x18] sm:$0xff]  ;;  %v87_v34 = vld [vmem:[%s714_s0 + $0x20] sm:$0xff]  ;;  %v88_v38 = vld [vmem:[%s714_s0 + $0x28] sm:$0xff] }
  0x14   :  { %457 = vmatpush.msra.mxu2 %v121_v9  ;;  %458 = vmatpush.msra.mxu3 %v121_v9  ;;  %v94_v31 = vld [vmem:[%s714_s0 + $0x58] sm:$0xff]  ;;  %v95_v35 = vld [vmem:[%s714_s0 + $0x60] sm:$0xff]  ;;  %v96_v39 = vld [vmem:[%s714_s0 + $0x68] sm:$0xff] }
  0x15   :  { %140 = vmatpush.msra.mxu0 %v121_v9  ;;  %456 = vmatpush.msra.mxu1 %v121_v9  ;;  %v105_v40 = vld [vmem:[%s714_s0 + $0xb0] sm:$0xff]  ;;  %v106_v44 = vld [vmem:[%s714_s0 + $0xb8] sm:$0xff]  ;;  %v677_v48 = vld [vmem:[%s716_s2] ss:$0 sm:$0xff] }
  0x16   :  { %460 = vmatpush.msra.mxu2 %v120_v10  ;;  %461 = vmatpush.msra.mxu3 %v120_v10  ;;  %v113_v41 = vld [vmem:[%s714_s0 + $0xf0] sm:$0xff]  ;;  %v114_v45 = vld [vmem:[%s714_s0 + $0xf8] sm:$0xff] }
  0x17   :  { %141 = vmatpush.msra.mxu0 %v120_v10  ;;  %459 = vmatpush.msra.mxu1 %v120_v10  ;;  %v89_v42 = vld [vmem:[%s714_s0 + $0x30] sm:$0xff]  ;;  %v90_v46 = vld [vmem:[%s714_s0 + $0x38] sm:$0xff] }
  0x18   :  { %463 = vmatpush.msra.mxu2 %v119_v11  ;;  %464 = vmatpush.msra.mxu3 %v119_v11  ;;  %v97_v43 = vld [vmem:[%s714_s0 + $0x70] sm:$0xff]  ;;  %v98_v47 = vld [vmem:[%s714_s0 + $0x78] sm:$0xff]  ;;  %s507_s0 = smov [#allocation3]  }
  0x19   :  { %142 = vmatpush.msra.mxu0 %v119_v11  ;;  %462 = vmatpush.msra.mxu1 %v119_v11  ;;  %s415_s2 = sshll.u32 %s507_s0, 4  ;;  %s416_s2 = int_to_ptr.vmem [resolvable:$true] %s415_s2 }
  0x1a   :  { %466 = vmatpush.msra.mxu2 %v118_v12  ;;  %467 = vmatpush.msra.mxu3 %v118_v12 }
  0x1b   :  { %143 = vmatpush.msra.mxu0 %v118_v12  ;;  %465 = vmatpush.msra.mxu1 %v118_v12 }
  0x1c   :  { %469 = vmatpush.msra.mxu2 %v117_v13  ;;  %470 = vmatpush.msra.mxu3 %v117_v13 }
  0x1d   :  { %144 = vmatpush.msra.mxu0 %v117_v13  ;;  %468 = vmatpush.msra.mxu1 %v117_v13 }
  0x1e   :  { %472 = vmatpush.msra.mxu2 %v116_v14  ;;  %473 = vmatpush.msra.mxu3 %v116_v14 }
  0x1f   :  { %145 = vmatpush.msra.mxu0 %v116_v14  ;;  %471 = vmatpush.msra.mxu1 %v116_v14 }
  0x20   :  { %475 = vmatpush.msra.mxu2 %v115_v15  ;;  %476 = vmatpush.msra.mxu3 %v115_v15 }
  0x21   :  { %195 = vmatmul.f32.vlgmr.msra.gmra.mxu2 %v99_v16  ;;  %219 = vmatmul.f32.vlgmr.msra.gmra.mxu3 %v107_v17 }
  0x22   :  { %146 = vmatpush.msra.mxu0 %v115_v15  ;;  %474 = vmatpush.msra.mxu1 %v115_v15 }
  0x23   :  { %147 = vmatmul.f32.vlgmr.msra.gmra.mxu0 %v83_v18  ;;  %171 = vmatmul.f32.vlgmr.msra.gmra.mxu1 %v91_v19 }
  0x29   :  { %198 = vmatmul.f32.gmra.mxu2 %v100_v20  ;;  %222 = vmatmul.f32.gmra.mxu3 %v108_v21 }
  0x2b   :  { %150 = vmatmul.f32.gmra.mxu0 %v84_v22  ;;  %174 = vmatmul.f32.gmra.mxu1 %v92_v23 }
  0x31   :  { %201 = vmatmul.f32.gmra.mxu2 %v101_v24  ;;  %225 = vmatmul.f32.gmra.mxu3 %v109_v25 }
  0x33   :  { %153 = vmatmul.f32.gmra.mxu0 %v85_v26  ;;  %177 = vmatmul.f32.gmra.mxu1 %v93_v27 }
  0x39   :  { %204 = vmatmul.f32.gmra.mxu2 %v102_v28  ;;  %228 = vmatmul.f32.gmra.mxu3 %v110_v29 }
  0x3b   :  { %156 = vmatmul.f32.gmra.mxu0 %v86_v30  ;;  %180 = vmatmul.f32.gmra.mxu1 %v94_v31 }
  0x41   :  { %207 = vmatmul.f32.gmra.mxu2 %v103_v32  ;;  %231 = vmatmul.f32.gmra.mxu3 %v111_v33 }
  0x43   :  { %159 = vmatmul.f32.gmra.mxu0 %v87_v34  ;;  %183 = vmatmul.f32.gmra.mxu1 %v95_v35 }
  0x49   :  { %210 = vmatmul.f32.gmra.mxu2 %v104_v36  ;;  %234 = vmatmul.f32.gmra.mxu3 %v112_v37 }
  0x4b   :  { %162 = vmatmul.f32.gmra.mxu0 %v88_v38  ;;  %186 = vmatmul.f32.gmra.mxu1 %v96_v39 }
  0x51   :  { %213 = vmatmul.f32.gmra.mxu2 %v105_v40  ;;  %237 = vmatmul.f32.gmra.mxu3 %v113_v41 }
  0x53   :  { %165 = vmatmul.f32.gmra.mxu0 %v89_v42  ;;  %189 = vmatmul.f32.gmra.mxu1 %v97_v43 }
  0x59   :  { %216 = vmatmul.f32.gmra.mxu2 %v106_v44  ;;  %240 = vmatmul.f32.gmra.mxu3 %v114_v45 }
  0x5b   :  { %168 = vmatmul.f32.gmra.mxu0 %v90_v46  ;;  %192 = vmatmul.f32.gmra.mxu1 %v98_v47 }
  0xa0   :  { %v148_v49 = vpop.f32.mrf.mxu0  ;;  %v172_v50 = vpop.f32.mrf.mxu1 }
  0xa1   :  { %v347_v51 = vadd.f32 %v677_v48, %v148_v49  ;;  %v355_v52 = vadd.f32 %v677_v48, %v172_v50 }
  0xa3   :  { %379 = vst [vmem:[#allocation3] sm:$0xff] %v347_v51 }
  0xa4   :  { %387 = vst [vmem:[#allocation3 + $0x40] sm:$0xff] %v355_v52  ;;  %v196_v53 = vpop.f32.mrf.mxu2  ;;  %v220_v54 = vpop.f32.mrf.mxu3 }
  0xa5   :  { %v363_v55 = vadd.f32 %v677_v48, %v196_v53  ;;  %v371_v56 = vadd.f32 %v677_v48, %v220_v54 }
  0xa7   :  { %395 = vst [vmem:[#allocation3 + $0x80] sm:$0xff] %v363_v55 }
  0xa8   :  { %403 = vst [vmem:[#allocation3 + $0xc0] sm:$0xff] %v371_v56  ;;  %v151_v57 = vpop.f32.mrf.mxu0  ;;  %v175_v58 = vpop.f32.mrf.mxu1 }
  0xa9   :  { %v348_v59 = vadd.f32 %v677_v48, %v151_v57  ;;  %v356_v60 = vadd.f32 %v677_v48, %v175_v58 }
  0xab   :  { %380 = vst [vmem:[#allocation3 + $0x8] sm:$0xff] %v348_v59 }
  0xac   :  { %388 = vst [vmem:[#allocation3 + $0x48] sm:$0xff] %v356_v60  ;;  %v199_v61 = vpop.f32.mrf.mxu2  ;;  %v223_v62 = vpop.f32.mrf.mxu3 }
  0xad   :  { %v364_v63 = vadd.f32 %v677_v48, %v199_v61  ;;  %v372_v0 = vadd.f32 %v677_v48, %v223_v62 }
  0xaf   :  { %396 = vst [vmem:[#allocation3 + $0x88] sm:$0xff] %v364_v63 }
  0xb0   :  { %404 = vst [vmem:[#allocation3 + $0xc8] sm:$0xff] %v372_v0  ;;  %v154_v1 = vpop.f32.mrf.mxu0  ;;  %v178_v2 = vpop.f32.mrf.mxu1 }
  0xb1   :  { %v349_v3 = vadd.f32 %v677_v48, %v154_v1  ;;  %v357_v4 = vadd.f32 %v677_v48, %v178_v2 }
  0xb3   :  { %381 = vst [vmem:[#allocation3 + $0x10] sm:$0xff] %v349_v3 }
  0xb4   :  { %389 = vst [vmem:[#allocation3 + $0x50] sm:$0xff] %v357_v4  ;;  %v202_v5 = vpop.f32.mrf.mxu2  ;;  %v226_v6 = vpop.f32.mrf.mxu3 }
  0xb5   :  { %v365_v7 = vadd.f32 %v677_v48, %v202_v5  ;;  %v373_v8 = vadd.f32 %v677_v48, %v226_v6 }
  0xb7   :  { %397 = vst [vmem:[#allocation3 + $0x90] sm:$0xff] %v365_v7 }
  0xb8   :  { %405 = vst [vmem:[#allocation3 + $0xd0] sm:$0xff] %v373_v8  ;;  %v157_v9 = vpop.f32.mrf.mxu0  ;;  %v181_v10 = vpop.f32.mrf.mxu1 }
  0xb9   :  { %v350_v11 = vadd.f32 %v677_v48, %v157_v9  ;;  %v358_v12 = vadd.f32 %v677_v48, %v181_v10 }
  0xbb   :  { %382 = vst [vmem:[#allocation3 + $0x18] sm:$0xff] %v350_v11 }
  0xbc   :  { %390 = vst [vmem:[#allocation3 + $0x58] sm:$0xff] %v358_v12  ;;  %v205_v13 = vpop.f32.mrf.mxu2  ;;  %v229_v14 = vpop.f32.mrf.mxu3 }
  0xbd   :  { %v366_v15 = vadd.f32 %v677_v48, %v205_v13  ;;  %v374_v16 = vadd.f32 %v677_v48, %v229_v14 }
  0xbf   :  { %398 = vst [vmem:[#allocation3 + $0x98] sm:$0xff] %v366_v15 }
  0xc0   :  { %406 = vst [vmem:[#allocation3 + $0xd8] sm:$0xff] %v374_v16  ;;  %v160_v17 = vpop.f32.mrf.mxu0  ;;  %v184_v18 = vpop.f32.mrf.mxu1 }
  0xc1   :  { %v351_v19 = vadd.f32 %v677_v48, %v160_v17  ;;  %v359_v20 = vadd.f32 %v677_v48, %v184_v18 }
  0xc3   :  { %383 = vst [vmem:[#allocation3 + $0x20] sm:$0xff] %v351_v19 }
  0xc4   :  { %391 = vst [vmem:[#allocation3 + $0x60] sm:$0xff] %v359_v20  ;;  %v208_v21 = vpop.f32.mrf.mxu2  ;;  %v232_v22 = vpop.f32.mrf.mxu3 }
  0xc5   :  { %v367_v23 = vadd.f32 %v677_v48, %v208_v21  ;;  %v375_v24 = vadd.f32 %v677_v48, %v232_v22 }
  0xc7   :  { %399 = vst [vmem:[#allocation3 + $0xa0] sm:$0xff] %v367_v23 }
  0xc8   :  { %407 = vst [vmem:[#allocation3 + $0xe0] sm:$0xff] %v375_v24  ;;  %v163_v25 = vpop.f32.mrf.mxu0  ;;  %v187_v26 = vpop.f32.mrf.mxu1 }
  0xc9   :  { %v352_v27 = vadd.f32 %v677_v48, %v163_v25  ;;  %v360_v28 = vadd.f32 %v677_v48, %v187_v26 }
  0xcb   :  { %384 = vst [vmem:[#allocation3 + $0x28] sm:$0xff] %v352_v27 }
  0xcc   :  { %392 = vst [vmem:[#allocation3 + $0x68] sm:$0xff] %v360_v28  ;;  %v211_v29 = vpop.f32.mrf.mxu2  ;;  %v235_v30 = vpop.f32.mrf.mxu3 }
  0xcd   :  { %v368_v31 = vadd.f32 %v677_v48, %v211_v29  ;;  %v376_v32 = vadd.f32 %v677_v48, %v235_v30 }
  0xcf   :  { %400 = vst [vmem:[#allocation3 + $0xa8] sm:$0xff] %v368_v31 }
  0xd0   :  { %408 = vst [vmem:[#allocation3 + $0xe8] sm:$0xff] %v376_v32  ;;  %v166_v33 = vpop.f32.mrf.mxu0  ;;  %v190_v34 = vpop.f32.mrf.mxu1 }
  0xd1   :  { %v353_v35 = vadd.f32 %v677_v48, %v166_v33  ;;  %v361_v36 = vadd.f32 %v677_v48, %v190_v34 }
  0xd3   :  { %385 = vst [vmem:[#allocation3 + $0x30] sm:$0xff] %v353_v35 }
  0xd4   :  { %393 = vst [vmem:[#allocation3 + $0x70] sm:$0xff] %v361_v36  ;;  %v214_v37 = vpop.f32.mrf.mxu2  ;;  %v238_v38 = vpop.f32.mrf.mxu3 }
  0xd5   :  { %v369_v39 = vadd.f32 %v677_v48, %v214_v37  ;;  %v377_v40 = vadd.f32 %v677_v48, %v238_v38 }
  0xd7   :  { %401 = vst [vmem:[#allocation3 + $0xb0] sm:$0xff] %v369_v39 }
  0xd8   :  { %409 = vst [vmem:[#allocation3 + $0xf0] sm:$0xff] %v377_v40  ;;  %v169_v41 = vpop.f32.mrf.mxu0  ;;  %v193_v42 = vpop.f32.mrf.mxu1 }
  0xd9   :  { %v354_v43 = vadd.f32 %v677_v48, %v169_v41  ;;  %v362_v44 = vadd.f32 %v677_v48, %v193_v42 }
  0xdb   :  { %386 = vst [vmem:[#allocation3 + $0x38] sm:$0xff] %v354_v43 }
  0xdc   :  { %394 = vst [vmem:[#allocation3 + $0x78] sm:$0xff] %v362_v44  ;;  %v217_v45 = vpop.f32.mrf.mxu2  ;;  %v241_v46 = vpop.f32.mrf.mxu3 }
  0xdd   :  { %v370_v47 = vadd.f32 %v677_v48, %v217_v45  ;;  %v378_v49 = vadd.f32 %v677_v48, %v241_v46 }
  0xdf   :  { %402 = vst [vmem:[#allocation3 + $0xb8] sm:$0xff] %v370_v47 }
  0xe0   :  { %410 = vst [vmem:[#allocation3 + $0xf8] sm:$0xff] %v378_v49 }
  0xe1   :  { %423 = dma.vmem_to_hbm [thread:$0]  %s416_s2, 4096, %s418_s28, [#allocation4], %s508_s29, %s508_s29, %s509_s30  }
  0xe2   :  { %505 = dma.done.wait [#allocation4], 4096  }
  0xe3   :  { %506 = vsyncadd [#allocation4], 4294963200 }
  0xe4   :  { %428 = vsyncpa [#allocation4], 1 }

// kernel: attention_forward.3
= control target key start
LH: loop header
LB: loop body
LE: loop exit
PB: predicated region body
PF: predicated region fallthrough
CT: control target
= control target key end

     0   :  { %7 = vsyncpa [#allocation4], 0  ;;  %s1357_s0 = inlined_call_operand.hbm [shape: f32[256,128], index: 0, kind: input, shape index: {}]   ;;  %s1358_s1 = inlined_call_operand.hbm [shape: f32[128,384], index: 1, kind: input, shape index: {}]   ;;  %s1359_s2 = inlined_call_operand.vmem [shape: f32[256,384], index: 2, kind: output, shape index: {}]  }
   0x1   :  { %8 = vsyncpa [#allocation6], 0 }
   0x2   :  { %10 = vsyncpa [#allocation6 + $0x1], 0  ;;  %s1105_s9 = smov 0   ;;  %s1107_s10 = smov 0  }
   0x3   :  { %s1109_s11 = smov 0   ;;  %s1111_s12 = smov 0  }
   0x4   :  { %s1113_s13 = smov 0   ;;  %s1115_s14 = smov 0  }
   0x5 LB: > { %s838_s15 = sadd.s32 4294967295, %s1084_s14   ;;  %p85_p0 = scmp.ne.s32.totalorder %s1068_s10, %s1064_s9  ;;  %s1084_s14 = sphi %s1115_s14, %s16_s14   ;;  %s1080_s13 = sphi %s1113_s13, %s1370_s13   ;;  %s1076_s12 = sphi %s1111_s12, %s1369_s12   ;;  %s1072_s11 = sphi %s1109_s11, %s1368_s11   ;;  %s1068_s10 = sphi %s1107_s10, %s1367_s10   ;;  %s1064_s9 = sphi %s1105_s9, %s1366_s9  }
   0x6   : > { %p1135_p1 = scmp.eq.s32.totalorder %s838_s15, 0  ;;  %p1139_p2 = scmp.eq.s32.totalorder %s838_s15, 2 }
   0x7   : > { %p840_p3 = scmp.ge.s32.totalorder %s1084_s14, 1  ;;  %p124_p4 = scmp.lt.s32.totalorder %s1084_s14, 4 }
   0x8   : > { %p1147_p5 = por %p1135_p1, %p85_p0  ;;  %s139_s22 = sshll.u32 %s1357_s0, 4  ;;  %s140_s22 = int_to_ptr.hbm [resolvable:$true] %s139_s22 }
   0x9   : > { %p1151_p6 = pnand %p840_p3, %p124_p4  ;;  %s1086_s23 = smov [#allocation3]  }
   0xa   : > { %s141_s24 = sshll.u32 %s1086_s23, 4  ;;  %s1087_s25 = smov 128   ;;  %s142_s24 = int_to_ptr.vmem [resolvable:$true] %s141_s24 }
   0xb   : > { %p907_p7 = pneg %p1151_p6  ;;  %s1088_s26 = smov 8  }
   0xc   : > { %s31_s27 = sadd.s32 1, %s1080_s13  ;;  %s72_s28 = sadd.s32 1, %s1072_s11 }
   0xd   : > { %p908_p8 = pnand %p907_p7, %p1135_p1  ;;  %p33_p9 = scmp.ge.s32.totalorder %s31_s27, 3 }
   0xe   : > { %p79_p10 = scmp.ne.s32.totalorder %s1072_s11, %s1068_s10  ;;  %p80_p11 = scmp.eq.s32.totalorder %s1084_s14, 0 }
   0xf   : > { %910 = dma.hbm_to_vmem [thread:$0]  (!%p908_p8), %s140_s22, 4096, %s142_s24, [#allocation4], %s1087_s25, %s1087_s25, %s1088_s26  }
  0x10   : > { %p916_p12 = scmp.lt.s32.totalorder %s1084_s14, 3  ;;  %s1372_s27 = smov (%p33_p9, %s31_s27), 0 }
  0x11   : > { %p1173_p13 = por %p80_p11, %p79_p10  ;;  %p1179_p0 = por %p1139_p2, %p79_p10 }
  0x12   : > { %s68_s3 = ssub.s32 %s1080_s13, %s1372_s27  ;;  %s155_s4 = sand.u32 1, %s1072_s11  }
  0x13   : > { %p70_p3 = scmp.eq.s32.totalorder %s68_s3, 0  ;;  %s843_s5 = sshll.u32 %s155_s4, 7 }
  0x14   : > { %s844_s6 = sshll.u32 %s1080_s13, 3  ;;  %s159_s21 = scalar_lea.vmem [#allocation5], %s843_s5 }
  0x15   : > { %s1188_s7 = scalar_select %p70_p3, %s1072_s11, %s72_s28  }
  0x16   : > { %s166_s15 = scalar_lea.hbm %s1358_s1, %s844_s6  ;;  %s169_s22 = sshll.u32 %s159_s21, 4  ;;  %s170_s22 = int_to_ptr.vmem [resolvable:$true] %s169_s22 }
  0x17   : > { %s167_s20 = sshll.u32 %s166_s15, 4  ;;  %p912_p2 = pnand %p916_p12, %p1173_p13  ;;  %s168_s20 = int_to_ptr.hbm [resolvable:$true] %s167_s20 }
  0x18   : > { %s156_s17 = scalar_lea.sflag [#allocation6], %s155_s4  ;;  %s1089_s23 = smov 384  }
  0x19   : > { %914 = dma.hbm_to_vmem [thread:$0]  (!%p912_p2), %s168_s20, 2048, %s170_s22, %s156_s17, %s1089_s23, %s1087_s25, %s1088_s26  }
  0x1a   : > { %181 = sbr.rel (%p1151_p6) target bundleno = 266 (0x10a), region = 28 }
  0x1f   : > { %1055 = dma.done.wait (%p1135_p1), [#allocation4], 4096  }
  0x20   : > { %1057 = vsyncadd (%p1135_p1), [#allocation4], 4294963200  ;;  %s1206_s24 = sand.u32 1, %s1068_s10  }
  0x21   : > { %s847_s28 = sshll.u32 %s1206_s24, 7  ;;  %s189_s29 = scalar_lea.sflag [#allocation6], %s1206_s24 }
  0x22   : > { %s1210_s3 = scalar_lea.vmem [#allocation5], %s847_s28 }
  0x23   : > { %1059 = dma.done.wait (%p1147_p5), %s189_s29, 2048  }
  0x24   : > { %1061 = vsyncadd (%p1147_p5), %s189_s29, 4294965248  ;;  %v331_v0 = vld [vmem:[%s1210_s3 + $0x78] sm:$0xff]  ;;  %v330_v1 = vld [vmem:[%s1210_s3 + $0x70] sm:$0xff]  ;;  %s848_s16 = sshll.u32 %s1206_s24, 8  ;;  %s850_s19 = sshll.u32 (%p1179_p0), %s1076_s12, 3 }
  0x25   : > { %854 = vmatpush.msra.mxu2 %v331_v0  ;;  %855 = vmatpush.msra.mxu3 %v331_v0  ;;  %v329_v2 = vld [vmem:[%s1210_s3 + $0x68] sm:$0xff]  ;;  %v328_v3 = vld [vmem:[%s1210_s3 + $0x60] sm:$0xff]  ;;  %v327_v4 = vld [vmem:[%s1210_s3 + $0x58] sm:$0xff]  ;;  %s1233_s18 = scalar_lea.vmem [#allocation7], %s848_s16  ;;  %s1275_s4 = scalar_lea.vmem (%p1179_p0), %s1359_s2, %s850_s19 }
  0x26   : > { %332 = vmatpush.msra.mxu0 %v331_v0  ;;  %853 = vmatpush.msra.mxu1 %v331_v0  ;;  %v326_v5 = vld [vmem:[%s1210_s3 + $0x50] sm:$0xff]  ;;  %v325_v6 = vld [vmem:[%s1210_s3 + $0x48] sm:$0xff]  ;;  %v324_v7 = vld [vmem:[%s1210_s3 + $0x40] sm:$0xff] }
  0x27   : > { %857 = vmatpush.msra.mxu2 %v330_v1  ;;  %858 = vmatpush.msra.mxu3 %v330_v1  ;;  %v323_v8 = vld [vmem:[%s1210_s3 + $0x38] sm:$0xff]  ;;  %v322_v9 = vld [vmem:[%s1210_s3 + $0x30] sm:$0xff]  ;;  %v321_v10 = vld [vmem:[%s1210_s3 + $0x28] sm:$0xff] }
  0x28   : > { %333 = vmatpush.msra.mxu0 %v330_v1  ;;  %856 = vmatpush.msra.mxu1 %v330_v1  ;;  %v320_v11 = vld [vmem:[%s1210_s3 + $0x20] sm:$0xff]  ;;  %v319_v12 = vld [vmem:[%s1210_s3 + $0x18] sm:$0xff]  ;;  %v318_v13 = vld [vmem:[%s1210_s3 + $0x10] sm:$0xff] }
  0x29   : > { %860 = vmatpush.msra.mxu2 %v329_v2  ;;  %861 = vmatpush.msra.mxu3 %v329_v2  ;;  %v317_v14 = vld [vmem:[%s1210_s3 + $0x8] sm:$0xff]  ;;  %v316_v15 = vld [vmem:[%s1210_s3] sm:$0xff]  ;;  %v302_v24 = vld [vmem:[#allocation3 + $0x90] sm:$0xff] }
  0x2a   : > { %334 = vmatpush.msra.mxu0 %v329_v2  ;;  %859 = vmatpush.msra.mxu1 %v329_v2  ;;  %v300_v16 = vld [vmem:[#allocation3 + $0x80] sm:$0xff]  ;;  %v301_v20 = vld [vmem:[#allocation3 + $0x88] sm:$0xff]  ;;  %v310_v25 = vld [vmem:[#allocation3 + $0xd0] sm:$0xff] }
  0x2b   : > { %863 = vmatpush.msra.mxu2 %v328_v3  ;;  %864 = vmatpush.msra.mxu3 %v328_v3  ;;  %v308_v17 = vld [vmem:[#allocation3 + $0xc0] sm:$0xff]  ;;  %v309_v21 = vld [vmem:[#allocation3 + $0xc8] sm:$0xff]  ;;  %v286_v26 = vld [vmem:[#allocation3 + $0x10] sm:$0xff] }
  0x2c   : > { %335 = vmatpush.msra.mxu0 %v328_v3  ;;  %862 = vmatpush.msra.mxu1 %v328_v3  ;;  %v284_v18 = vld [vmem:[#allocation3] sm:$0xff]  ;;  %v285_v22 = vld [vmem:[#allocation3 + $0x8] sm:$0xff]  ;;  %v294_v27 = vld [vmem:[#allocation3 + $0x50] sm:$0xff] }
  0x2d   : > { %866 = vmatpush.msra.mxu2 %v327_v4  ;;  %867 = vmatpush.msra.mxu3 %v327_v4  ;;  %v292_v19 = vld [vmem:[#allocation3 + $0x40] sm:$0xff]  ;;  %v293_v23 = vld [vmem:[#allocation3 + $0x48] sm:$0xff]  ;;  %v303_v28 = vld [vmem:[#allocation3 + $0x98] sm:$0xff] }
  0x2e   : > { %336 = vmatpush.msra.mxu0 %v327_v4  ;;  %865 = vmatpush.msra.mxu1 %v327_v4  ;;  %v311_v29 = vld [vmem:[#allocation3 + $0xd8] sm:$0xff]  ;;  %v304_v32 = vld [vmem:[#allocation3 + $0xa0] sm:$0xff]  ;;  %v305_v36 = vld [vmem:[#allocation3 + $0xa8] sm:$0xff] }
  0x2f   : > { %869 = vmatpush.msra.mxu2 %v326_v5  ;;  %870 = vmatpush.msra.mxu3 %v326_v5  ;;  %v287_v30 = vld [vmem:[#allocation3 + $0x18] sm:$0xff]  ;;  %v312_v33 = vld [vmem:[#allocation3 + $0xe0] sm:$0xff]  ;;  %v313_v37 = vld [vmem:[#allocation3 + $0xe8] sm:$0xff] }
  0x30   : > { %337 = vmatpush.msra.mxu0 %v326_v5  ;;  %868 = vmatpush.msra.mxu1 %v326_v5  ;;  %v295_v31 = vld [vmem:[#allocation3 + $0x58] sm:$0xff]  ;;  %v288_v34 = vld [vmem:[#allocation3 + $0x20] sm:$0xff]  ;;  %v289_v38 = vld [vmem:[#allocation3 + $0x28] sm:$0xff] }
  0x31   : > { %872 = vmatpush.msra.mxu2 %v325_v6  ;;  %873 = vmatpush.msra.mxu3 %v325_v6  ;;  %v296_v35 = vld [vmem:[#allocation3 + $0x60] sm:$0xff]  ;;  %v297_v39 = vld [vmem:[#allocation3 + $0x68] sm:$0xff]  ;;  %v306_v40 = vld [vmem:[#allocation3 + $0xb0] sm:$0xff] }
  0x32   : > { %338 = vmatpush.msra.mxu0 %v325_v6  ;;  %871 = vmatpush.msra.mxu1 %v325_v6  ;;  %v314_v41 = vld [vmem:[#allocation3 + $0xf0] sm:$0xff]  ;;  %v307_v44 = vld [vmem:[#allocation3 + $0xb8] sm:$0xff] }
  0x33   : > { %875 = vmatpush.msra.mxu2 %v324_v7  ;;  %876 = vmatpush.msra.mxu3 %v324_v7  ;;  %v290_v42 = vld [vmem:[#allocation3 + $0x30] sm:$0xff]  ;;  %v315_v45 = vld [vmem:[#allocation3 + $0xf8] sm:$0xff] }
  0x34   : > { %339 = vmatpush.msra.mxu0 %v324_v7  ;;  %874 = vmatpush.msra.mxu1 %v324_v7  ;;  %v298_v43 = vld [vmem:[#allocation3 + $0x70] sm:$0xff]  ;;  %v291_v46 = vld [vmem:[#allocation3 + $0x38] sm:$0xff] }
  0x35   : > { %878 = vmatpush.msra.mxu2 %v323_v8  ;;  %879 = vmatpush.msra.mxu3 %v323_v8  ;;  %v299_v47 = vld [vmem:[#allocation3 + $0x78] sm:$0xff] }
  0x36   : > { %340 = vmatpush.msra.mxu0 %v323_v8  ;;  %877 = vmatpush.msra.mxu1 %v323_v8 }
  0x37   : > { %881 = vmatpush.msra.mxu2 %v322_v9  ;;  %882 = vmatpush.msra.mxu3 %v322_v9 }
  0x38   : > { %341 = vmatpush.msra.mxu0 %v322_v9  ;;  %880 = vmatpush.msra.mxu1 %v322_v9 }
  0x39   : > { %884 = vmatpush.msra.mxu2 %v321_v10  ;;  %885 = vmatpush.msra.mxu3 %v321_v10 }
  0x3a   : > { %342 = vmatpush.msra.mxu0 %v321_v10  ;;  %883 = vmatpush.msra.mxu1 %v321_v10 }
  0x3b   : > { %887 = vmatpush.msra.mxu2 %v320_v11  ;;  %888 = vmatpush.msra.mxu3 %v320_v11 }
  0x3c   : > { %343 = vmatpush.msra.mxu0 %v320_v11  ;;  %886 = vmatpush.msra.mxu1 %v320_v11 }
  0x3d   : > { %890 = vmatpush.msra.mxu2 %v319_v12  ;;  %891 = vmatpush.msra.mxu3 %v319_v12 }
  0x3e   : > { %344 = vmatpush.msra.mxu0 %v319_v12  ;;  %889 = vmatpush.msra.mxu1 %v319_v12 }
  0x3f   : > { %893 = vmatpush.msra.mxu2 %v318_v13  ;;  %894 = vmatpush.msra.mxu3 %v318_v13 }
  0x40   : > { %345 = vmatpush.msra.mxu0 %v318_v13  ;;  %892 = vmatpush.msra.mxu1 %v318_v13 }
  0x41   : > { %896 = vmatpush.msra.mxu2 %v317_v14  ;;  %897 = vmatpush.msra.mxu3 %v317_v14 }
  0x42   : > { %346 = vmatpush.msra.mxu0 %v317_v14  ;;  %895 = vmatpush.msra.mxu1 %v317_v14 }
  0x43   : > { %899 = vmatpush.msra.mxu2 %v316_v15  ;;  %900 = vmatpush.msra.mxu3 %v316_v15 }
  0x44   : > { %396 = vmatmul.f32.vlgmr.msra.gmra.mxu2 %v300_v16  ;;  %420 = vmatmul.f32.vlgmr.msra.gmra.mxu3 %v308_v17 }
  0x45   : > { %347 = vmatpush.msra.mxu0 %v316_v15  ;;  %898 = vmatpush.msra.mxu1 %v316_v15 }
  0x46   : > { %348 = vmatmul.f32.vlgmr.msra.gmra.mxu0 %v284_v18  ;;  %372 = vmatmul.f32.vlgmr.msra.gmra.mxu1 %v292_v19 }
  0x4c   : > { %399 = vmatmul.f32.gmra.mxu2 %v301_v20  ;;  %423 = vmatmul.f32.gmra.mxu3 %v309_v21 }
  0x4e   : > { %351 = vmatmul.f32.gmra.mxu0 %v285_v22  ;;  %375 = vmatmul.f32.gmra.mxu1 %v293_v23 }
  0x54   : > { %402 = vmatmul.f32.gmra.mxu2 %v302_v24  ;;  %426 = vmatmul.f32.gmra.mxu3 %v310_v25 }
  0x56   : > { %354 = vmatmul.f32.gmra.mxu0 %v286_v26  ;;  %378 = vmatmul.f32.gmra.mxu1 %v294_v27 }
  0x5c   : > { %405 = vmatmul.f32.gmra.mxu2 %v303_v28  ;;  %429 = vmatmul.f32.gmra.mxu3 %v311_v29 }
  0x5e   : > { %357 = vmatmul.f32.gmra.mxu0 %v287_v30  ;;  %381 = vmatmul.f32.gmra.mxu1 %v295_v31 }
  0x64   : > { %408 = vmatmul.f32.gmra.mxu2 %v304_v32  ;;  %432 = vmatmul.f32.gmra.mxu3 %v312_v33 }
  0x66   : > { %360 = vmatmul.f32.gmra.mxu0 %v288_v34  ;;  %384 = vmatmul.f32.gmra.mxu1 %v296_v35 }
  0x6c   : > { %411 = vmatmul.f32.gmra.mxu2 %v305_v36  ;;  %435 = vmatmul.f32.gmra.mxu3 %v313_v37 }
  0x6e   : > { %363 = vmatmul.f32.gmra.mxu0 %v289_v38  ;;  %387 = vmatmul.f32.gmra.mxu1 %v297_v39 }
  0x74   : > { %414 = vmatmul.f32.gmra.mxu2 %v306_v40  ;;  %438 = vmatmul.f32.gmra.mxu3 %v314_v41 }
  0x76   : > { %366 = vmatmul.f32.gmra.mxu0 %v290_v42  ;;  %390 = vmatmul.f32.gmra.mxu1 %v298_v43 }
  0x7c   : > { %417 = vmatmul.f32.gmra.mxu2 %v307_v44  ;;  %441 = vmatmul.f32.gmra.mxu3 %v315_v45 }
  0x7e   : > { %369 = vmatmul.f32.gmra.mxu0 %v291_v46  ;;  %393 = vmatmul.f32.gmra.mxu1 %v299_v47 }
  0xc3   : > { %v349_v48 = vpop.f32.mrf.mxu0  ;;  %v373_v49 = vpop.f32.mrf.mxu1 }
  0xc4   : > { %544 = vst [vmem:[%s1233_s18] sm:$0xff] %v349_v48 }
  0xc5   : > { %552 = vst [vmem:[%s1233_s18 + $0x40] sm:$0xff] %v373_v49 }
  0xc7   : > { %v397_v50 = vpop.f32.mrf.mxu2  ;;  %v421_v51 = vpop.f32.mrf.mxu3 }
  0xc8   : > { %560 = vst [vmem:[%s1233_s18 + $0x80] sm:$0xff] %v397_v50 }
  0xc9   : > { %568 = vst [vmem:[%s1233_s18 + $0xc0] sm:$0xff] %v421_v51 }
  0xcb   : > { %v352_v52 = vpop.f32.mrf.mxu0  ;;  %v376_v53 = vpop.f32.mrf.mxu1  ;;  %v678_v16 = vld [vmem:[%s1233_s18] sm:$0xff] (%p1179_p0) }
  0xcc   : > { %545 = vst [vmem:[%s1233_s18 + $0x8] sm:$0xff] %v352_v52  ;;  %v694_v24 = vld [vmem:[%s1233_s18 + $0x40] sm:$0xff] (%p1179_p0) }
  0xcd   : > { %553 = vst [vmem:[%s1233_s18 + $0x48] sm:$0xff] %v376_v53 }
  0xce   : > { %679 = vst [vmem:[%s1275_s4] sm:$0xff] (%p1179_p0), %v678_v16 }
  0xcf   : > { %v400_v54 = vpop.f32.mrf.mxu2  ;;  %v424_v55 = vpop.f32.mrf.mxu3  ;;  %695 = vst [vmem:[%s1275_s4 + $0xc0] sm:$0xff] (%p1179_p0), %v694_v24  ;;  %v710_v32 = vld [vmem:[%s1233_s18 + $0x80] sm:$0xff] (%p1179_p0) }
  0xd0   : > { %561 = vst [vmem:[%s1233_s18 + $0x88] sm:$0xff] %v400_v54  ;;  %v726_v40 = vld [vmem:[%s1233_s18 + $0xc0] sm:$0xff] (%p1179_p0) }
  0xd1   : > { %569 = vst [vmem:[%s1233_s18 + $0xc8] sm:$0xff] %v424_v55 }
  0xd2   : > { %711 = vst [vmem:[%s1275_s4 + $0x180] sm:$0xff] (%p1179_p0), %v710_v32 }
  0xd3   : > { %v355_v56 = vpop.f32.mrf.mxu0  ;;  %v379_v57 = vpop.f32.mrf.mxu1  ;;  %v680_v17 = vld [vmem:[%s1233_s18 + $0x8] sm:$0xff] (%p1179_p0)  ;;  %727 = vst [vmem:[%s1275_s4 + $0x240] sm:$0xff] (%p1179_p0), %v726_v40 }
  0xd4   : > { %546 = vst [vmem:[%s1233_s18 + $0x10] sm:$0xff] %v355_v56  ;;  %v696_v25 = vld [vmem:[%s1233_s18 + $0x48] sm:$0xff] (%p1179_p0) }
  0xd5   : > { %554 = vst [vmem:[%s1233_s18 + $0x50] sm:$0xff] %v379_v57 }
  0xd6   : > { %681 = vst [vmem:[%s1275_s4 + $0x18] sm:$0xff] (%p1179_p0), %v680_v17 }
  0xd7   : > { %v403_v58 = vpop.f32.mrf.mxu2  ;;  %v427_v59 = vpop.f32.mrf.mxu3  ;;  %697 = vst [vmem:[%s1275_s4 + $0xd8] sm:$0xff] (%p1179_p0), %v696_v25  ;;  %v712_v33 = vld [vmem:[%s1233_s18 + $0x88] sm:$0xff] (%p1179_p0) }
  0xd8   : > { %562 = vst [vmem:[%s1233_s18 + $0x90] sm:$0xff] %v403_v58  ;;  %v728_v41 = vld [vmem:[%s1233_s18 + $0xc8] sm:$0xff] (%p1179_p0) }
  0xd9   : > { %570 = vst [vmem:[%s1233_s18 + $0xd0] sm:$0xff] %v427_v59 }
  0xda   : > { %713 = vst [vmem:[%s1275_s4 + $0x198] sm:$0xff] (%p1179_p0), %v712_v33 }
  0xdb   : > { %v358_v60 = vpop.f32.mrf.mxu0  ;;  %v382_v61 = vpop.f32.mrf.mxu1  ;;  %v682_v18 = vld [vmem:[%s1233_s18 + $0x10] sm:$0xff] (%p1179_p0)  ;;  %729 = vst [vmem:[%s1275_s4 + $0x258] sm:$0xff] (%p1179_p0), %v728_v41 }
  0xdc   : > { %547 = vst [vmem:[%s1233_s18 + $0x18] sm:$0xff] %v358_v60  ;;  %v698_v26 = vld [vmem:[%s1233_s18 + $0x50] sm:$0xff] (%p1179_p0) }
  0xdd   : > { %555 = vst [vmem:[%s1233_s18 + $0x58] sm:$0xff] %v382_v61 }
  0xde   : > { %683 = vst [vmem:[%s1275_s4 + $0x30] sm:$0xff] (%p1179_p0), %v682_v18 }
  0xdf   : > { %v406_v62 = vpop.f32.mrf.mxu2  ;;  %v430_v63 = vpop.f32.mrf.mxu3  ;;  %699 = vst [vmem:[%s1275_s4 + $0xf0] sm:$0xff] (%p1179_p0), %v698_v26  ;;  %v714_v34 = vld [vmem:[%s1233_s18 + $0x90] sm:$0xff] (%p1179_p0) }
  0xe0   : > { %563 = vst [vmem:[%s1233_s18 + $0x98] sm:$0xff] %v406_v62  ;;  %v730_v42 = vld [vmem:[%s1233_s18 + $0xd0] sm:$0xff] (%p1179_p0) }
  0xe1   : > { %571 = vst [vmem:[%s1233_s18 + $0xd8] sm:$0xff] %v430_v63 }
  0xe2   : > { %715 = vst [vmem:[%s1275_s4 + $0x1b0] sm:$0xff] (%p1179_p0), %v714_v34 }
  0xe3   : > { %v361_v0 = vpop.f32.mrf.mxu0  ;;  %v385_v1 = vpop.f32.mrf.mxu1  ;;  %v684_v19 = vld [vmem:[%s1233_s18 + $0x18] sm:$0xff] (%p1179_p0)  ;;  %731 = vst [vmem:[%s1275_s4 + $0x270] sm:$0xff] (%p1179_p0), %v730_v42 }
  0xe4   : > { %548 = vst [vmem:[%s1233_s18 + $0x20] sm:$0xff] %v361_v0  ;;  %v700_v27 = vld [vmem:[%s1233_s18 + $0x58] sm:$0xff] (%p1179_p0) }
  0xe5   : > { %556 = vst [vmem:[%s1233_s18 + $0x60] sm:$0xff] %v385_v1 }
  0xe6   : > { %685 = vst [vmem:[%s1275_s4 + $0x48] sm:$0xff] (%p1179_p0), %v684_v19 }
  0xe7   : > { %v409_v2 = vpop.f32.mrf.mxu2  ;;  %v433_v3 = vpop.f32.mrf.mxu3  ;;  %701 = vst [vmem:[%s1275_s4 + $0x108] sm:$0xff] (%p1179_p0), %v700_v27  ;;  %v716_v35 = vld [vmem:[%s1233_s18 + $0x98] sm:$0xff] (%p1179_p0) }
  0xe8   : > { %564 = vst [vmem:[%s1233_s18 + $0xa0] sm:$0xff] %v409_v2  ;;  %v732_v43 = vld [vmem:[%s1233_s18 + $0xd8] sm:$0xff] (%p1179_p0) }
  0xe9   : > { %572 = vst [vmem:[%s1233_s18 + $0xe0] sm:$0xff] %v433_v3 }
  0xea   : > { %717 = vst [vmem:[%s1275_s4 + $0x1c8] sm:$0xff] (%p1179_p0), %v716_v35 }
  0xeb   : > { %v364_v4 = vpop.f32.mrf.mxu0  ;;  %v388_v5 = vpop.f32.mrf.mxu1  ;;  %v686_v20 = vld [vmem:[%s1233_s18 + $0x20] sm:$0xff] (%p1179_p0)  ;;  %733 = vst [vmem:[%s1275_s4 + $0x288] sm:$0xff] (%p1179_p0), %v732_v43 }
  0xec   : > { %549 = vst [vmem:[%s1233_s18 + $0x28] sm:$0xff] %v364_v4  ;;  %v702_v28 = vld [vmem:[%s1233_s18 + $0x60] sm:$0xff] (%p1179_p0) }
  0xed   : > { %557 = vst [vmem:[%s1233_s18 + $0x68] sm:$0xff] %v388_v5 }
  0xee   : > { %687 = vst [vmem:[%s1275_s4 + $0x60] sm:$0xff] (%p1179_p0), %v686_v20 }
  0xef   : > { %v412_v6 = vpop.f32.mrf.mxu2  ;;  %v436_v7 = vpop.f32.mrf.mxu3  ;;  %703 = vst [vmem:[%s1275_s4 + $0x120] sm:$0xff] (%p1179_p0), %v702_v28  ;;  %v718_v36 = vld [vmem:[%s1233_s18 + $0xa0] sm:$0xff] (%p1179_p0) }
  0xf0   : > { %565 = vst [vmem:[%s1233_s18 + $0xa8] sm:$0xff] %v412_v6  ;;  %v734_v44 = vld [vmem:[%s1233_s18 + $0xe0] sm:$0xff] (%p1179_p0) }
  0xf1   : > { %573 = vst [vmem:[%s1233_s18 + $0xe8] sm:$0xff] %v436_v7 }
  0xf2   : > { %719 = vst [vmem:[%s1275_s4 + $0x1e0] sm:$0xff] (%p1179_p0), %v718_v36 }
  0xf3   : > { %v367_v8 = vpop.f32.mrf.mxu0  ;;  %v391_v9 = vpop.f32.mrf.mxu1  ;;  %v688_v21 = vld [vmem:[%s1233_s18 + $0x28] sm:$0xff] (%p1179_p0)  ;;  %735 = vst [vmem:[%s1275_s4 + $0x2a0] sm:$0xff] (%p1179_p0), %v734_v44 }
  0xf4   : > { %550 = vst [vmem:[%s1233_s18 + $0x30] sm:$0xff] %v367_v8  ;;  %v704_v29 = vld [vmem:[%s1233_s18 + $0x68] sm:$0xff] (%p1179_p0) }
  0xf5   : > { %558 = vst [vmem:[%s1233_s18 + $0x70] sm:$0xff] %v391_v9 }
  0xf6   : > { %689 = vst [vmem:[%s1275_s4 + $0x78] sm:$0xff] (%p1179_p0), %v688_v21 }
  0xf7   : > { %v415_v10 = vpop.f32.mrf.mxu2  ;;  %v439_v11 = vpop.f32.mrf.mxu3  ;;  %705 = vst [vmem:[%s1275_s4 + $0x138] sm:$0xff] (%p1179_p0), %v704_v29  ;;  %v720_v37 = vld [vmem:[%s1233_s18 + $0xa8] sm:$0xff] (%p1179_p0) }
  0xf8   : > { %566 = vst [vmem:[%s1233_s18 + $0xb0] sm:$0xff] %v415_v10  ;;  %v736_v45 = vld [vmem:[%s1233_s18 + $0xe8] sm:$0xff] (%p1179_p0) }
  0xf9   : > { %574 = vst [vmem:[%s1233_s18 + $0xf0] sm:$0xff] %v439_v11 }
  0xfa   : > { %721 = vst [vmem:[%s1275_s4 + $0x1f8] sm:$0xff] (%p1179_p0), %v720_v37 }
  0xfb   : > { %v370_v12 = vpop.f32.mrf.mxu0  ;;  %v394_v13 = vpop.f32.mrf.mxu1  ;;  %v690_v22 = vld [vmem:[%s1233_s18 + $0x30] sm:$0xff] (%p1179_p0)  ;;  %737 = vst [vmem:[%s1275_s4 + $0x2b8] sm:$0xff] (%p1179_p0), %v736_v45 }
  0xfc   : > { %551 = vst [vmem:[%s1233_s18 + $0x38] sm:$0xff] %v370_v12  ;;  %v706_v30 = vld [vmem:[%s1233_s18 + $0x70] sm:$0xff] (%p1179_p0) }
  0xfd   : > { %559 = vst [vmem:[%s1233_s18 + $0x78] sm:$0xff] %v394_v13  ;;  %582 = sbr.rel (!%p1179_p0) target bundleno = 266 (0x10a), region = 48 }
  0xfe   : > { %691 = vst [vmem:[%s1275_s4 + $0x90] sm:$0xff] (%p1179_p0), %v690_v22 }
  0xff   : > { %v418_v14 = vpop.f32.mrf.mxu2  ;;  %v442_v15 = vpop.f32.mrf.mxu3  ;;  %707 = vst [vmem:[%s1275_s4 + $0x150] sm:$0xff] (%p1179_p0), %v706_v30  ;;  %v722_v38 = vld [vmem:[%s1233_s18 + $0xb0] sm:$0xff] (%p1179_p0) }
 0x100   : > { %567 = vst [vmem:[%s1233_s18 + $0xb8] sm:$0xff] %v418_v14  ;;  %v738_v46 = vld [vmem:[%s1233_s18 + $0xf0] sm:$0xff] (%p1179_p0) }
 0x101   : > { %575 = vst [vmem:[%s1233_s18 + $0xf8] sm:$0xff] %v442_v15 }
 0x102   : > { %723 = vst [vmem:[%s1275_s4 + $0x210] sm:$0xff] %v722_v38 }
 0x103   : > { %v692_v23 = vld [vmem:[%s1233_s18 + $0x38] sm:$0xff]  ;;  %739 = vst [vmem:[%s1275_s4 + $0x2d0] sm:$0xff] %v738_v46 }
 0x104   : > { %693 = vst [vmem:[%s1275_s4 + $0xa8] sm:$0xff] %v692_v23  ;;  %v708_v31 = vld [vmem:[%s1233_s18 + $0x78] sm:$0xff] }
 0x105   : > { %709 = vst [vmem:[%s1275_s4 + $0x168] sm:$0xff] %v708_v31 }
 0x107   : > { %v724_v39 = vld [vmem:[%s1233_s18 + $0xb8] sm:$0xff] }
 0x108   : > { %725 = vst [vmem:[%s1275_s4 + $0x228] sm:$0xff] %v724_v39  ;;  %v740_v47 = vld [vmem:[%s1233_s18 + $0xf8] sm:$0xff] }
 0x109   : > { %741 = vst [vmem:[%s1275_s4 + $0x2e8] sm:$0xff] %v740_v47 }
 0x10a PF: > { %s16_s14 = sadd.s32 1, %s1084_s14   ;;  %s1366_s9 = smov %s1068_s10 }
 0x10b   : > { %p13_p1 = scmp.ge.s32.totalorder %s16_s14, 5   ;;  %s1367_s10 = smov %s1072_s11 }
 0x10c   : > { %s1368_s11 = smov %s1188_s7  ;;  %s1369_s12 = smov %s1080_s13 }
 0x10d   : > { %s1370_s13 = smov %s1372_s27  ;;  %15 = sbr.rel (!%p13_p1) target bundleno = 5 (0x5), region = 120 }
 0x112   :  { %757 = vsyncpa [#allocation4], 1 }
 0x113   :  { %759 = vsyncpa [#allocation4 + $0x1], 1 }
 0x114   :  { %760 = vsyncpa [#allocation6], 1 }
 0x115   :  { %762 = vsyncpa [#allocation6 + $0x1], 1 }

// kernel: attention_forward.4
= control target key start
LH: loop header
LB: loop body
LE: loop exit
PB: predicated region body
PF: predicated region fallthrough
CT: control target
= control target key end

     0   :  { %s3753_s12 = smov 0   ;;  %s3755_s13 = smov 0   ;;  %s5481_s0 = inlined_call_operand.vmem [shape: f32[2,128,384], index: 0, kind: input, shape index: {}, may-alias: {0,1,2}]   ;;  %s5482_s1 = inlined_call_operand.vmem [shape: f32[2,128,384], index: 1, kind: input, shape index: {}, may-alias: {0,1,2}]   ;;  %s5483_s2 = inlined_call_operand.vmem [shape: f32[2,128,384], index: 2, kind: input, shape index: {}, may-alias: {0,1,2}]   ;;  %s5484_s3 = inlined_call_operand.vmem [shape: f32[2,128,128], index: 3, kind: output, shape index: {}]  }
   0x1   :  { %s3757_s14 = smov 0   ;;  %s3759_s15 = smov 0  }
   0x2   :  { %s3761_s16 = smov 0  }
   0x3 LB: > { %s32_s17 = sadd.s32 1, %s3723_s15  ;;  %p48_p1 = scmp.ne.s32.totalorder %s3715_s13, %s3711_s12  ;;  %s3727_s16 = sphi %s3761_s16, %s13_s16   ;;  %s3723_s15 = sphi %s3759_s15, %s5579_s15   ;;  %s3719_s14 = sphi %s3757_s14, %s5578_s14   ;;  %s3715_s13 = sphi %s3755_s13, %s5577_s13   ;;  %s3711_s12 = sphi %s3753_s12, %s5576_s12  }
   0x4   : > { %p34_p0 = scmp.ge.s32.totalorder %s32_s17, 2  ;;  %p49_p2 = scmp.eq.s32.totalorder %s3727_s16, 0 }
   0x5   : > { %s41_s20 = sadd.s32 1, %s3715_s13  ;;  %p3297_p5 = scmp.ge.s32.totalorder %s3727_s16, 2 }
   0x6   : > { %s5581_s17 = smov (%p34_p0, %s32_s17), 0  ;;  %p3784_p3 = por %p49_p2, %p48_p1 }
   0x7   : > { %s36_s19 = ssub.s32 %s3723_s15, %s5581_s17  ;;  %158 = sbr.rel (%p3297_p5) target bundleno = 75 (0x4b), region = 16 }
   0x8   : > { %p39_p4 = scmp.eq.s32.totalorder %s36_s19, 0 }
   0xa   : > { %s3792_s21 = scalar_select %p39_p4, %s3715_s13, %s41_s20  }
   0xc   : > { %161 = sbr.rel (!%p3784_p3) target bundleno = 33 (0x21), region = 20  ;;  %s163_s22 = sand.u32 (%p3784_p3), 1, %s3715_s13  }
   0xd   : > { %s3409_s23 = smul.u32 (%p3784_p3), 384, %s3723_s15  ;;  %s3298_s24 = sshll.u32 (%p3784_p3), %s163_s22, 7 }
   0xe   : > { %s165_s28 = scalar_lea.vmem (%p3784_p3), [#allocation5], %s3298_s24 }
   0xf   : > { %s3802_s27 = scalar_lea.vmem (%p3784_p3), %s5481_s0, %s3409_s23 }
  0x10   : > { %v230_v0 = vld [vmem:[%s3802_s27] sm:$0xff] (%p3784_p3)  ;;  %v232_v1 = vld [vmem:[%s3802_s27 + $0x18] sm:$0xff] (%p3784_p3)  ;;  %v234_v2 = vld [vmem:[%s3802_s27 + $0x30] sm:$0xff] (%p3784_p3) }
  0x11   : > { %231 = vst [vmem:[%s165_s28] sm:$0xff] %v230_v0  ;;  %v236_v3 = vld [vmem:[%s3802_s27 + $0x48] sm:$0xff]  ;;  %v238_v4 = vld [vmem:[%s3802_s27 + $0x60] sm:$0xff]  ;;  %v240_v5 = vld [vmem:[%s3802_s27 + $0x78] sm:$0xff] }
  0x12   : > { %233 = vst [vmem:[%s165_s28 + $0x8] sm:$0xff] %v232_v1  ;;  %v242_v6 = vld [vmem:[%s3802_s27 + $0x90] sm:$0xff]  ;;  %v244_v7 = vld [vmem:[%s3802_s27 + $0xa8] sm:$0xff]  ;;  %v246_v8 = vld [vmem:[%s3802_s27 + $0xc0] sm:$0xff] }
  0x13   : > { %235 = vst [vmem:[%s165_s28 + $0x10] sm:$0xff] %v234_v2  ;;  %v248_v9 = vld [vmem:[%s3802_s27 + $0xd8] sm:$0xff]  ;;  %v250_v10 = vld [vmem:[%s3802_s27 + $0xf0] sm:$0xff]  ;;  %v252_v11 = vld [vmem:[%s3802_s27 + $0x108] sm:$0xff] }
  0x14   : > { %237 = vst [vmem:[%s165_s28 + $0x18] sm:$0xff] %v236_v3  ;;  %v254_v12 = vld [vmem:[%s3802_s27 + $0x120] sm:$0xff]  ;;  %v256_v13 = vld [vmem:[%s3802_s27 + $0x138] sm:$0xff]  ;;  %v258_v14 = vld [vmem:[%s3802_s27 + $0x150] sm:$0xff] }
  0x15   : > { %239 = vst [vmem:[%s165_s28 + $0x20] sm:$0xff] %v238_v4  ;;  %v260_v15 = vld [vmem:[%s3802_s27 + $0x168] sm:$0xff] }
  0x16   : > { %241 = vst [vmem:[%s165_s28 + $0x28] sm:$0xff] %v240_v5 }
  0x17   : > { %243 = vst [vmem:[%s165_s28 + $0x30] sm:$0xff] %v242_v6 }
  0x18   : > { %245 = vst [vmem:[%s165_s28 + $0x38] sm:$0xff] %v244_v7 }
  0x19   : > { %247 = vst [vmem:[%s165_s28 + $0x40] sm:$0xff] %v246_v8 }
  0x1a   : > { %249 = vst [vmem:[%s165_s28 + $0x48] sm:$0xff] %v248_v9 }
  0x1b   : > { %251 = vst [vmem:[%s165_s28 + $0x50] sm:$0xff] %v250_v10 }
  0x1c   : > { %253 = vst [vmem:[%s165_s28 + $0x58] sm:$0xff] %v252_v11 }
  0x1d   : > { %255 = vst [vmem:[%s165_s28 + $0x60] sm:$0xff] %v254_v12 }
  0x1e   : > { %257 = vst [vmem:[%s165_s28 + $0x68] sm:$0xff] %v256_v13 }
  0x1f   : > { %259 = vst [vmem:[%s165_s28 + $0x70] sm:$0xff] %v258_v14 }
  0x20   : > { %261 = vst [vmem:[%s165_s28 + $0x78] sm:$0xff] %v260_v15 }
  0x21 PF: > { %267 = sbr.rel (!%p3784_p3) target bundleno = 54 (0x36), region = 58  ;;  %s269_s29 = sand.u32 (%p3784_p3), 1, %s3715_s13  }
  0x22   : > { %s3301_s30 = smul.u32 (%p3784_p3), 384, %s3723_s15  ;;  %s3300_s4 = sshll.u32 (%p3784_p3), %s269_s29, 7 }
  0x23   : > { %s271_s8 = scalar_lea.vmem (%p3784_p3), [#allocation6], %s3300_s4 }
  0x24   : > { %s3827_s7 = scalar_lea.vmem (%p3784_p3), %s5482_s1, %s3301_s30 }
  0x25   : > { %v3302_v16 = vld [vmem:[%s3827_s7 + $0x8] sm:$0xff] (%p3784_p3)  ;;  %v3303_v17 = vld [vmem:[%s3827_s7 + $0x20] sm:$0xff] (%p3784_p3)  ;;  %v3304_v18 = vld [vmem:[%s3827_s7 + $0x38] sm:$0xff] (%p3784_p3) }
  0x26   : > { %338 = vst [vmem:[%s271_s8] sm:$0xff] %v3302_v16  ;;  %v3305_v19 = vld [vmem:[%s3827_s7 + $0x50] sm:$0xff]  ;;  %v3306_v20 = vld [vmem:[%s3827_s7 + $0x68] sm:$0xff]  ;;  %v3307_v21 = vld [vmem:[%s3827_s7 + $0x80] sm:$0xff] }
  0x27   : > { %340 = vst [vmem:[%s271_s8 + $0x8] sm:$0xff] %v3303_v17  ;;  %v3308_v22 = vld [vmem:[%s3827_s7 + $0x98] sm:$0xff]  ;;  %v3309_v23 = vld [vmem:[%s3827_s7 + $0xb0] sm:$0xff]  ;;  %v3310_v24 = vld [vmem:[%s3827_s7 + $0xc8] sm:$0xff] }
  0x28   : > { %342 = vst [vmem:[%s271_s8 + $0x10] sm:$0xff] %v3304_v18  ;;  %v3311_v25 = vld [vmem:[%s3827_s7 + $0xe0] sm:$0xff]  ;;  %v3312_v26 = vld [vmem:[%s3827_s7 + $0xf8] sm:$0xff]  ;;  %v3313_v27 = vld [vmem:[%s3827_s7 + $0x110] sm:$0xff] }
  0x29   : > { %344 = vst [vmem:[%s271_s8 + $0x18] sm:$0xff] %v3305_v19  ;;  %v3314_v28 = vld [vmem:[%s3827_s7 + $0x128] sm:$0xff]  ;;  %v3315_v29 = vld [vmem:[%s3827_s7 + $0x140] sm:$0xff]  ;;  %v3316_v30 = vld [vmem:[%s3827_s7 + $0x158] sm:$0xff] }
  0x2a   : > { %346 = vst [vmem:[%s271_s8 + $0x20] sm:$0xff] %v3306_v20  ;;  %v3317_v31 = vld [vmem:[%s3827_s7 + $0x170] sm:$0xff] }
  0x2b   : > { %348 = vst [vmem:[%s271_s8 + $0x28] sm:$0xff] %v3307_v21 }
  0x2c   : > { %350 = vst [vmem:[%s271_s8 + $0x30] sm:$0xff] %v3308_v22 }
  0x2d   : > { %352 = vst [vmem:[%s271_s8 + $0x38] sm:$0xff] %v3309_v23 }
  0x2e   : > { %354 = vst [vmem:[%s271_s8 + $0x40] sm:$0xff] %v3310_v24 }
  0x2f   : > { %356 = vst [vmem:[%s271_s8 + $0x48] sm:$0xff] %v3311_v25 }
  0x30   : > { %358 = vst [vmem:[%s271_s8 + $0x50] sm:$0xff] %v3312_v26 }
  0x31   : > { %360 = vst [vmem:[%s271_s8 + $0x58] sm:$0xff] %v3313_v27 }
  0x32   : > { %362 = vst [vmem:[%s271_s8 + $0x60] sm:$0xff] %v3314_v28 }
  0x33   : > { %364 = vst [vmem:[%s271_s8 + $0x68] sm:$0xff] %v3315_v29 }
  0x34   : > { %366 = vst [vmem:[%s271_s8 + $0x70] sm:$0xff] %v3316_v30 }
  0x35   : > { %368 = vst [vmem:[%s271_s8 + $0x78] sm:$0xff] %v3317_v31 }
  0x36 PF: > { %374 = sbr.rel (!%p3784_p3) target bundleno = 75 (0x4b), region = 96  ;;  %s376_s9 = sand.u32 (%p3784_p3), 1, %s3715_s13  }
  0x37   : > { %s3319_s10 = smul.u32 (%p3784_p3), 384, %s3723_s15  ;;  %s3318_s11 = sshll.u32 (%p3784_p3), %s376_s9, 7 }
  0x38   : > { %s378_s18 = scalar_lea.vmem (%p3784_p3), [#allocation7], %s3318_s11 }
  0x39   : > { %s3852_s22 = scalar_lea.vmem (%p3784_p3), %s5483_s2, %s3319_s10 }
  0x3a   : > { %v3320_v32 = vld [vmem:[%s3852_s22 + $0x10] sm:$0xff] (%p3784_p3)  ;;  %v3321_v33 = vld [vmem:[%s3852_s22 + $0x28] sm:$0xff] (%p3784_p3)  ;;  %v3322_v34 = vld [vmem:[%s3852_s22 + $0x40] sm:$0xff] (%p3784_p3) }
  0x3b   : > { %445 = vst [vmem:[%s378_s18] sm:$0xff] %v3320_v32  ;;  %v3323_v35 = vld [vmem:[%s3852_s22 + $0x58] sm:$0xff]  ;;  %v3324_v36 = vld [vmem:[%s3852_s22 + $0x70] sm:$0xff]  ;;  %v3325_v37 = vld [vmem:[%s3852_s22 + $0x88] sm:$0xff] }
  0x3c   : > { %447 = vst [vmem:[%s378_s18 + $0x8] sm:$0xff] %v3321_v33  ;;  %v3326_v38 = vld [vmem:[%s3852_s22 + $0xa0] sm:$0xff]  ;;  %v3327_v39 = vld [vmem:[%s3852_s22 + $0xb8] sm:$0xff]  ;;  %v3328_v40 = vld [vmem:[%s3852_s22 + $0xd0] sm:$0xff] }
  0x3d   : > { %449 = vst [vmem:[%s378_s18 + $0x10] sm:$0xff] %v3322_v34  ;;  %v3329_v41 = vld [vmem:[%s3852_s22 + $0xe8] sm:$0xff]  ;;  %v3330_v42 = vld [vmem:[%s3852_s22 + $0x100] sm:$0xff]  ;;  %v3331_v43 = vld [vmem:[%s3852_s22 + $0x118] sm:$0xff] }
  0x3e   : > { %451 = vst [vmem:[%s378_s18 + $0x18] sm:$0xff] %v3323_v35  ;;  %v3332_v44 = vld [vmem:[%s3852_s22 + $0x130] sm:$0xff]  ;;  %v3333_v45 = vld [vmem:[%s3852_s22 + $0x148] sm:$0xff]  ;;  %v3334_v46 = vld [vmem:[%s3852_s22 + $0x160] sm:$0xff] }
  0x3f   : > { %453 = vst [vmem:[%s378_s18 + $0x20] sm:$0xff] %v3324_v36  ;;  %v3335_v47 = vld [vmem:[%s3852_s22 + $0x178] sm:$0xff] }
  0x40   : > { %455 = vst [vmem:[%s378_s18 + $0x28] sm:$0xff] %v3325_v37 }
  0x41   : > { %457 = vst [vmem:[%s378_s18 + $0x30] sm:$0xff] %v3326_v38 }
  0x42   : > { %459 = vst [vmem:[%s378_s18 + $0x38] sm:$0xff] %v3327_v39 }
  0x43   : > { %461 = vst [vmem:[%s378_s18 + $0x40] sm:$0xff] %v3328_v40 }
  0x44   : > { %463 = vst [vmem:[%s378_s18 + $0x48] sm:$0xff] %v3329_v41 }
  0x45   : > { %465 = vst [vmem:[%s378_s18 + $0x50] sm:$0xff] %v3330_v42 }
  0x46   : > { %467 = vst [vmem:[%s378_s18 + $0x58] sm:$0xff] %v3331_v43 }
  0x47   : > { %469 = vst [vmem:[%s378_s18 + $0x60] sm:$0xff] %v3332_v44 }
  0x48   : > { %471 = vst [vmem:[%s378_s18 + $0x68] sm:$0xff] %v3333_v45 }
  0x49   : > { %473 = vst [vmem:[%s378_s18 + $0x70] sm:$0xff] %v3334_v46 }
  0x4a   : > { %475 = vst [vmem:[%s378_s18 + $0x78] sm:$0xff] %v3335_v47 }
  0x4b PF: > { %p3336_p6 = scmp.ge.s32.totalorder %s3727_s16, 1  ;;  %p480_p7 = scmp.lt.s32.totalorder %s3727_s16, 3 }
  0x4d   : > { %p481_p8 = pnand %p3336_p6, %p480_p7 }
  0x4f   : > { %484 = sbr.rel (%p481_p8) target bundleno = 1823 (0x71f), region = 134 }
  0x54   : > { %s487_s23 = sand.u32 1, %s3711_s12   ;;  %vm698_vm0 = vcmask 523264   ;;  %s3729_s12 = smov 64   ;;  %vm569_vm1 = vcmask 7168  }
  0x55   : > { %s3873_s24 = sshll.u32 %s487_s23, 7  ;;  %p540_p9 = scmp.lt.s32.totalorder %s3719_s14, 1 }
  0x56   : > { %s3876_s25 = scalar_lea.vmem [#allocation6], %s3873_s24  ;;  %s3882_s26 = scalar_lea.vmem [#allocation5], %s3873_s24 }
  0x57   : > { %v3879_v48 = vld [vmem:[%s3876_s25 + $0x78] sm:$0xff]  ;;  %v1408_v49 = vld [vmem:[%s3882_s26 + $0x10] sm:$0xff]  ;;  %v1406_v50 = vld [vmem:[%s3882_s26] sm:$0xff]  ;;  %s4034_s27 = scalar_lea.vmem [#allocation7], %s3873_s24  ;;  %s5583_s14 = smov (!%p540_p9, %s3719_s14), 1 }
  0x58   : > { %3342 = vmatpush.xpose.msk.msra.mxu0 %vm698_vm0, %v3879_v48  ;;  %v3888_v51 = vmul.f32 0.125, %v1408_v49  ;;  %v3890_v52 = vmul.f32 0.125, %v1406_v50  ;;  %v3893_v53 = vld [vmem:[%s3876_s25 + $0x70] sm:$0xff]  ;;  %v1411_v54 = vld [vmem:[%s3882_s26 + $0x28] sm:$0xff]  ;;  %v1409_v55 = vld [vmem:[%s3882_s26 + $0x18] sm:$0xff]  ;;  %s3408_s28 = sshll.u32 %s5583_s14, 7 }
  0x59   : > { %v1407_v56 = vld [vmem:[%s3882_s26 + $0x8] sm:$0xff]  ;;  %v3909_v59 = vmul.f32 0.125, %v1411_v54  ;;  %v3911_v60 = vmul.f32 0.125, %v1409_v55  ;;  %v1410_v61 = vld [vmem:[%s3882_s26 + $0x20] sm:$0xff]  ;;  %v1412_v1 = vld [vmem:[%s3882_s26 + $0x30] sm:$0xff]  ;;  %s5345_s4 = scalar_lea.vmem %s5484_s3, %s3408_s28 }
  0x5a   : > { %1490 = vrot.lane.b32.xlu1 %v3888_v51, %s3729_s12  ;;  %1486 = vrot.lane.b32.xlu0 %v3890_v52, %s3729_s12  ;;  %v3904_v57 = vmul.f32 0.125, %v1407_v56  ;;  %v3907_v58 = vld [vmem:[%s3876_s25 + $0x68] sm:$0xff]  ;;  %v3919_v62 = vld [vmem:[%s3876_s25 + $0x60] sm:$0xff]  ;;  %v3925_v63 = vmul.f32 0.125, %v1410_v61  ;;  %v3936_v4 = vmul.f32 0.125, %v1412_v1 }
  0x5b   : > { %v1414_v0 = vld [vmem:[%s3882_s26 + $0x40] sm:$0xff]  ;;  %v3932_v2 = vld [vmem:[%s3876_s25 + $0x58] sm:$0xff]  ;;  %v676_v6 = vld [vmem:[%s3876_s25 + $0x50] sm:$0xff] }
  0x5c   : > { %3343 = vmatpush.xpose.msk.msra.mxu0 %vm698_vm0, %v3893_v53  ;;  %1488 = vrot.lane.b32.xlu2 %v3904_v57, %s3729_s12  ;;  %v3934_v3 = vmul.f32 0.125, %v1414_v0  ;;  %v1413_v5 = vld [vmem:[%s3882_s26 + $0x38] sm:$0xff]  ;;  %v1415_v9 = vld [vmem:[%s3882_s26 + $0x48] sm:$0xff]  ;;  %v1416_v13 = vld [vmem:[%s3882_s26 + $0x50] sm:$0xff] }
  0x5d   : > { %v3948_v7 = vmul.f32 0.125, %v1413_v5  ;;  %v1417_v8 = vld [vmem:[%s3882_s26 + $0x58] sm:$0xff]  ;;  %v675_v10 = vld [vmem:[%s3876_s25 + $0x48] sm:$0xff]  ;;  %v3956_v12 = vmul.f32 0.125, %v1415_v9  ;;  %v674_v14 = vld [vmem:[%s3876_s25 + $0x40] sm:$0xff]  ;;  %v3967_v15 = vmul.f32 0.125, %v1416_v13 }
  0x5e   : > { %v3954_v11 = vmul.f32 0.125, %v1417_v8  ;;  %v1420_v16 = vld [vmem:[%s3882_s26 + $0x70] sm:$0xff]  ;;  %v1418_v17 = vld [vmem:[%s3882_s26 + $0x60] sm:$0xff]  ;;  %v673_v18 = vld [vmem:[%s3876_s25 + $0x38] sm:$0xff] }
  0x5f   : > { %v3973_v19 = vmul.f32 0.125, %v1420_v16  ;;  %v3975_v20 = vmul.f32 0.125, %v1418_v17  ;;  %v1419_v21 = vld [vmem:[%s3882_s26 + $0x68] sm:$0xff]  ;;  %v672_v22 = vld [vmem:[%s3876_s25 + $0x30] sm:$0xff]  ;;  %v1421_v24 = vld [vmem:[%s3882_s26 + $0x78] sm:$0xff] }
  0x60   : > { %3344 = vmatpush.xpose.msk.msra.mxu0 %vm698_vm0, %v3907_v58  ;;  %v3986_v23 = vmul.f32 0.125, %v1419_v21  ;;  %v671_v25 = vld [vmem:[%s3876_s25 + $0x28] sm:$0xff]  ;;  %v3991_v26 = vmul.f32 0.125, %v1421_v24  ;;  %v670_v28 = vld [vmem:[%s3876_s25 + $0x20] sm:$0xff]  ;;  %v669_v29 = vld [vmem:[%s3876_s25 + $0x18] sm:$0xff] }
  0x61   : > { %v1439_v27 = vld [vmem:[%s3876_s25 + $0x8] sm:$0xff]  ;;  %v666_v30 = vld [vmem:[%s3876_s25] sm:$0xff]  ;;  %v1440_v31 = vld [vmem:[%s3876_s25 + $0x10] sm:$0xff] }
  0x62   : > { %1496 = vrot.lane.b32.xlu1 %v3909_v59, %s3729_s12  ;;  %1492 = vrot.lane.b32.xlu0 %v3911_v60, %s3729_s12  ;;  %v4037_v32 = vld [vmem:[%s4034_s27] sm:$0xff]  ;;  %v4040_v33 = vld [vmem:[%s4034_s27 + $0x8] sm:$0xff] }
  0x63   : > { %v1469_v34 = vld [vmem:[%s4034_s27 + $0x78] sm:$0xff]  ;;  %v3454_v35 = vpack.i.bf16 %v4040_v33, %v4037_v32  ;;  %v1468_v36 = vld [vmem:[%s4034_s27 + $0x70] sm:$0xff]  ;;  %v1467_v40 = vld [vmem:[%s4034_s27 + $0x68] sm:$0xff] }
  0x64   : > { %3345 = vmatpush.xpose.msk.msra.mxu0 %vm698_vm0, %v3919_v62  ;;  %1494 = vrot.lane.b32.xlu2 %v3925_v63, %s3729_s12  ;;  %v1456_v37 = vld [vmem:[%s4034_s27 + $0x10] sm:$0xff]  ;;  %v1457_v38 = vld [vmem:[%s4034_s27 + $0x18] sm:$0xff]  ;;  %v3469_v41 = vpack.i.bf16 %v1468_v36, %v1469_v34  ;;  %v1466_v42 = vld [vmem:[%s4034_s27 + $0x60] sm:$0xff] }
  0x65   : > { %1213 = vmatpush.msra.mxu1 %v1469_v34  ;;  %v3459_v39 = vpack.i.bf16 %v1457_v38, %v1456_v37  ;;  %v1464_v43 = vld [vmem:[%s4034_s27 + $0x50] sm:$0xff]  ;;  %v1465_v44 = vld [vmem:[%s4034_s27 + $0x58] sm:$0xff]  ;;  %v3474_v47 = vpack.i.bf16 %v1466_v42, %v1467_v40  ;;  %v1458_v55 = vld [vmem:[%s4034_s27 + $0x20] sm:$0xff] }
  0x66   : > { %v3479_v46 = vpack.i.bf16 %v1464_v43, %v1465_v44  ;;  %v1460_v49 = vld [vmem:[%s4034_s27 + $0x30] sm:$0xff]  ;;  %v1461_v50 = vld [vmem:[%s4034_s27 + $0x38] sm:$0xff]  ;;  %v1459_v56 = vld [vmem:[%s4034_s27 + $0x28] sm:$0xff] }
  0x67   : > { %1214 = vmatpush.msra.mxu1 %v1468_v36  ;;  %v1462_v61 = vld [vmem:[%s4034_s27 + $0x40] sm:$0xff] }
  0x68   : > { %3346 = vmatpush.xpose.msk.msra.mxu0 %vm698_vm0, %v3932_v2 }
  0x69   : > { %1215 = vmatpush.msra.mxu1 %v1467_v40 }
  0x6a   : > { %1502 = vrot.lane.b32.xlu1 %v3934_v3, %s3729_s12  ;;  %1498 = vrot.lane.b32.xlu0 %v3936_v4, %s3729_s12 }
  0x6b   : > { %1216 = vmatpush.msra.mxu1 %v1466_v42 }
  0x6c   : > { %3347 = vmatpush.xpose.msk.msra.mxu0 %vm698_vm0, %v676_v6  ;;  %1500 = vrot.lane.b32.xlu2 %v3948_v7, %s3729_s12 }
  0x6d   : > { %1217 = vmatpush.msra.mxu1 %v1465_v44 }
  0x6f   : > { %1218 = vmatpush.msra.mxu1 %v1464_v43 }
  0x70   : > { %3348 = vmatpush.xpose.msk.msra.mxu0 %vm698_vm0, %v675_v10 }
  0x72   : > { %1508 = vrot.lane.b32.xlu1 %v3954_v11, %s3729_s12  ;;  %1504 = vrot.lane.b32.xlu0 %v3956_v12, %s3729_s12 }
  0x74   : > { %3349 = vmatpush.xpose.msk.msra.mxu0 %vm698_vm0, %v674_v14  ;;  %1506 = vrot.lane.b32.xlu2 %v3967_v15, %s3729_s12 }
  0x78   : > { %3350 = vmatpush.xpose.msk.msra.mxu0 %vm698_vm0, %v673_v18 }
  0x7a   : > { %1514 = vrot.lane.b32.xlu1 %v3973_v19, %s3729_s12  ;;  %1510 = vrot.lane.b32.xlu0 %v3975_v20, %s3729_s12 }
  0x7c   : > { %3351 = vmatpush.xpose.msk.msra.mxu0 %vm698_vm0, %v672_v22  ;;  %1512 = vrot.lane.b32.xlu2 %v3986_v23, %s3729_s12 }
  0x80   : > { %3352 = vmatpush.xpose.msk.msra.mxu0 %vm698_vm0, %v671_v25 }
  0x82   : > { %1536 = vrot.lane.b32.xlu1 %v1439_v27, %s3729_s12  ;;  %1516 = vrot.lane.b32.xlu0 %v3991_v26, %s3729_s12 }
  0x84   : > { %3353 = vmatpush.xpose.msk.msra.mxu0 %vm698_vm0, %v670_v28  ;;  %1534 = vrot.lane.b32.xlu2 %v666_v30, %s3729_s12 }
  0x88   : > { %3354 = vmatpush.xpose.msk.msra.mxu0 %vm698_vm0, %v669_v29 }
  0x8a   : > { %1542 = vrot.lane.b32.xlu1 %v670_v28, %s3729_s12  ;;  %1538 = vrot.lane.b32.xlu0 %v1440_v31, %s3729_s12 }
  0x8c   : > { %3355 = vmatpush.xpose.msk.msra.mxu0 %vm698_vm0, %v1440_v31  ;;  %1540 = vrot.lane.b32.xlu2 %v669_v29, %s3729_s12 }
  0x90   : > { %3356 = vmatpush.xpose.msk.msra.mxu0 %vm698_vm0, %v1439_v27 }
  0x92   : > { %1548 = vrot.lane.b32.xlu1 %v673_v18, %s3729_s12  ;;  %1544 = vrot.lane.b32.xlu0 %v671_v25, %s3729_s12 }
  0x94   : > { %3357 = vmatpush.xpose.msk.msra.mxu0 %vm698_vm0, %v666_v30  ;;  %1546 = vrot.lane.b32.xlu2 %v672_v22, %s3729_s12 }
  0x97   : > { %3358 = vmatmul.msk.f32.vlgmr.msra.gmra.mxu0 %vm698_vm0, %v3890_v52 }
  0x9a   : > { %1554 = vrot.lane.b32.xlu1 %v676_v6, %s3729_s12  ;;  %1550 = vrot.lane.b32.xlu0 %v674_v14, %s3729_s12 }
  0x9c   : > { %1552 = vrot.lane.b32.xlu2 %v675_v10, %s3729_s12 }
  0x9f   : > { %3359 = vmatmul.msk.f32.gmra.mxu0 %vm698_vm0, %v3904_v57  ;;  %v3464_v57 = vpack.i.bf16 %v1459_v56, %v1458_v55 }
  0xa2   : > { %1562 = vrot.lane.b32.xlu1 %v3893_v53, %s3729_s12  ;;  %1556 = vrot.lane.b32.xlu0 %v3932_v2, %s3729_s12 }
  0xa4   : > { %1564 = vrot.lane.b32.xlu2 %v3879_v48, %s3729_s12 }
  0xa7   : > { %3360 = vmatmul.msk.f32.gmra.mxu0 %vm698_vm0, %v3888_v51  ;;  %v3489_v51 = vpack.i.bf16 %v1460_v49, %v1461_v50 }
  0xaa   : > { %1558 = vrot.lane.b32.xlu0 %v3919_v62, %s3729_s12  ;;  %3460 = vrot.lane.b32.xlu1 %v3459_v39, %s3729_s12  ;;  %v1463_v62 = vld [vmem:[%s4034_s27 + $0x48] sm:$0xff] }
  0xab   : > { %1219 = vmatpush.msra.mxu1 %v1463_v62 }
  0xac   : > { %1560 = vrot.lane.b32.xlu2 %v3907_v58, %s3729_s12 }
  0xad   : > { %1220 = vmatpush.msra.mxu1 %v1462_v61 }
  0xaf   : > { %3361 = vmatmul.msk.f32.gmra.mxu0 %vm698_vm0, %v3911_v60  ;;  %1221 = vmatpush.msra.mxu1 %v1461_v50 }
  0xb1   : > { %1222 = vmatpush.msra.mxu1 %v1460_v49 }
  0xb2   : > { %3455 = vrot.lane.b32.xlu0 %v3454_v35, %s3729_s12  ;;  %3480 = vrot.lane.b32.xlu1 %v3479_v46, %s3729_s12 }
  0xb3   : > { %1223 = vmatpush.msra.mxu1 %v1459_v56 }
  0xb4   : > { %3465 = vrot.lane.b32.xlu2 %v3464_v57, %s3729_s12 }
  0xb5   : > { %1224 = vmatpush.msra.mxu1 %v1458_v55 }
  0xb6   : > { %v4060_v45 = vpop.permute.xlu2 %1488 }
  0xb7   : > { %3362 = vmatmul.msk.f32.gmra.mxu0 %vm698_vm0, %v3925_v63  ;;  %v3484_v63 = vpack.i.bf16 %v1462_v61, %v1463_v62  ;;  %1225 = vmatpush.msra.mxu1 %v1457_v38 }
  0xb9   : > { %1226 = vmatpush.msra.mxu1 %v1456_v37 }
  0xba   : > { %3470 = vrot.lane.b32.xlu0 %v3469_v41, %s3729_s12 }
  0xbb   : > { %1227 = vmatpush.msra.mxu1 %v4040_v33 }
  0xbc   : > { %3485 = vrot.lane.b32.xlu2 %v3484_v63, %s3729_s12 }
  0xbd   : > { %1228 = vmatpush.msra.mxu1 %v4037_v32 }
  0xbe   : > { %v4066_v48 = vpop.permute.xlu2 %1494 }
  0xbf   : > { %3363 = vmatmul.msk.f32.gmra.mxu0 %vm698_vm0, %v3909_v59 }
  0xc2   : > { %3475 = vrot.lane.b32.xlu0 %v3474_v47, %s3729_s12 }
  0xc6   : > { %v4073_v52 = vpop.permute.xlu2 %1500 }
  0xc7   : > { %3364 = vmatmul.msk.f32.gmra.mxu0 %vm698_vm0, %v3936_v4 }
  0xca   : > { %3490 = vrot.lane.b32.xlu0 %v3489_v51, %s3729_s12 }
  0xcc   : > { %v4076_v53 = vpop.permute.xlu1 %1490  ;;  %v4078_v54 = vpop.permute.xlu0 %1486 }
  0xce   : > { %v4084_v58 = vpop.permute.xlu2 %1506 }
  0xcf   : > { %3365 = vmatmul.msk.f32.gmra.mxu0 %vm698_vm0, %v3948_v7 }
  0xd4   : > { %v4087_v59 = vpop.permute.xlu1 %1496  ;;  %v4089_v60 = vpop.permute.xlu0 %1492 }
  0xd6   : > { %v4095_v0 = vpop.permute.xlu2 %1512 }
  0xd7   : > { %3366 = vmatmul.msk.f32.gmra.mxu0 %vm698_vm0, %v3934_v3 }
  0xdc   : > { %v4098_v1 = vpop.permute.xlu1 %1502  ;;  %v4100_v2 = vpop.permute.xlu0 %1498 }
  0xde   : > { %v4104_v4 = vpop.permute.xlu2 %1534 }
  0xdf   : > { %3367 = vmatmul.msk.f32.gmra.mxu0 %vm698_vm0, %v3956_v12 }
  0xe4   : > { %v4106_v3 = vpop.permute.xlu1 %1508  ;;  %v4108_v5 = vpop.permute.xlu0 %1504 }
  0xe6   : > { %v4113_v6 = vpop.permute.xlu2 %1540 }
  0xe7   : > { %3368 = vmatmul.msk.f32.gmra.mxu0 %vm698_vm0, %v3967_v15 }
  0xec   : > { %v4116_v7 = vpop.permute.xlu1 %1514  ;;  %v4118_v8 = vpop.permute.xlu0 %1510 }
  0xee   : > { %v1547_v9 = vpop.permute.xlu2 %1546 }
  0xef   : > { %3369 = vmatmul.msk.f32.gmra.mxu0 %vm698_vm0, %v3954_v11 }
  0xf4   : > { %v4122_v10 = vpop.permute.xlu1 %1536  ;;  %v4124_v12 = vpop.permute.xlu0 %1516 }
  0xf6   : > { %v1553_v13 = vpop.permute.xlu2 %1552 }
  0xf7   : > { %3370 = vmatmul.msk.f32.gmra.mxu0 %vm698_vm0, %v3975_v20 }
  0xfc   : > { %v1543_v14 = vpop.permute.xlu1 %1542  ;;  %v4128_v15 = vpop.permute.xlu0 %1538 }
  0xfe   : > { %v1565_v16 = vpop.permute.xlu2 %1564 }
  0xff   : > { %3371 = vmatmul.msk.f32.gmra.mxu0 %vm698_vm0, %v3986_v23  ;;  %3374 = vmatpush.xpose.msk.msra.mxu2 %vm698_vm0, %v1565_v16 }
 0x104   : > { %v1549_v17 = vpop.permute.xlu1 %1548  ;;  %v1545_v11 = vpop.permute.xlu0 %1544 }
 0x106   : > { %v1561_v23 = vpop.permute.xlu2 %1560 }
 0x107   : > { %3372 = vmatmul.msk.f32.gmra.mxu0 %vm698_vm0, %v3973_v19 }
 0x10c   : > { %v1555_v18 = vpop.permute.xlu1 %1554  ;;  %v1551_v21 = vpop.permute.xlu0 %1550 }
 0x10e   : > { %v3466_v33 = vpop.permute.xlu2 %3465 }
 0x10f   : > { %3373 = vmatmul.msk.f32.gmra.mxu0 %vm698_vm0, %v3991_v26  ;;  %v3468_v50 = vunpack.i.h.bf16 %v3466_v33  ;;  %v3467_v55 = vunpack.i.l.bf16 %v3466_v33 }
 0x114   : > { %v1563_v20 = vpop.permute.xlu1 %1562  ;;  %v1557_v22 = vpop.permute.xlu0 %1556 }
 0x115   : > { %v4137_v24 = vpop.f32.mrf.mxu0  ;;  %3375 = vmatpush.xpose.msk.msra.mxu2 %vm698_vm0, %v1563_v20 }
 0x116   : > { %876 = vmax.xlane.f32.xlu0 %v4137_v24  ;;  %v3486_v40 = vpop.permute.xlu2 %3485 }
 0x117   : > { %v3487_v42 = vunpack.i.l.bf16 %v3486_v40  ;;  %v3488_v46 = vunpack.i.h.bf16 %v3486_v40 }
 0x119   : > { %3376 = vmatpush.xpose.msk.msra.mxu2 %vm698_vm0, %v1561_v23 }
 0x11c   : > { %v1559_v25 = vpop.permute.xlu0 %1558  ;;  %v3461_v28 = vpop.permute.xlu1 %3460 }
 0x11d   : > { %v4142_v27 = vpop.f32.mrf.mxu0  ;;  %3377 = vmatpush.xpose.msk.msra.mxu2 %vm698_vm0, %v1559_v25  ;;  %v3463_v56 = vunpack.i.h.bf16 %v3461_v28  ;;  %v3462_v57 = vunpack.i.l.bf16 %v3461_v28 }
 0x11e   : > { %878 = vmax.xlane.f32.xlu0 %v4142_v27 }
 0x121   : > { %3378 = vmatpush.xpose.msk.msra.mxu2 %vm698_vm0, %v1557_v22 }
 0x124   : > { %v4147_v19 = vpop.permute.xlu0 %3455  ;;  %v3481_v35 = vpop.permute.xlu1 %3480 }
 0x125   : > { %v4149_v26 = vpop.f32.mrf.mxu0  ;;  %3379 = vmatpush.xpose.msk.msra.mxu2 %vm698_vm0, %v1555_v18  ;;  %v3482_v39 = vunpack.i.l.bf16 %v3481_v35  ;;  %v3483_v41 = vunpack.i.h.bf16 %v3481_v35  ;;  %v3458_v61 = vunpack.i.h.bf16 %v4147_v19  ;;  %v3457_v63 = vunpack.i.l.bf16 %v4147_v19 }
 0x126   : > { %880 = vmax.xlane.f32.xlu1 %v4149_v26 }
 0x129   : > { %3380 = vmatpush.xpose.msk.msra.mxu2 %vm698_vm0, %v1553_v13 }
 0x12c   : > { %v3471_v29 = vpop.permute.xlu0 %3470 }
 0x12d   : > { %v4154_v30 = vpop.f32.mrf.mxu0  ;;  %3381 = vmatpush.xpose.msk.msra.mxu2 %vm698_vm0, %v1551_v21  ;;  %v3472_v31 = vunpack.i.l.bf16 %v3471_v29  ;;  %v3473_v32 = vunpack.i.h.bf16 %v3471_v29 }
 0x12e   : > { %882 = vmax.xlane.f32.xlu1 %v4154_v30 }
 0x12f   : > { %2113 = vmatpush.msra.mxu3 %v3472_v31 }
 0x131   : > { %3382 = vmatpush.xpose.msk.msra.mxu2 %vm698_vm0, %v1549_v17  ;;  %2114 = vmatpush.msra.mxu3 %v3473_v32 }
 0x134   : > { %v3476_v34 = vpop.permute.xlu0 %3475 }
 0x135   : > { %v4159_v36 = vpop.f32.mrf.mxu0  ;;  %3383 = vmatpush.xpose.msk.msra.mxu2 %vm698_vm0, %v1547_v9  ;;  %v3477_v37 = vunpack.i.l.bf16 %v3476_v34  ;;  %v3478_v38 = vunpack.i.h.bf16 %v3476_v34 }
 0x136   : > { %884 = vmax.xlane.f32.xlu2 %v4159_v36 }
 0x137   : > { %2115 = vmatpush.msra.mxu3 %v3477_v37 }
 0x139   : > { %3384 = vmatpush.xpose.msk.msra.mxu2 %vm698_vm0, %v1545_v11  ;;  %2116 = vmatpush.msra.mxu3 %v3478_v38 }
 0x13b   : > { %2117 = vmatpush.msra.mxu3 %v3482_v39 }
 0x13c   : > { %v3491_v43 = vpop.permute.xlu0 %3490 }
 0x13d   : > { %v4164_v44 = vpop.f32.mrf.mxu0  ;;  %3385 = vmatpush.xpose.msk.msra.mxu2 %vm698_vm0, %v1543_v14  ;;  %2118 = vmatpush.msra.mxu3 %v3483_v41  ;;  %v3492_v47 = vunpack.i.l.bf16 %v3491_v43  ;;  %v3493_v49 = vunpack.i.h.bf16 %v3491_v43 }
 0x13e   : > { %886 = vmax.xlane.f32.xlu2 %v4164_v44 }
 0x13f   : > { %2119 = vmatpush.msra.mxu3 %v3487_v42 }
 0x141   : > { %3386 = vmatpush.xpose.msk.msra.mxu2 %vm698_vm0, %v4113_v6  ;;  %2120 = vmatpush.msra.mxu3 %v3488_v46 }
 0x143   : > { %2121 = vmatpush.msra.mxu3 %v3492_v47 }
 0x145   : > { %v4170_v51 = vpop.f32.mrf.mxu0  ;;  %3387 = vmatpush.xpose.msk.msra.mxu2 %vm698_vm0, %v4128_v15  ;;  %2122 = vmatpush.msra.mxu3 %v3493_v49 }
 0x146   : > { %888 = vmax.xlane.f32.xlu0 %v4170_v51 }
 0x147   : > { %2123 = vmatpush.msra.mxu3 %v3468_v50 }
 0x149   : > { %3388 = vmatpush.xpose.msk.msra.mxu2 %vm698_vm0, %v4122_v10  ;;  %2124 = vmatpush.msra.mxu3 %v3467_v55  ;;  %v3730_v10 = vmov -inf  }
 0x14a   : > { %570 = vst.msk [vmem:[#allocation3] sm:$0xff] %vm569_vm1, %v3730_v10 }
 0x14b   : > { %2125 = vmatpush.msra.mxu3 %v3463_v56  ;;  %571 = vst.msk [vmem:[#allocation3 + $0x8] sm:$0xff] %vm569_vm1, %v3730_v10 }
 0x14c   : > { %572 = vst.msk [vmem:[#allocation3 + $0x10] sm:$0xff] %vm569_vm1, %v3730_v10 }
 0x14d   : > { %v4178_v62 = vpop.f32.mrf.mxu0  ;;  %3389 = vmatpush.xpose.msk.msra.mxu2 %vm698_vm0, %v4104_v4  ;;  %2126 = vmatpush.msra.mxu3 %v3462_v57  ;;  %573 = vst.msk [vmem:[#allocation3 + $0x18] sm:$0xff] %vm569_vm1, %v3730_v10 }
 0x14e   : > { %890 = vmax.xlane.f32.xlu1 %v4178_v62  ;;  %574 = vst.msk [vmem:[#allocation3 + $0x20] sm:$0xff] %vm569_vm1, %v3730_v10 }
 0x14f   : > { %2127 = vmatpush.msra.mxu3 %v3458_v61  ;;  %575 = vst.msk [vmem:[#allocation3 + $0x28] sm:$0xff] %vm569_vm1, %v3730_v10 }
 0x150   : > { %3390 = vmatmul.msk.f32.vlgmr.msra.gmra.mxu2 %vm698_vm0, %v4078_v54  ;;  %576 = vst.msk [vmem:[#allocation3 + $0x30] sm:$0xff] %vm569_vm1, %v3730_v10 }
 0x151   : > { %2128 = vmatpush.msra.mxu3 %v3457_v63  ;;  %577 = vst.msk [vmem:[#allocation3 + $0x38] sm:$0xff] %vm569_vm1, %v3730_v10 }
 0x152   : > { %578 = vst.msk [vmem:[#allocation3 + $0x40] sm:$0xff] %vm569_vm1, %v3730_v10  ;;  %v861_v15 = vld [vmem:[#allocation3 + $0x8] sm:$0xff] }
 0x153   : > { %579 = vst.msk [vmem:[#allocation3 + $0x48] sm:$0xff] %vm569_vm1, %v3730_v10 }
 0x154   : > { %580 = vst.msk [vmem:[#allocation3 + $0x50] sm:$0xff] %vm569_vm1, %v3730_v10 }
 0x155   : > { %v4186_v6 = vpop.f32.mrf.mxu0  ;;  %581 = vst.msk [vmem:[#allocation3 + $0x58] sm:$0xff] %vm569_vm1, %v3730_v10 }
 0x156   : > { %892 = vmax.xlane.f32.xlu2 %v4186_v6  ;;  %582 = vst.msk [vmem:[#allocation3 + $0x60] sm:$0xff] %vm569_vm1, %v3730_v10 }
 0x157   : > { %583 = vst.msk [vmem:[#allocation3 + $0x68] sm:$0xff] %vm569_vm1, %v3730_v10  ;;  %v4372_v33 = vld [vmem:[#allocation3 + $0x30] sm:$0xff] }
 0x158   : > { %3391 = vmatmul.msk.f32.gmra.mxu2 %vm698_vm0, %v4060_v45  ;;  %v3731_v45 = vmov 0   ;;  %584 = vst.msk [vmem:[#allocation3 + $0x70] sm:$0xff] %vm569_vm1, %v3730_v10  ;;  %v4381_v35 = vld [vmem:[#allocation3 + $0x38] sm:$0xff] }
 0x159   : > { %3494 = vset.pattern.permute.xlu1 %v3731_v45  ;;  %3495 = vset.pattern.permute.xlu2 %v3731_v45  ;;  %585 = vst.msk [vmem:[#allocation3 + $0x78] sm:$0xff] %vm569_vm1, %v3730_v10 }
 0x15a   : > { %3496 = vset.pattern.permute.xlu0 %v3731_v45  ;;  %586 = vst.msk [vmem:[#allocation3 + $0x80] sm:$0xff] %vm569_vm1, %v3730_v10 }
 0x15b   : > { %587 = vst.msk [vmem:[#allocation3 + $0x88] sm:$0xff] %vm569_vm1, %v3730_v10 }
 0x15c   : > { %588 = vst.msk [vmem:[#allocation3 + $0x90] sm:$0xff] %vm569_vm1, %v3730_v10  ;;  %v4419_v50 = vld [vmem:[#allocation3 + $0x58] sm:$0xff] }
 0x15d   : > { %v4191_v9 = vpop.f32.mrf.mxu0  ;;  %589 = vst.msk [vmem:[#allocation3 + $0x98] sm:$0xff] %vm569_vm1, %v3730_v10  ;;  %v4432_v63 = vld [vmem:[#allocation3 + $0x60] sm:$0xff] }
 0x15e   : > { %894 = vmax.xlane.f32.xlu0 %v4191_v9  ;;  %590 = vst.msk [vmem:[#allocation3 + $0xa0] sm:$0xff] %vm569_vm1, %v3730_v10 }
 0x15f   : > { %591 = vst.msk [vmem:[#allocation3 + $0xa8] sm:$0xff] %vm569_vm1, %v3730_v10 }
 0x160   : > { %3392 = vmatmul.msk.f32.gmra.mxu2 %vm698_vm0, %v4076_v53  ;;  %592 = vst.msk [vmem:[#allocation3 + $0xb0] sm:$0xff] %vm569_vm1, %v3730_v10 }
 0x161   : > { %593 = vst.msk [vmem:[#allocation3 + $0xb8] sm:$0xff] %vm569_vm1, %v3730_v10 }
 0x162   : > { %594 = vst.msk [vmem:[#allocation3 + $0xc0] sm:$0xff] %vm569_vm1, %v3730_v10 }
 0x163   : > { %595 = vst.msk [vmem:[#allocation3 + $0xc8] sm:$0xff] %vm569_vm1, %v3730_v10 }
 0x164   : > { %596 = vst.msk [vmem:[#allocation3 + $0xd0] sm:$0xff] %vm569_vm1, %v3730_v10 }
 0x165   : > { %v4196_v4 = vpop.f32.mrf.mxu0  ;;  %597 = vst.msk [vmem:[#allocation3 + $0xd8] sm:$0xff] %vm569_vm1, %v3730_v10 }
 0x166   : > { %896 = vmax.xlane.f32.xlu1 %v4196_v4  ;;  %598 = vst.msk [vmem:[#allocation3 + $0xe0] sm:$0xff] %vm569_vm1, %v3730_v10 }
 0x167   : > { %599 = vst.msk [vmem:[#allocation3 + $0xe8] sm:$0xff] %vm569_vm1, %v3730_v10 }
 0x168   : > { %3393 = vmatmul.msk.f32.gmra.mxu2 %vm698_vm0, %v4089_v60  ;;  %v4245_v60 = vld [vmem:[#allocation3] sm:$0xff]  ;;  %600 = vst.msk [vmem:[#allocation3 + $0xf0] sm:$0xff] %vm569_vm1, %v3730_v10 }
 0x169   : > { %601 = vst.msk [vmem:[#allocation3 + $0xf8] sm:$0xff] %vm569_vm1, %v3730_v10 }
 0x16d   : > { %v4201_v54 = vpop.f32.mrf.mxu0 }
 0x16e   : > { %898 = vmax.xlane.f32.xlu2 %v4201_v54 }
 0x170   : > { %3394 = vmatmul.msk.f32.gmra.mxu2 %vm698_vm0, %v4066_v48 }
 0x175   : > { %v4214_v53 = vpop.f32.mrf.mxu0 }
 0x176   : > { %900 = vmax.xlane.f32.xlu0 %v4214_v53 }
 0x178   : > { %3395 = vmatmul.msk.f32.gmra.mxu2 %vm698_vm0, %v4087_v59 }
 0x17d   : > { %v4227_v48 = vpop.f32.mrf.mxu0 }
 0x17e   : > { %902 = vmax.xlane.f32.xlu1 %v4227_v48 }
 0x180   : > { %3396 = vmatmul.msk.f32.gmra.mxu2 %vm698_vm0, %v4100_v2 }
 0x185   : > { %v4240_v59 = vpop.f32.mrf.mxu0 }
 0x186   : > { %904 = vmax.xlane.f32.xlu2 %v4240_v59 }
 0x188   : > { %3397 = vmatmul.msk.f32.gmra.mxu2 %vm698_vm0, %v4073_v52  ;;  %v3732_v52 = vmov 0.0  }
 0x189   : > { %v877_v2 = vpop.xlane.xlu0 %876  ;;  %604 = vst.msk [vmem:[#allocation4 + $0x10] sm:$0xff] %vm569_vm1, %v3732_v52 }
 0x18a   : > { %v4253_v13 = vmax.f32 %v4245_v60, %v877_v2  ;;  %602 = vst.msk [vmem:[#allocation4] sm:$0xff] %vm569_vm1, %v3732_v52 }
 0x18b   : > { %603 = vst.msk [vmem:[#allocation4 + $0x8] sm:$0xff] %vm569_vm1, %v3732_v52 }
 0x18c   : > { %v924_v14 = vsub.f32 %v4245_v60, %v4253_v13  ;;  %1197 = vst.msk [vmem:[#allocation3] sm:$0xff] %vm569_vm1, %v4253_v13 }
 0x18d   : > { %605 = vst.msk [vmem:[#allocation4 + $0x18] sm:$0xff] %vm569_vm1, %v3732_v52  ;;  %v4337_v19 = vpop.f32.mrf.mxu0 }
 0x18e   : > { %606 = vst.msk [vmem:[#allocation4 + $0x20] sm:$0xff] %vm569_vm1, %v3732_v52  ;;  %906 = vmax.xlane.f32.xlu0 %v4337_v19  ;;  %v940_v56 = vmul.f32 1.442695, %v924_v14  ;;  %v4444_v14 = vld [vmem:[#allocation3 + $0x68] sm:$0xff] }
 0x18f   : > { %607 = vst.msk [vmem:[#allocation4 + $0x28] sm:$0xff] %vm569_vm1, %v3732_v52 }
 0x190   : > { %3398 = vmatmul.msk.f32.gmra.mxu2 %vm698_vm0, %v4098_v1  ;;  %608 = vst.msk [vmem:[#allocation4 + $0x30] sm:$0xff] %vm569_vm1, %v3732_v52  ;;  %v4282_v1 = vld [vmem:[#allocation3 + $0x10] sm:$0xff] }
 0x191   : > { %v879_v16 = vpop.xlane.xlu0 %878  ;;  %609 = vst.msk [vmem:[#allocation4 + $0x38] sm:$0xff] %vm569_vm1, %v3732_v52 }
 0x192   : > { %v909_v17 = vmax.f32 %v861_v15, %v879_v16  ;;  %610 = vst.msk [vmem:[#allocation4 + $0x40] sm:$0xff] %vm569_vm1, %v3732_v52 }
 0x193   : > { %611 = vst.msk [vmem:[#allocation4 + $0x48] sm:$0xff] %vm569_vm1, %v3732_v52 }
 0x194   : > { %1198 = vst.msk [vmem:[#allocation3 + $0x8] sm:$0xff] %vm569_vm1, %v909_v17  ;;  %v925_v11 = vsub.f32 %v861_v15, %v909_v17 }
 0x195   : > { %612 = vst.msk [vmem:[#allocation4 + $0x50] sm:$0xff] %vm569_vm1, %v3732_v52 }
 0x196   : > { %v942_v18 = vmul.f32 1.442695, %v925_v11  ;;  %613 = vst.msk [vmem:[#allocation4 + $0x58] sm:$0xff] %vm569_vm1, %v3732_v52 }
 0x197   : > { %974 = vperm.xlu1 %3494, %v4253_v13   ;;  %614 = vst.msk [vmem:[#allocation4 + $0x60] sm:$0xff] %vm569_vm1, %v3732_v52 }
 0x198   : > { %3399 = vmatmul.msk.f32.gmra.mxu2 %vm698_vm0, %v4108_v5  ;;  %3497 = vpow2.f32 %v942_v18  ;;  %615 = vst.msk [vmem:[#allocation4 + $0x68] sm:$0xff] %vm569_vm1, %v3732_v52  ;;  %v4305_v5 = vld [vmem:[#allocation3 + $0x18] sm:$0xff] }
 0x199   : > { %v881_v21 = vpop.xlane.xlu1 %880  ;;  %616 = vst.msk [vmem:[#allocation4 + $0x70] sm:$0xff] %vm569_vm1, %v3732_v52  ;;  %3499 = vpow2.f32 %v940_v56 }
 0x19a   : > { %v4293_v20 = vmax.f32 %v4282_v1, %v881_v21  ;;  %617 = vst.msk [vmem:[#allocation4 + $0x78] sm:$0xff] %vm569_vm1, %v3732_v52 }
 0x19b   : > { %618 = vst.msk [vmem:[#allocation4 + $0x80] sm:$0xff] %vm569_vm1, %v3732_v52 }
 0x19c   : > { %1199 = vst.msk [vmem:[#allocation3 + $0x10] sm:$0xff] %vm569_vm1, %v4293_v20  ;;  %v926_v10 = vsub.f32 %v4282_v1, %v4293_v20 }
 0x19d   : > { %619 = vst.msk [vmem:[#allocation4 + $0x88] sm:$0xff] %vm569_vm1, %v3732_v52 }
 0x19e   : > { %979 = vperm.xlu2 %3495, %v909_v17   ;;  %620 = vst.msk [vmem:[#allocation4 + $0x90] sm:$0xff] %vm569_vm1, %v3732_v52  ;;  %v4320_v25 = vpop.eup %3497  ;;  %v944_v13 = vmul.f32 1.442695, %v926_v10  ;;  %v4454_v17 = vld [vmem:[#allocation3 + $0x70] sm:$0xff]  ;;  %v4485_v10 = vld [vmem:[#allocation3 + $0x78] sm:$0xff] }
 0x19f   : > { %621 = vst.msk [vmem:[#allocation4 + $0x98] sm:$0xff] %vm569_vm1, %v3732_v52  ;;  %v4439_v2 = vpop.eup %3499 }
 0x1a0   : > { %3400 = vmatmul.msk.f32.gmra.mxu2 %vm698_vm0, %v4084_v58  ;;  %622 = vst.msk [vmem:[#allocation4 + $0xa0] sm:$0xff] %vm569_vm1, %v3732_v52  ;;  %v4331_v58 = vld [vmem:[#allocation3 + $0x20] sm:$0xff]  ;;  %3501 = vpow2.f32 %v944_v13 }
 0x1a1   : > { %v883_v22 = vpop.xlane.xlu1 %882  ;;  %623 = vst.msk [vmem:[#allocation4 + $0xa8] sm:$0xff] %vm569_vm1, %v3732_v52 }
 0x1a2   : > { %v4316_v23 = vmax.f32 %v4305_v5, %v883_v22  ;;  %624 = vst.msk [vmem:[#allocation4 + $0xb0] sm:$0xff] %vm569_vm1, %v3732_v52 }
 0x1a3   : > { %625 = vst.msk [vmem:[#allocation4 + $0xb8] sm:$0xff] %vm569_vm1, %v3732_v52 }
 0x1a4   : > { %1200 = vst.msk [vmem:[#allocation3 + $0x18] sm:$0xff] %vm569_vm1, %v4316_v23 }
 0x1a5   : > { %626 = vst.msk [vmem:[#allocation4 + $0xc0] sm:$0xff] %vm569_vm1, %v3732_v52 }
 0x1a6   : > { %1301 = vperm.xlu2 %3495, %v4320_v25   ;;  %627 = vst.msk [vmem:[#allocation4 + $0xc8] sm:$0xff] %vm569_vm1, %v3732_v52  ;;  %v4452_v16 = vpop.eup %3501 }
 0x1a7   : > { %628 = vst.msk [vmem:[#allocation4 + $0xd0] sm:$0xff] %vm569_vm1, %v3732_v52 }
 0x1a8   : > { %3401 = vmatmul.msk.f32.gmra.mxu2 %vm698_vm0, %v4106_v3  ;;  %629 = vst.msk [vmem:[#allocation4 + $0xd8] sm:$0xff] %vm569_vm1, %v3732_v52  ;;  %v4357_v3 = vld [vmem:[#allocation3 + $0x28] sm:$0xff] }
 0x1a9   : > { %v885_v28 = vpop.xlane.xlu2 %884  ;;  %630 = vst.msk [vmem:[#allocation4 + $0xe0] sm:$0xff] %vm569_vm1, %v3732_v52 }
 0x1aa   : > { %v4345_v29 = vmax.f32 %v4331_v58, %v885_v28  ;;  %631 = vst.msk [vmem:[#allocation4 + $0xe8] sm:$0xff] %vm569_vm1, %v3732_v52 }
 0x1ab   : > { %632 = vst.msk [vmem:[#allocation4 + $0xf0] sm:$0xff] %vm569_vm1, %v3732_v52 }
 0x1ac   : > { %1201 = vst.msk [vmem:[#allocation3 + $0x20] sm:$0xff] %vm569_vm1, %v4345_v29 }
 0x1ad   : > { %633 = vst.msk [vmem:[#allocation4 + $0xf8] sm:$0xff] %vm569_vm1, %v3732_v52 }
 0x1b0   : > { %3402 = vmatmul.msk.f32.gmra.mxu2 %vm698_vm0, %v4118_v8 }
 0x1b1   : > { %v887_v31 = vpop.xlane.xlu2 %886 }
 0x1b2   : > { %v4368_v32 = vmax.f32 %v4357_v3, %v887_v31 }
 0x1b4   : > { %1202 = vst.msk [vmem:[#allocation3 + $0x28] sm:$0xff] %vm569_vm1, %v4368_v32 }
 0x1b8   : > { %3403 = vmatmul.msk.f32.gmra.mxu2 %vm698_vm0, %v4095_v0  ;;  %v4390_v0 = vld [vmem:[#allocation3 + $0x40] sm:$0xff] }
 0x1b9   : > { %v889_v34 = vpop.xlane.xlu0 %888 }
 0x1ba   : > { %v4377_v8 = vmax.f32 %v4372_v33, %v889_v34 }
 0x1bc   : > { %1203 = vst.msk [vmem:[#allocation3 + $0x30] sm:$0xff] %vm569_vm1, %v4377_v8 }
 0x1c0   : > { %3404 = vmatmul.msk.f32.gmra.mxu2 %vm698_vm0, %v4116_v7  ;;  %v4399_v7 = vld [vmem:[#allocation3 + $0x48] sm:$0xff] }
 0x1c1   : > { %v891_v37 = vpop.xlane.xlu1 %890 }
 0x1c2   : > { %v4386_v38 = vmax.f32 %v4381_v35, %v891_v37 }
 0x1c4   : > { %1204 = vst.msk [vmem:[#allocation3 + $0x38] sm:$0xff] %vm569_vm1, %v4386_v38 }
 0x1c8   : > { %3405 = vmatmul.msk.f32.gmra.mxu2 %vm698_vm0, %v4124_v12  ;;  %v4409_v12 = vld [vmem:[#allocation3 + $0x50] sm:$0xff] }
 0x1c9   : > { %v893_v39 = vpop.xlane.xlu2 %892 }
 0x1ca   : > { %v4395_v40 = vmax.f32 %v4390_v0, %v893_v39 }
 0x1cc   : > { %1205 = vst.msk [vmem:[#allocation3 + $0x40] sm:$0xff] %vm569_vm1, %v4395_v40 }
 0x1d1   : > { %v895_v41 = vpop.xlane.xlu0 %894 }
 0x1d2   : > { %v4402_v42 = vmax.f32 %v4399_v7, %v895_v41  ;;  %v927_v41 = vsub.f32 %v4305_v5, %v4316_v23 }
 0x1d3   : > { %v4404_v43 = vpop.f32.mrf.mxu2 }
 0x1d4   : > { %1712 = vmax.xlane.f32.xlu1 %v4404_v43  ;;  %1206 = vst.msk [vmem:[#allocation3 + $0x48] sm:$0xff] %vm569_vm1, %v4402_v42  ;;  %v946_v56 = vmul.f32 1.442695, %v927_v41 }
 0x1d9   : > { %v897_v46 = vpop.xlane.xlu1 %896 }
 0x1da   : > { %v4412_v47 = vmax.f32 %v4409_v12, %v897_v46 }
 0x1db   : > { %v4414_v49 = vpop.f32.mrf.mxu2 }
 0x1dc   : > { %1714 = vmax.xlane.f32.xlu0 %v4414_v49  ;;  %1207 = vst.msk [vmem:[#allocation3 + $0x50] sm:$0xff] %vm569_vm1, %v4412_v47 }
 0x1e1   : > { %v899_v55 = vpop.xlane.xlu2 %898 }
 0x1e2   : > { %v4425_v57 = vmax.f32 %v4419_v50, %v899_v55 }
 0x1e3   : > { %v4427_v61 = vpop.f32.mrf.mxu2 }
 0x1e4   : > { %1716 = vmax.xlane.f32.xlu2 %v4427_v61  ;;  %1208 = vst.msk [vmem:[#allocation3 + $0x58] sm:$0xff] %vm569_vm1, %v4425_v57 }
 0x1e9   : > { %v901_v45 = vpop.xlane.xlu0 %900 }
 0x1ea   : > { %v4437_v60 = vmax.f32 %v4432_v63, %v901_v45 }
 0x1eb   : > { %v4469_v37 = vpop.f32.mrf.mxu2 }
 0x1ec   : > { %1209 = vst.msk [vmem:[#allocation3 + $0x60] sm:$0xff] %vm569_vm1, %v4437_v60 }
 0x1ed   : > { %1296 = vperm.xlu1 %3494, %v4439_v2   ;;  %5504 = vst [vmem:[#allocation8_spill] sm:$0xff] %v4469_v37 }
 0x1f0   : > { %984 = vperm.xlu0 %3496, %v4293_v20  }
 0x1f1   : > { %v903_v52 = vpop.xlane.xlu1 %902 }
 0x1f2   : > { %v4448_v15 = vmax.f32 %v4444_v14, %v903_v52 }
 0x1f4   : > { %1210 = vst.msk [vmem:[#allocation3 + $0x68] sm:$0xff] %vm569_vm1, %v4448_v15 }
 0x1f8   : > { %1306 = vperm.xlu0 %3496, %v4452_v16  }
 0x1f9   : > { %v905_v11 = vpop.xlane.xlu2 %904 }
 0x1fa   : > { %v4458_v1 = vmax.f32 %v4454_v17, %v905_v11  ;;  %v4505_v11 = vld [vmem:[#allocation3 + $0x80] sm:$0xff] }
 0x1fc   : > { %1211 = vst.msk [vmem:[#allocation3 + $0x70] sm:$0xff] %vm569_vm1, %v4458_v1  ;;  %989 = vperm.xlu2 %3495, %v4316_v23   ;;  %v929_v23 = vsub.f32 %v4357_v3, %v4368_v32  ;;  %v4513_v3 = vld [vmem:[#allocation3 + $0x88] sm:$0xff] }
 0x1fe   : > { %v950_v52 = vmul.f32 1.442695, %v929_v23 }
 0x201   : > { %v980_v20 = vpop.permute.xlu2 %979  ;;  %v907_v45 = vpop.xlane.xlu0 %906 }
 0x202   : > { %v1053_v28 = vsub.f32 %v4142_v27, %v980_v20  ;;  %v928_v27 = vsub.f32 %v4331_v58, %v4345_v29  ;;  %v4488_v13 = vmax.f32 %v4485_v10, %v907_v45 }
 0x204   : > { %999 = vperm.xlu2 %3495, %v4368_v32   ;;  %v1070_v31 = vmul.f32 1.442695, %v1053_v28  ;;  %v948_v46 = vmul.f32 1.442695, %v928_v27  ;;  %1212 = vst.msk [vmem:[#allocation3 + $0x78] sm:$0xff] %vm569_vm1, %v4488_v13 }
 0x209   : > { %v975_v18 = vpop.permute.xlu1 %974  ;;  %v4515_v32 = vpop.permute.xlu2 %1301 }
 0x20a   : > { %v1052_v21 = vsub.f32 %v4137_v24, %v975_v18  ;;  %v4475_v24 = vpop.f32.mrf.mxu2  ;;  %5509 = vst [vmem:[#allocation13_spill] sm:$0xff] %v4515_v32 }
 0x20b   : > { %5505 = vst [vmem:[#allocation9_spill] sm:$0xff] %v4475_v24 }
 0x20c   : > { %v1068_v22 = vmul.f32 1.442695, %v1052_v21 }
 0x20e   : > { %3503 = vpow2.f32 %v1068_v22 }
 0x20f   : > { %3505 = vpow2.f32 %v1070_v31  ;;  %v4524_v31 = vld [vmem:[#allocation3 + $0x90] sm:$0xff] }
 0x210   : > { %3507 = vpow2.f32 %v948_v46 }
 0x211   : > { %3509 = vpow2.f32 %v946_v56 }
 0x212   : > { %v4482_v55 = vpop.f32.mrf.mxu2  ;;  %3511 = vpow2.f32 %v950_v52  ;;  %v931_v52 = vsub.f32 %v4381_v35, %v4386_v38 }
 0x213   : > { %5506 = vst [vmem:[#allocation10_spill] sm:$0xff] %v4482_v55 }
 0x214   : > { %v4466_v34 = vpop.eup %3503 }
 0x215   : > { %1229 = vmatmul.f32.vlgmr.msra.gmra.mxu1 %v4466_v34  ;;  %v4472_v39 = vpop.eup %3505 }
 0x216   : > { %v4493_v5 = vpop.eup %3507 }
 0x217   : > { %1718 = vmax.xlane.f32.xlu1 %v4469_v37  ;;  %5507 = vst [vmem:[#allocation11_spill] sm:$0xff] %v4493_v5  ;;  %v4498_v58 = vpop.eup %3509 }
 0x21a   : > { %v4522_v28 = vpop.f32.mrf.mxu2 }
 0x21b   : > { %5510 = vst [vmem:[#allocation14_spill] sm:$0xff] %v4522_v28 }
 0x21d   : > { %1232 = vmatmul.f32.gmra.mxu1 %v4472_v39 }
 0x222   : > { %1720 = vmax.xlane.f32.xlu0 %v4475_v24  ;;  %v4531_v46 = vpop.f32.mrf.mxu2 }
 0x223   : > { %5511 = vst [vmem:[#allocation15_spill] sm:$0xff] %v4531_v46 }
 0x22d   : > { %1722 = vmax.xlane.f32.xlu2 %v4482_v55 }
 0x230   : > { %994 = vperm.xlu1 %3494, %v4345_v29   ;;  %v4502_v29 = vpop.eup %3511 }
 0x231   : > { %5508 = vst [vmem:[#allocation12_spill] sm:$0xff] %v4502_v29 }
 0x236   : > { %1316 = vperm.xlu0 %3496, %v4493_v5  }
 0x238   : > { %1311 = vperm.xlu1 %3494, %v4498_v58  }
 0x240   : > { %1004 = vperm.xlu1 %3494, %v4377_v8  }
 0x245   : > { %1321 = vperm.xlu2 %3495, %v4502_v29  }
 0x247   : > { %v1713_v18 = vpop.xlane.xlu1 %1712 }
 0x248   : > { %v4508_v21 = vmax.f32 %v4505_v11, %v1713_v18 }
 0x24a   : > { %2033 = vst.msk [vmem:[#allocation3 + $0x80] sm:$0xff] %vm569_vm1, %v4508_v21 }
 0x24d   : > { %1009 = vperm.xlu2 %3495, %v4386_v38  }
 0x24f   : > { %v1715_v20 = vpop.xlane.xlu0 %1714 }
 0x250   : > { %v4518_v22 = vmax.f32 %v4513_v3, %v1715_v20 }
 0x252   : > { %2034 = vst.msk [vmem:[#allocation3 + $0x88] sm:$0xff] %vm569_vm1, %v4518_v22 }
 0x257   : > { %v1717_v27 = vpop.xlane.xlu2 %1716 }
 0x258   : > { %v4527_v41 = vmax.f32 %v4524_v31, %v1717_v27  ;;  %v954_v27 = vmul.f32 1.442695, %v931_v52 }
 0x25a   : > { %2035 = vst.msk [vmem:[#allocation3 + $0x90] sm:$0xff] %vm569_vm1, %v4527_v41 }
 0x25f   : > { %v990_v23 = vpop.permute.xlu2 %989 }
 0x260   : > { %1726 = vmax.xlane.f32.xlu0 %v4531_v46  ;;  %v1055_v20 = vsub.f32 %v4154_v30, %v990_v23  ;;  %v4549_v30 = vpop.f32.mrf.mxu2 }
 0x261   : > { %5513 = vst [vmem:[#allocation17_spill] sm:$0xff] %v4549_v30 }
 0x262   : > { %v985_v56 = vpop.permute.xlu0 %984  ;;  %v1074_v32 = vmul.f32 1.442695, %v1055_v20 }
 0x263   : > { %v1054_v45 = vsub.f32 %v4149_v26, %v985_v56  ;;  %v930_v26 = vsub.f32 %v4372_v33, %v4377_v8  ;;  %v4558_v33 = vpop.permute.xlu1 %1296 }
 0x264   : > { %5514 = vst [vmem:[#allocation18_spill] sm:$0xff] %v4558_v33 }
 0x265   : > { %v1072_v18 = vmul.f32 1.442695, %v1054_v45  ;;  %v952_v38 = vmul.f32 1.442695, %v930_v26  ;;  %v4561_v45 = vld [vmem:[#allocation3 + $0x98] sm:$0xff] }
 0x267   : > { %3513 = vpow2.f32 %v1072_v18 }
 0x268   : > { %3515 = vpow2.f32 %v954_v27 }
 0x269   : > { %3517 = vpow2.f32 %v1074_v32  ;;  %v932_v32 = vsub.f32 %v4390_v0, %v4395_v40  ;;  %v4574_v0 = vld [vmem:[#allocation3 + $0xa0] sm:$0xff] }
 0x26a   : > { %1724 = vmax.xlane.f32.xlu1 %v4522_v28  ;;  %3519 = vpow2.f32 %v952_v38  ;;  %v4569_v20 = vpop.permute.xlu0 %1306  ;;  %v1000_v38 = vpop.permute.xlu2 %999 }
 0x26b   : > { %v956_v8 = vmul.f32 1.442695, %v932_v32  ;;  %v4584_v32 = vld [vmem:[#allocation3 + $0xa8] sm:$0xff] }
 0x26d   : > { %v4539_v5 = vpop.eup %3513  ;;  %3521 = vpow2.f32 %v956_v8 }
 0x26e   : > { %1235 = vmatmul.f32.gmra.mxu1 %v4539_v5  ;;  %v4542_v46 = vpop.eup %3515 }
 0x26f   : > { %5512 = vst [vmem:[#allocation16_spill] sm:$0xff] %v4542_v46  ;;  %v4547_v35 = vpop.eup %3517 }
 0x270   : > { %v4556_v56 = vpop.eup %3519 }
 0x273   : > { %v4567_v18 = vpop.eup %3521 }
 0x274   : > { %1331 = vperm.xlu0 %3496, %v4542_v46   ;;  %5515 = vst [vmem:[#allocation19_spill] sm:$0xff] %v4567_v18 }
 0x276   : > { %1728 = vmax.xlane.f32.xlu2 %v4549_v30  ;;  %1238 = vmatmul.f32.gmra.mxu1 %v4547_v35  ;;  %v1057_v30 = vsub.f32 %v4164_v44, %v1000_v38 }
 0x278   : > { %v1078_v55 = vmul.f32 1.442695, %v1057_v30 }
 0x27c   : > { %1019 = vperm.xlu0 %3496, %v4402_v42  }
 0x283   : > { %1326 = vperm.xlu1 %3494, %v4556_v56  }
 0x28a   : > { %v1719_v23 = vpop.xlane.xlu1 %1718 }
 0x28b   : > { %v4564_v52 = vmax.f32 %v4561_v45, %v1719_v23  ;;  %1014 = vperm.xlu1 %3494, %v4395_v40   ;;  %v4582_v40 = vpop.f32.mrf.mxu2 }
 0x28c   : > { %5516 = vst [vmem:[#allocation20_spill] sm:$0xff] %v4582_v40 }
 0x28d   : > { %2036 = vst.msk [vmem:[#allocation3 + $0x98] sm:$0xff] %vm569_vm1, %v4564_v52 }
 0x28e   : > { %1336 = vperm.xlu2 %3495, %v4567_v18  }
 0x293   : > { %v4592_v46 = vpop.f32.mrf.mxu2 }
 0x294   : > { %5517 = vst [vmem:[#allocation21_spill] sm:$0xff] %v4592_v46 }
 0x295   : > { %v1721_v27 = vpop.xlane.xlu0 %1720 }
 0x296   : > { %v4577_v26 = vmax.f32 %v4574_v0, %v1721_v27  ;;  %1024 = vperm.xlu2 %3495, %v4412_v47  }
 0x298   : > { %2037 = vst.msk [vmem:[#allocation3 + $0xa0] sm:$0xff] %vm569_vm1, %v4577_v26 }
 0x2a0   : > { %v1723_v8 = vpop.xlane.xlu2 %1722 }
 0x2a1   : > { %v4587_v23 = vmax.f32 %v4584_v32, %v1723_v8  ;;  %v934_v8 = vsub.f32 %v4409_v12, %v4412_v47 }
 0x2a2   : > { %v995_v33 = vpop.permute.xlu1 %994 }
 0x2a3   : > { %2038 = vst.msk [vmem:[#allocation3 + $0xa8] sm:$0xff] %vm569_vm1, %v4587_v23  ;;  %v1056_v27 = vsub.f32 %v4159_v36, %v995_v33  ;;  %v960_v37 = vmul.f32 1.442695, %v934_v8  ;;  %v935_v8 = vsub.f32 %v4419_v50, %v4425_v57  ;;  %v4644_v50 = vpop.f32.mrf.mxu1 }
 0x2a4   : > { %5524 = vst [vmem:[#allocation28_spill] sm:$0xff] %v4644_v50 }
 0x2a5   : > { %v1076_v18 = vmul.f32 1.442695, %v1056_v27 }
 0x2a6   : > { %1732 = vmax.xlane.f32.xlu0 %v4592_v46 }
 0x2a7   : > { %3523 = vpow2.f32 %v1076_v18 }
 0x2a8   : > { %v4600_v29 = vpop.permute.xlu2 %1321  ;;  %3525 = vpow2.f32 %v1078_v55 }
 0x2a9   : > { %5519 = vst [vmem:[#allocation23_spill] sm:$0xff] %v4600_v29  ;;  %3527 = vpow2.f32 %v960_v37  ;;  %v4616_v37 = vpop.f32.mrf.mxu2  ;;  %v1376_v29 = vmul.f32 0.0, %v4569_v20 }
 0x2aa   : > { %v4596_v28 = vpop.permute.xlu1 %1311  ;;  %5521 = vst [vmem:[#allocation25_spill] sm:$0xff] %v4616_v37 }
 0x2ab   : > { %5518 = vst [vmem:[#allocation22_spill] sm:$0xff] %v4596_v28 }
 0x2ad   : > { %v4602_v24 = vpop.eup %3523 }
 0x2ae   : > { %1241 = vmatmul.f32.gmra.mxu1 %v4602_v24  ;;  %v4607_v38 = vpop.eup %3525 }
 0x2af   : > { %v4611_v47 = vpop.eup %3527 }
 0x2b0   : > { %v1010_v44 = vpop.permute.xlu2 %1009  ;;  %5520 = vst [vmem:[#allocation24_spill] sm:$0xff] %v4611_v47 }
 0x2b1   : > { %v1059_v12 = vsub.f32 %v4178_v62, %v1010_v44 }
 0x2b2   : > { %v1005_v36 = vpop.permute.xlu1 %1004 }
 0x2b3   : > { %v1058_v33 = vsub.f32 %v4170_v51, %v1005_v36  ;;  %v1082_v55 = vmul.f32 1.442695, %v1059_v12  ;;  %v933_v51 = vsub.f32 %v4399_v7, %v4402_v42  ;;  %v4628_v36 = vpop.permute.xlu0 %1316  ;;  %v4633_v42 = vld [vmem:[#allocation3 + $0xb8] sm:$0xff] }
 0x2b4   : > { %5522 = vst [vmem:[#allocation26_spill] sm:$0xff] %v4628_v36 }
 0x2b5   : > { %v1080_v18 = vmul.f32 1.442695, %v1058_v33  ;;  %1730 = vmax.xlane.f32.xlu1 %v4582_v40  ;;  %v958_v62 = vmul.f32 1.442695, %v933_v51  ;;  %v962_v33 = vmul.f32 1.442695, %v935_v8  ;;  %v4654_v8 = vpop.f32.mrf.mxu2 }
 0x2b6   : > { %1244 = vmatmul.f32.gmra.mxu1 %v4607_v38 }
 0x2b7   : > { %3529 = vpow2.f32 %v1080_v18 }
 0x2b8   : > { %3531 = vpow2.f32 %v1082_v55  ;;  %v4646_v55 = vld [vmem:[#allocation3 + $0xb0] sm:$0xff] }
 0x2b9   : > { %3533 = vpow2.f32 %v958_v62 }
 0x2ba   : > { %1346 = vperm.xlu0 %3496, %v4611_v47   ;;  %3535 = vpow2.f32 %v962_v33  ;;  %v4656_v33 = vpop.f32.mrf.mxu1 }
 0x2bb   : > { %5525 = vst [vmem:[#allocation29_spill] sm:$0xff] %v4656_v33  ;;  %v937_v33 = vsub.f32 %v4444_v14, %v4448_v15 }
 0x2bd   : > { %v4614_v30 = vpop.eup %3529  ;;  %v4664_v50 = vpop.f32.mrf.mxu2  ;;  %v966_v47 = vmul.f32 1.442695, %v937_v33 }
 0x2be   : > { %1247 = vmatmul.f32.gmra.mxu1 %v4614_v30  ;;  %v4623_v27 = vpop.eup %3531 }
 0x2bf   : > { %1734 = vmax.xlane.f32.xlu2 %v4616_v37  ;;  %v4630_v7 = vpop.eup %3533  ;;  %3537 = vpow2.f32 %v966_v47 }
 0x2c0   : > { %v4638_v12 = vpop.eup %3535 }
 0x2c1   : > { %5523 = vst [vmem:[#allocation27_spill] sm:$0xff] %v4638_v12 }
 0x2c2   : > { %1034 = vperm.xlu0 %3496, %v4437_v60  }
 0x2c5   : > { %v4680_v40 = vpop.eup %3537  ;;  %v4685_v33 = vpop.f32.mrf.mxu2 }
 0x2c6   : > { %1250 = vmatmul.f32.gmra.mxu1 %v4623_v27  ;;  %5530 = vst [vmem:[#allocation34_spill] sm:$0xff] %v4680_v40 }
 0x2c7   : > { %5531 = vst [vmem:[#allocation35_spill] sm:$0xff] %v4685_v33 }
 0x2ce   : > { %1341 = vperm.xlu1 %3494, %v4630_v7  }
 0x2d3   : > { %v1727_v44 = vpop.xlane.xlu0 %1726 }
 0x2d4   : > { %v4636_v18 = vmax.f32 %v4633_v42, %v1727_v44 }
 0x2d6   : > { %2040 = vst.msk [vmem:[#allocation3 + $0xb8] sm:$0xff] %vm569_vm1, %v4636_v18  ;;  %1029 = vperm.xlu1 %3494, %v4425_v57   ;;  %v4658_v57 = vld [vmem:[#allocation3 + $0xc0] sm:$0xff] }
 0x2d7   : > { %1351 = vperm.xlu2 %3495, %v4638_v12  }
 0x2dd   : > { %v1725_v51 = vpop.xlane.xlu1 %1724 }
 0x2de   : > { %v4649_v62 = vmax.f32 %v4646_v55, %v1725_v51 }
 0x2df   : > { %1039 = vperm.xlu2 %3495, %v4448_v15  }
 0x2e0   : > { %2039 = vst.msk [vmem:[#allocation3 + $0xb0] sm:$0xff] %vm569_vm1, %v4649_v62 }
 0x2e6   : > { %v4673_v12 = vpop.permute.xlu0 %1331 }
 0x2e7   : > { %5527 = vst [vmem:[#allocation31_spill] sm:$0xff] %v4673_v12 }
 0x2e9   : > { %v1729_v44 = vpop.xlane.xlu2 %1728 }
 0x2ea   : > { %v4662_v28 = vmax.f32 %v4658_v57, %v1729_v44 }
 0x2eb   : > { %v1236_v51 = vpop.f32.mrf.mxu1 }
 0x2ec   : > { %2041 = vst.msk [vmem:[#allocation3 + $0xc0] sm:$0xff] %vm569_vm1, %v4662_v28  ;;  %v4668_v36 = vadd.f32 %v1376_v29, %v1236_v51  ;;  %1738 = vmax.xlane.f32.xlu0 %v4664_v50 }
 0x2ee   : > { %5526 = vst [vmem:[#allocation30_spill] sm:$0xff] %v4668_v36  ;;  %v1020_v29 = vpop.permute.xlu0 %1019 }
 0x2ef   : > { %v1061_v14 = vsub.f32 %v4191_v9, %v1020_v29 }
 0x2f1   : > { %v4677_v44 = vpop.permute.xlu2 %1336  ;;  %v1086_v15 = vmul.f32 1.442695, %v1061_v14 }
 0x2f2   : > { %5529 = vst [vmem:[#allocation33_spill] sm:$0xff] %v4677_v44 }
 0x2f5   : > { %v4675_v20 = vpop.permute.xlu1 %1326 }
 0x2f6   : > { %5528 = vst [vmem:[#allocation32_spill] sm:$0xff] %v4675_v20 }
 0x2f9   : > { %v1025_v47 = vpop.permute.xlu2 %1024 }
 0x2fd   : > { %v1015_v37 = vpop.permute.xlu1 %1014 }
 0x2fe   : > { %v1060_v46 = vsub.f32 %v4186_v6, %v1015_v37  ;;  %v936_v6 = vsub.f32 %v4432_v63, %v4437_v60  ;;  %v4703_v60 = vld [vmem:[#allocation3 + $0xd0] sm:$0xff] }
 0x300   : > { %v1084_v51 = vmul.f32 1.442695, %v1060_v46  ;;  %1736 = vmax.xlane.f32.xlu1 %v4654_v8  ;;  %1361 = vperm.xlu0 %3496, %v4680_v40   ;;  %v1062_v46 = vsub.f32 %v4196_v4, %v1025_v47  ;;  %v964_v9 = vmul.f32 1.442695, %v936_v6  ;;  %v4718_v6 = vld [vmem:[#allocation3 + $0xc8] sm:$0xff] }
 0x302   : > { %3539 = vpow2.f32 %v1084_v51  ;;  %v1088_v37 = vmul.f32 1.442695, %v1062_v46  ;;  %v938_v51 = vsub.f32 %v4454_v17, %v4458_v1 }
 0x303   : > { %3541 = vpow2.f32 %v1086_v15 }
 0x304   : > { %3543 = vpow2.f32 %v964_v9  ;;  %v968_v14 = vmul.f32 1.442695, %v938_v51 }
 0x305   : > { %3545 = vpow2.f32 %v1088_v37  ;;  %v4725_v37 = vld [vmem:[#allocation3 + $0xd8] sm:$0xff] }
 0x306   : > { %3547 = vpow2.f32 %v968_v14 }
 0x308   : > { %v4687_v36 = vpop.eup %3539  ;;  %1740 = vmax.xlane.f32.xlu2 %v4685_v33  ;;  %1049 = vperm.xlu0 %3496, %v4488_v13  }
 0x309   : > { %1253 = vmatmul.f32.gmra.mxu1 %v4687_v36  ;;  %v4695_v29 = vpop.eup %3541 }
 0x30a   : > { %v4701_v63 = vpop.eup %3543 }
 0x30b   : > { %v4705_v15 = vpop.eup %3545 }
 0x30c   : > { %v4714_v17 = vpop.eup %3547 }
 0x30d   : > { %5532 = vst [vmem:[#allocation36_spill] sm:$0xff] %v4714_v17 }
 0x310   : > { %1810 = vperm.xlu0 %3496, %v4508_v21  }
 0x311   : > { %1256 = vmatmul.f32.gmra.mxu1 %v4695_v29 }
 0x319   : > { %1356 = vperm.xlu1 %3494, %v4701_v63   ;;  %1259 = vmatmul.f32.gmra.mxu1 %v4705_v15  ;;  %v1733_v4 = vpop.xlane.xlu0 %1732 }
 0x31a   : > { %v4710_v47 = vmax.f32 %v4703_v60, %v1733_v4 }
 0x31c   : > { %2043 = vst.msk [vmem:[#allocation3 + $0xd0] sm:$0xff] %vm569_vm1, %v4710_v47 }
 0x320   : > { %1366 = vperm.xlu2 %3495, %v4714_v17  }
 0x321   : > { %1044 = vperm.xlu1 %3494, %v4458_v1  }
 0x328   : > { %v1731_v46 = vpop.xlane.xlu1 %1730 }
 0x329   : > { %v4721_v9 = vmax.f32 %v4718_v6, %v1731_v46  ;;  %v1762_v46 = vsub.f32 %v4524_v31, %v4527_v41 }
 0x32b   : > { %2042 = vst.msk [vmem:[#allocation3 + $0xc8] sm:$0xff] %vm569_vm1, %v4721_v9  ;;  %v1780_v17 = vmul.f32 1.442695, %v1762_v46 }
 0x32c   : > { %v4733_v1 = vpop.permute.xlu0 %1346 }
 0x32d   : > { %5533 = vst [vmem:[#allocation37_spill] sm:$0xff] %v4733_v1 }
 0x332   : > { %v1735_v51 = vpop.xlane.xlu2 %1734 }
 0x333   : > { %v4728_v14 = vmax.f32 %v4725_v37, %v1735_v51  ;;  %v4743_v51 = vpop.f32.mrf.mxu2 }
 0x334   : > { %v1035_v40 = vpop.permute.xlu0 %1034 }
 0x335   : > { %2044 = vst.msk [vmem:[#allocation3 + $0xd8] sm:$0xff] %vm569_vm1, %v4728_v14 }
 0x33a   : > { %1136 = vadd.xlane.f32.xlu0 %v4539_v5  ;;  %v4739_v44 = vpop.permute.xlu2 %1351  ;;  %v1064_v5 = vsub.f32 %v4214_v53, %v1035_v40  ;;  %v1765_v53 = vsub.f32 %v4584_v32, %v4587_v23 }
 0x33b   : > { %5535 = vst [vmem:[#allocation39_spill] sm:$0xff] %v4739_v44 }
 0x33c   : > { %v1092_v31 = vmul.f32 1.442695, %v1064_v5 }
 0x340   : > { %v4735_v4 = vpop.permute.xlu1 %1341 }
 0x341   : > { %5534 = vst [vmem:[#allocation38_spill] sm:$0xff] %v4735_v4 }
 0x342   : > { %v1040_v44 = vpop.permute.xlu2 %1039 }
 0x348   : > { %v1030_v20 = vpop.permute.xlu1 %1029 }
 0x349   : > { %v1063_v12 = vsub.f32 %v4201_v54, %v1030_v20  ;;  %1132 = vadd.xlane.f32.xlu2 %v4466_v34  ;;  %v939_v54 = vsub.f32 %v4485_v10, %v4488_v13  ;;  %v1786_v10 = vmul.f32 1.442695, %v1765_v53  ;;  %v1760_v13 = vsub.f32 %v4505_v11, %v4508_v21 }
 0x34b   : > { %v1090_v33 = vmul.f32 1.442695, %v1063_v12  ;;  %1742 = vmax.xlane.f32.xlu1 %v4743_v51  ;;  %v1065_v12 = vsub.f32 %v4227_v48, %v1040_v44  ;;  %v970_v40 = vmul.f32 1.442695, %v939_v54  ;;  %v4766_v48 = vld [vmem:[#allocation3 + $0xe8] sm:$0xff] }
 0x34d   : > { %3549 = vpow2.f32 %v1090_v33  ;;  %v1094_v20 = vmul.f32 1.442695, %v1065_v12  ;;  %v1761_v33 = vsub.f32 %v4513_v3, %v4518_v22  ;;  %v1776_v3 = vmul.f32 1.442695, %v1760_v13 }
 0x34e   : > { %1825 = vperm.xlu0 %3496, %v4564_v52   ;;  %3551 = vpow2.f32 %v1780_v17 }
 0x34f   : > { %3553 = vpow2.f32 %v1092_v31  ;;  %v1778_v44 = vmul.f32 1.442695, %v1761_v33  ;;  %v4790_v31 = vld [vmem:[#allocation3 + $0xe0] sm:$0xff] }
 0x350   : > { %3555 = vpow2.f32 %v970_v40  ;;  %v4799_v40 = vld [vmem:[#allocation3 + $0xf0] sm:$0xff] }
 0x351   : > { %3557 = vpow2.f32 %v1094_v20 }
 0x352   : > { %3559 = vpow2.f32 %v1786_v10 }
 0x353   : > { %v4748_v4 = vpop.eup %3549  ;;  %3561 = vpow2.f32 %v1778_v44 }
 0x354   : > { %1262 = vmatmul.f32.gmra.mxu1 %v4748_v4  ;;  %v4753_v34 = vpop.eup %3551  ;;  %3563 = vpow2.f32 %v1776_v3 }
 0x355   : > { %v4761_v17 = vpop.eup %3553 }
 0x356   : > { %2206 = vperm.xlu0 %3496, %v4753_v34   ;;  %v4773_v5 = vpop.eup %3555 }
 0x357   : > { %v4777_v11 = vpop.eup %3557 }
 0x358   : > { %v4781_v21 = vpop.eup %3559 }
 0x35c   : > { %1265 = vmatmul.f32.gmra.mxu1 %v4761_v17 }
 0x35e   : > { %1835 = vperm.xlu0 %3496, %v4587_v23   ;;  %v4784_v23 = vpop.eup %3561 }
 0x35f   : > { %v1739_v32 = vpop.xlane.xlu0 %1738 }
 0x360   : > { %v4770_v46 = vmax.f32 %v4766_v48, %v1739_v32 }
 0x361   : > { %1815 = vperm.xlu2 %3495, %v4518_v22   ;;  %v4787_v22 = vpop.eup %3563 }
 0x362   : > { %2046 = vst.msk [vmem:[#allocation3 + $0xe8] sm:$0xff] %vm569_vm1, %v4770_v46 }
 0x364   : > { %1371 = vperm.xlu1 %3494, %v4773_v5   ;;  %1268 = vmatmul.f32.gmra.mxu1 %v4777_v11 }
 0x366   : > { %2221 = vperm.xlu0 %3496, %v4781_v21  }
 0x369   : > { %2201 = vperm.xlu2 %3495, %v4784_v23  }
 0x36c   : > { %2196 = vperm.xlu1 %3494, %v4787_v22  }
 0x372   : > { %v4792_v54 = vpop.permute.xlu0 %1361 }
 0x373   : > { %5536 = vst [vmem:[#allocation40_spill] sm:$0xff] %v4792_v54  ;;  %v1737_v12 = vpop.xlane.xlu1 %1736 }
 0x374   : > { %v4795_v53 = vmax.f32 %v4790_v31, %v1737_v12 }
 0x376   : > { %2045 = vst.msk [vmem:[#allocation3 + $0xe0] sm:$0xff] %vm569_vm1, %v4795_v53 }
 0x37a   : > { %v1050_v20 = vpop.permute.xlu0 %1049 }
 0x37b   : > { %v1741_v33 = vpop.xlane.xlu2 %1740 }
 0x37c   : > { %v4802_v10 = vmax.f32 %v4799_v40, %v1741_v33 }
 0x37e   : > { %2047 = vst.msk [vmem:[#allocation3 + $0xf0] sm:$0xff] %vm569_vm1, %v4802_v10 }
 0x382   : > { %v1811_v13 = vpop.permute.xlu0 %1810 }
 0x383   : > { %v1888_v44 = vsub.f32 %v4404_v43, %v1811_v13  ;;  %v1067_v43 = vsub.f32 %v4337_v19, %v1050_v20 }
 0x385   : > { %v1904_v32 = vmul.f32 1.442695, %v1888_v44  ;;  %v1098_v13 = vmul.f32 1.442695, %v1067_v43  ;;  %v1768_v44 = vsub.f32 %v4658_v57, %v4662_v28  ;;  %v1102_v57 = vld [vmem:[#allocation4 + $0x10] sm:$0xff] }
 0x387   : > { %3565 = vpow2.f32 %v1904_v32 }
 0x38b   : > { %v4807_v3 = vpop.permute.xlu1 %1356 }
 0x38d   : > { %v4809_v12 = vpop.eup %3565 }
 0x38e   : > { %2129 = vmatmul.f32.vlgmr.msra.gmra.mxu3 %v4809_v12 }
 0x390   : > { %1144 = vadd.xlane.f32.xlu0 %v4614_v30  ;;  %v1792_v30 = vmul.f32 1.442695, %v1768_v44 }
 0x392   : > { %1138 = vadd.xlane.f32.xlu2 %v4547_v35  ;;  %v1764_v35 = vsub.f32 %v4574_v0, %v4577_v26 }
 0x393   : > { %v1045_v33 = vpop.permute.xlu1 %1044 }
 0x394   : > { %v1066_v54 = vsub.f32 %v4240_v59, %v1045_v33  ;;  %v1784_v19 = vmul.f32 1.442695, %v1764_v35 }
 0x396   : > { %v1096_v1 = vmul.f32 1.442695, %v1066_v54  ;;  %1134 = vadd.xlane.f32.xlu1 %v4472_v39  ;;  %v1763_v39 = vsub.f32 %v4561_v45, %v4564_v52  ;;  %v4840_v45 = vpop.permute.xlu2 %1366 }
 0x397   : > { %5537 = vst [vmem:[#allocation41_spill] sm:$0xff] %v4840_v45 }
 0x398   : > { %3567 = vpow2.f32 %v1096_v1  ;;  %v1782_v54 = vmul.f32 1.442695, %v1763_v39 }
 0x399   : > { %3569 = vpow2.f32 %v1098_v13  ;;  %v4846_v13 = vld [vmem:[#allocation3 + $0xf8] sm:$0xff] }
 0x39a   : > { %3571 = vpow2.f32 %v1792_v30 }
 0x39b   : > { %3573 = vpow2.f32 %v1784_v19 }
 0x39c   : > { %3575 = vpow2.f32 %v1782_v54 }
 0x39e   : > { %v4819_v32 = vpop.eup %3567 }
 0x39f   : > { %1271 = vmatmul.f32.gmra.mxu1 %v4819_v32  ;;  %v4825_v59 = vpop.eup %3569 }
 0x3a0   : > { %v4831_v1 = vpop.eup %3571 }
 0x3a1   : > { %v4837_v33 = vpop.eup %3573 }
 0x3a2   : > { %v4842_v52 = vpop.eup %3575 }
 0x3a4   : > { %1850 = vperm.xlu0 %3496, %v4662_v28   ;;  %v1118_v28 = vmul.f32 %v4452_v16, %v1102_v57 }
 0x3a7   : > { %1274 = vmatmul.f32.gmra.mxu1 %v4825_v59 }
 0x3aa   : > { %1830 = vperm.xlu2 %3495, %v4577_v26   ;;  %v1100_v26 = vld [vmem:[#allocation4] sm:$0xff] }
 0x3ab   : > { %v1116_v16 = vmul.f32 %v4439_v2, %v1100_v26 }
 0x3ac   : > { %2236 = vperm.xlu0 %3496, %v4831_v1  }
 0x3ad   : > { %v1137_v0 = vpop.xlane.xlu0 %1136 }
 0x3ae   : > { %v1166_v20 = vadd.f32 %v1137_v0, %v1118_v28 }
 0x3af   : > { %1820 = vperm.xlu1 %3494, %v4527_v41  }
 0x3b0   : > { %1183 = vst.msk [vmem:[#allocation4 + $0x10] sm:$0xff] %vm569_vm1, %v1166_v20  ;;  %v1766_v20 = vsub.f32 %v4646_v55, %v4649_v62 }
 0x3b2   : > { %2216 = vperm.xlu2 %3495, %v4837_v33  }
 0x3b7   : > { %2211 = vperm.xlu1 %3494, %v4842_v52  }
 0x3bc   : > { %v1133_v43 = vpop.xlane.xlu2 %1132 }
 0x3bd   : > { %v1164_v41 = vadd.f32 %v1133_v43, %v1116_v16  ;;  %v1106_v16 = vld [vmem:[#allocation4 + $0x30] sm:$0xff] }
 0x3be   : > { %v1743_v44 = vpop.xlane.xlu1 %1742 }
 0x3bf   : > { %1181 = vst.msk [vmem:[#allocation4] sm:$0xff] %vm569_vm1, %v1164_v41  ;;  %v4850_v30 = vmax.f32 %v4846_v13, %v1743_v44  ;;  %v1122_v41 = vmul.f32 %v4556_v56, %v1106_v16 }
 0x3c0   : > { %v1826_v2 = vpop.permute.xlu0 %1825 }
 0x3c1   : > { %2048 = vst.msk [vmem:[#allocation3 + $0xf8] sm:$0xff] %vm569_vm1, %v4850_v30 }
 0x3c4   : > { %v1816_v35 = vpop.permute.xlu2 %1815 }
 0x3c5   : > { %v1889_v19 = vsub.f32 %v4414_v49, %v1816_v35  ;;  %v1767_v49 = vsub.f32 %v4633_v42, %v4636_v18 }
 0x3c7   : > { %v1906_v39 = vmul.f32 1.442695, %v1889_v19  ;;  %v1790_v28 = vmul.f32 1.442695, %v1767_v49 }
 0x3c8   : > { %v4861_v54 = vpop.permute.xlu0 %2206 }
 0x3c9   : > { %3577 = vpow2.f32 %v1906_v39  ;;  %v1101_v39 = vld [vmem:[#allocation4 + $0x8] sm:$0xff] }
 0x3ca   : > { %3579 = vpow2.f32 %v1790_v28  ;;  %v1117_v28 = vmul.f32 %v4320_v25, %v1101_v39 }
 0x3cc   : > { %v4877_v42 = vpop.permute.xlu2 %2201 }
 0x3cf   : > { %v4855_v57 = vpop.eup %3577 }
 0x3d0   : > { %2132 = vmatmul.f32.gmra.mxu3 %v4855_v57  ;;  %v1836_v0 = vpop.permute.xlu0 %1835  ;;  %v4871_v26 = vpop.eup %3579 }
 0x3d6   : > { %1150 = vadd.xlane.f32.xlu0 %v4695_v29  ;;  %v1788_v29 = vmul.f32 1.442695, %v1766_v20 }
 0x3d8   : > { %3581 = vpow2.f32 %v1788_v29 }
 0x3db   : > { %1142 = vadd.xlane.f32.xlu2 %v4607_v38  ;;  %v4869_v38 = vpop.permute.xlu1 %1371 }
 0x3de   : > { %v4879_v43 = vpop.eup %3581 }
 0x3e1   : > { %1140 = vadd.xlane.f32.xlu1 %v4602_v24  ;;  %v4874_v24 = vpop.permute.xlu0 %2221 }
 0x3e3   : > { %v4881_v55 = vpop.permute.xlu1 %2196 }
 0x3ea   : > { %1865 = vperm.xlu0 %3496, %v4728_v14  }
 0x3f3   : > { %1845 = vperm.xlu2 %3495, %v4636_v18   ;;  %v1103_v18 = vld [vmem:[#allocation4 + $0x18] sm:$0xff] }
 0x3fa   : > { %1840 = vperm.xlu1 %3494, %v4649_v62   ;;  %v1119_v62 = vmul.f32 %v4498_v58, %v1103_v18  ;;  %v5538_v58 = vld [vmem:[#allocation8_spill] sm:$0xff] }
 0x3fb   : > { %2231 = vperm.xlu2 %3495, %v4871_v26   ;;  %v1891_v18 = vsub.f32 %v5538_v58, %v1826_v2  ;;  %v5540_v2 = vld [vmem:[#allocation10_spill] sm:$0xff] }
 0x3fc   : > { %v1893_v39 = vsub.f32 %v5540_v2, %v1836_v0  ;;  %v1104_v2 = vld [vmem:[#allocation4 + $0x20] sm:$0xff] }
 0x402   : > { %2226 = vperm.xlu1 %3494, %v4879_v43  }
 0x403   : > { %v1145_v44 = vpop.xlane.xlu0 %1144 }
 0x404   : > { %v1170_v35 = vadd.f32 %v1145_v44, %v1122_v41  ;;  %v1910_v44 = vmul.f32 1.442695, %v1891_v18 }
 0x405   : > { %v1139_v19 = vpop.xlane.xlu2 %1138 }
 0x406   : > { %1187 = vst.msk [vmem:[#allocation4 + $0x30] sm:$0xff] %vm569_vm1, %v1170_v35  ;;  %v1167_v49 = vadd.f32 %v1139_v19, %v1119_v62 }
 0x408   : > { %1184 = vst.msk [vmem:[#allocation4 + $0x18] sm:$0xff] %vm569_vm1, %v1167_v49 }
 0x409   : > { %v1135_v20 = vpop.xlane.xlu1 %1134 }
 0x40a   : > { %v1165_v29 = vadd.f32 %v1135_v20, %v1117_v28  ;;  %v1914_v20 = vmul.f32 1.442695, %v1893_v39 }
 0x40c   : > { %1182 = vst.msk [vmem:[#allocation4 + $0x8] sm:$0xff] %vm569_vm1, %v1165_v29  ;;  %v1769_v29 = vsub.f32 %v4718_v6, %v4721_v9 }
 0x40d   : > { %v1831_v35 = vpop.permute.xlu2 %1830 }
 0x414   : > { %1156 = vadd.xlane.f32.xlu0 %v4761_v17  ;;  %v5539_v17 = vld [vmem:[#allocation9_spill] sm:$0xff] }
 0x415   : > { %v1892_v62 = vsub.f32 %v5539_v17, %v1831_v35 }
 0x416   : > { %v1851_v49 = vpop.permute.xlu0 %1850 }
 0x421   : > { %v1821_v56 = vpop.permute.xlu1 %1820 }
 0x422   : > { %v1890_v16 = vsub.f32 %v4427_v61, %v1821_v56  ;;  %v1912_v61 = vmul.f32 1.442695, %v1892_v62  ;;  %v1794_v56 = vmul.f32 1.442695, %v1769_v29  ;;  %v1771_v29 = vsub.f32 %v4725_v37, %v4728_v14 }
 0x424   : > { %v1908_v41 = vmul.f32 1.442695, %v1890_v16  ;;  %1148 = vadd.xlane.f32.xlu2 %v4687_v36  ;;  %v1770_v36 = vsub.f32 %v4703_v60, %v4710_v47  ;;  %v4912_v60 = vpop.permute.xlu0 %2236 }
 0x426   : > { %3583 = vpow2.f32 %v1908_v41  ;;  %v1796_v28 = vmul.f32 1.442695, %v1770_v36  ;;  %v4921_v41 = vpop.permute.xlu2 %2216 }
 0x427   : > { %3585 = vpow2.f32 %v1910_v44  ;;  %v1105_v44 = vld [vmem:[#allocation4 + $0x28] sm:$0xff] }
 0x428   : > { %1880 = vperm.xlu0 %3496, %v4802_v10   ;;  %3587 = vpow2.f32 %v1912_v61 }
 0x429   : > { %3589 = vpow2.f32 %v1796_v28  ;;  %v4926_v17 = vpop.permute.xlu1 %2211 }
 0x42a   : > { %3591 = vpow2.f32 %v1914_v20 }
 0x42b   : > { %3593 = vpow2.f32 %v1794_v56  ;;  %v1798_v56 = vmul.f32 1.442695, %v1771_v29 }
 0x42c   : > { %v4895_v25 = vpop.eup %3583  ;;  %1146 = vadd.xlane.f32.xlu1 %v4623_v27 }
 0x42d   : > { %2135 = vmatmul.f32.gmra.mxu3 %v4895_v25  ;;  %v4900_v19 = vpop.eup %3585  ;;  %3595 = vpow2.f32 %v1798_v56  ;;  %v1108_v56 = vld [vmem:[#allocation4 + $0x40] sm:$0xff] }
 0x42e   : > { %v4906_v27 = vpop.eup %3587 }
 0x42f   : > { %v4914_v16 = vpop.eup %3589 }
 0x430   : > { %v4916_v0 = vpop.eup %3591 }
 0x431   : > { %v4924_v35 = vpop.eup %3593 }
 0x435   : > { %2138 = vmatmul.f32.gmra.mxu3 %v4900_v19 }
 0x43c   : > { %1860 = vperm.xlu2 %3495, %v4710_v47   ;;  %v1109_v47 = vld [vmem:[#allocation4 + $0x48] sm:$0xff] }
 0x43d   : > { %2141 = vmatmul.f32.gmra.mxu3 %v4906_v27  ;;  %v1125_v6 = vmul.f32 %v4630_v7, %v1109_v47  ;;  %v5542_v7 = vld [vmem:[#allocation11_spill] sm:$0xff]  ;;  %v1774_v47 = vsub.f32 %v4799_v40, %v4802_v10 }
 0x43e   : > { %v1120_v39 = vmul.f32 %v5542_v7, %v1104_v2 }
 0x444   : > { %2246 = vperm.xlu2 %3495, %v4914_v16  }
 0x445   : > { %1855 = vperm.xlu1 %3494, %v4721_v9   ;;  %2144 = vmatmul.f32.gmra.mxu3 %v4916_v0  ;;  %v5541_v9 = vld [vmem:[#allocation12_spill] sm:$0xff] }
 0x446   : > { %v1121_v62 = vmul.f32 %v5541_v9, %v1105_v44 }
 0x449   : > { %v1151_v58 = vpop.xlane.xlu0 %1150 }
 0x44a   : > { %v1173_v18 = vadd.f32 %v1151_v58, %v1125_v6  ;;  %v1804_v6 = vmul.f32 1.442695, %v1774_v47  ;;  %v2405_v47 = vld [vmem:[#allocation4] sm:$0xff] }
 0x44b   : > { %vm2426_vm3 = vweird.f32 %v2405_v47 }
 0x44c   : > { %1190 = vst.msk [vmem:[#allocation4 + $0x48] sm:$0xff] %vm569_vm1, %v1173_v18  ;;  %v4940_v18 = vpop.eup %3595  ;;  %3597 = vpow2.f32 %v1804_v6  ;;  %v5546_v6 = vld [vmem:[#allocation19_spill] sm:$0xff] }
 0x44d   : > { %2241 = vperm.xlu1 %3494, %v4924_v35  }
 0x44e   : > { %v1143_v61 = vpop.xlane.xlu2 %1142 }
 0x44f   : > { %v1169_v36 = vadd.f32 %v1143_v61, %v1121_v62  ;;  %v5544_v62 = vld [vmem:[#allocation15_spill] sm:$0xff] }
 0x451   : > { %1186 = vst.msk [vmem:[#allocation4 + $0x28] sm:$0xff] %vm569_vm1, %v1169_v36 }
 0x452   : > { %1162 = vadd.xlane.f32.xlu0 %v4825_v59  ;;  %v5543_v59 = vld [vmem:[#allocation14_spill] sm:$0xff]  ;;  %v4946_v14 = vpop.eup %3597 }
 0x454   : > { %v1141_v28 = vpop.xlane.xlu1 %1140 }
 0x455   : > { %v1168_v20 = vadd.f32 %v1141_v28, %v1120_v39  ;;  %v1112_v39 = vld [vmem:[#allocation4 + $0x60] sm:$0xff] }
 0x456   : > { %v1846_v9 = vpop.permute.xlu2 %1845  ;;  %v1128_v28 = vmul.f32 %v4701_v63, %v1112_v39 }
 0x457   : > { %1185 = vst.msk [vmem:[#allocation4 + $0x20] sm:$0xff] %vm569_vm1, %v1168_v20  ;;  %v1895_v37 = vsub.f32 %v5544_v62, %v1846_v9  ;;  %v1107_v9 = vld [vmem:[#allocation4 + $0x38] sm:$0xff] }
 0x459   : > { %v1918_v61 = vmul.f32 1.442695, %v1895_v37  ;;  %v5547_v37 = vld [vmem:[#allocation16_spill] sm:$0xff] }
 0x45a   : > { %1971 = vadd.xlane.f32.xlu0 %v4855_v57 }
 0x45c   : > { %v4956_v7 = vpop.permute.xlu0 %1865 }
 0x46c   : > { %v1841_v58 = vpop.permute.xlu1 %1840 }
 0x46d   : > { %v1894_v44 = vsub.f32 %v5543_v59, %v1841_v58  ;;  %1154 = vadd.xlane.f32.xlu2 %v4748_v4  ;;  %v5545_v4 = vld [vmem:[#allocation17_spill] sm:$0xff]  ;;  %v1124_v58 = vmul.f32 %v5546_v6, %v1108_v56 }
 0x46e   : > { %2251 = vperm.xlu0 %3496, %v4940_v18   ;;  %v1896_v10 = vsub.f32 %v5545_v4, %v1851_v49  ;;  %v4965_v49 = vpop.permute.xlu2 %2231 }
 0x46f   : > { %v1916_v57 = vmul.f32 1.442695, %v1894_v44 }
 0x470   : > { %v1920_v36 = vmul.f32 1.442695, %v1896_v10 }
 0x471   : > { %3599 = vpow2.f32 %v1916_v57  ;;  %v2408_v57 = vld [vmem:[#allocation4 + $0x18] sm:$0xff] }
 0x472   : > { %3601 = vpow2.f32 %v1918_v61  ;;  %v1123_v61 = vmul.f32 %v5547_v37, %v1107_v9  ;;  %vm2471_vm7 = vweird.f32 %v2408_v57 }
 0x473   : > { %3603 = vpow2.f32 %v1920_v36 }
 0x474   : > { %v4969_v59 = vpop.permute.xlu1 %2226  ;;  %3605 = vrcp.f32 %v2405_v47 }
 0x475   : > { %3607 = vrcp.f32 %v2408_v57 }
 0x476   : > { %2266 = vperm.xlu0 %3496, %v4946_v14  }
 0x477   : > { %v4949_v40 = vpop.eup %3599  ;;  %1152 = vadd.xlane.f32.xlu1 %v4705_v15 }
 0x478   : > { %2147 = vmatmul.f32.gmra.mxu3 %v4949_v40  ;;  %v4954_v2 = vpop.eup %3601 }
 0x479   : > { %v4961_v20 = vpop.eup %3603 }
 0x47a   : > { %v3606_v62 = vpop.eup %3605 }
 0x47b   : > { %v2422_v36 = vmul.f32 %v3606_v62, %v2405_v47  ;;  %vm2427_vm2 = vweird.f32 %v3606_v62 }
 0x47c   : > { %vm2428_vm4 = vmor %vm2426_vm3, %vm2427_vm2 }
 0x47d   : > { %v2423_v39 = vsub.f32 1.0, %v2422_v36 }
 0x480   : > { %2150 = vmatmul.f32.gmra.mxu3 %v4954_v2 }
 0x485   : > { %1875 = vperm.xlu2 %3495, %v4770_v46  }
 0x487   : > { %v1157_v15 = vpop.xlane.xlu0 %1156 }
 0x488   : > { %v1176_v29 = vadd.f32 %v1157_v15, %v1128_v28  ;;  %2153 = vmatmul.f32.gmra.mxu3 %v4961_v20  ;;  %v3608_v28 = vpop.eup %3607  ;;  %v2424_v15 = vmul.f32 %v3606_v62, %v2423_v39  ;;  %v5548_v39 = vld [vmem:[#allocation20_spill] sm:$0xff] }
 0x489   : > { %vm2472_vm6 = vweird.f32 %v3608_v28 }
 0x48a   : > { %1193 = vst.msk [vmem:[#allocation4 + $0x60] sm:$0xff] %vm569_vm1, %v1176_v29  ;;  %v2467_v29 = vmul.f32 %v3608_v28, %v2408_v57  ;;  %v2425_v56 = vadd.f32 %v3606_v62, %v2424_v15  ;;  %vm2473_vm8 = vmor %vm2471_vm7, %vm2472_vm6 }
 0x48c   : > { %v2468_v6 = vsub.f32 1.0, %v2467_v29 }
 0x48e   : > { %v2469_v9 = vmul.f32 %v3608_v28, %v2468_v6  ;;  %v5549_v6 = vld [vmem:[#allocation21_spill] sm:$0xff] }
 0x490   : > { %1870 = vperm.xlu1 %3494, %v4795_v53  }
 0x497   : > { %v1149_v44 = vpop.xlane.xlu2 %1148 }
 0x498   : > { %v1172_v63 = vadd.f32 %v1149_v44, %v1124_v58  ;;  %v2432_v58 = vand.u32 2147483648, %v2405_v47  ;;  %v2430_v44 = vand.u32 2147483647, %v2405_v47 }
 0x49a   : > { %1189 = vst.msk [vmem:[#allocation4 + $0x40] sm:$0xff] %vm569_vm1, %v1172_v63  ;;  %v2429_v63 = vsel %vm2428_vm4, %v3606_v62, %v2425_v56  ;;  %v2433_v37 = vor.u32 1.1754944e-38, %v2432_v58  ;;  %vm2431_vm5 = vcmp.eq.f32.partialorder %v2430_v44, 8.507059e+37  ;;  %v4980_v44 = vpop.permute.xlu0 %1880 }
 0x49f   : > { %v1147_v4 = vpop.xlane.xlu1 %1146  ;;  %v1861_v47 = vpop.permute.xlu2 %1860 }
 0x4a0   : > { %v1171_v10 = vadd.f32 %v1147_v4, %v1123_v61  ;;  %1977 = vadd.xlane.f32.xlu0 %v4906_v27  ;;  %v2434_v27 = vsel %vm2431_vm5, %v2433_v37, %v2429_v63  ;;  %v2470_v61 = vadd.f32 %v3608_v28, %v2469_v9  ;;  %v2477_v4 = vand.u32 2147483648, %v2408_v57  ;;  %v1115_v63 = vld [vmem:[#allocation4 + $0x78] sm:$0xff] }
 0x4a1   : > { %v1898_v58 = vsub.f32 %v5549_v6, %v1861_v47 }
 0x4a2   : > { %1188 = vst.msk [vmem:[#allocation4 + $0x38] sm:$0xff] %vm569_vm1, %v1171_v10  ;;  %v2475_v10 = vand.u32 2147483647, %v2408_v57  ;;  %v2474_v15 = vsel %vm2473_vm8, %v3608_v28, %v2470_v61  ;;  %v2478_v29 = vor.u32 1.1754944e-38, %v2477_v4 }
 0x4a3   : > { %v1924_v57 = vmul.f32 1.442695, %v1898_v58 }
 0x4a4   : > { %vm2476_vm9 = vcmp.eq.f32.partialorder %v2475_v10, 8.507059e+37 }
 0x4a5   : > { %v2479_v56 = vsel %vm2476_vm9, %v2478_v29, %v2474_v15  ;;  %v1111_v29 = vld [vmem:[#allocation4 + $0x58] sm:$0xff] }
 0x4ae   : > { %1160 = vadd.xlane.f32.xlu2 %v4819_v32 }
 0x4b4   : > { %2679 = vperm.xlu0 %3496, %v2434_v27   ;;  %v1131_v27 = vmul.f32 %v4773_v5, %v1115_v63  ;;  %v1110_v63 = vld [vmem:[#allocation4 + $0x50] sm:$0xff] }
 0x4b6   : > { %1969 = vadd.xlane.f32.xlu2 %v4809_v12  ;;  %v1773_v12 = vsub.f32 %v4766_v48, %v4770_v46  ;;  %v1938_v48 = vld [vmem:[#allocation4 + $0x88] sm:$0xff] }
 0x4b7   : > { %v1856_v36 = vpop.permute.xlu1 %1855 }
 0x4b8   : > { %v1897_v32 = vsub.f32 %v5548_v39, %v1856_v36  ;;  %v1802_v28 = vmul.f32 1.442695, %v1773_v12  ;;  %v1772_v36 = vsub.f32 %v4790_v31, %v4795_v53  ;;  %v5005_v31 = vpop.permute.xlu2 %2246 }
 0x4ba   : > { %v1922_v62 = vmul.f32 1.442695, %v1897_v32  ;;  %1158 = vadd.xlane.f32.xlu1 %v4777_v11  ;;  %v5550_v11 = vld [vmem:[#allocation25_spill] sm:$0xff]  ;;  %v1800_v15 = vmul.f32 1.442695, %v1772_v36 }
 0x4bb   : > { %v1899_v37 = vsub.f32 %v5550_v11, %v4956_v7  ;;  %v1954_v7 = vmul.f32 %v4784_v23, %v1938_v48  ;;  %v2411_v23 = vld [vmem:[#allocation4 + $0x30] sm:$0xff]  ;;  %v5552_v11 = vld [vmem:[#allocation24_spill] sm:$0xff] }
 0x4bc   : > { %3609 = vpow2.f32 %v1922_v62  ;;  %2694 = vperm.xlu0 %3496, %v2479_v56   ;;  %v5551_v62 = vld [vmem:[#allocation27_spill] sm:$0xff]  ;;  %v2407_v48 = vld [vmem:[#allocation4 + $0x10] sm:$0xff]  ;;  %vm2516_vm11 = vweird.f32 %v2411_v23 }
 0x4bd   : > { %3611 = vpow2.f32 %v1924_v57  ;;  %v1926_v10 = vmul.f32 1.442695, %v1899_v37  ;;  %v1127_v56 = vmul.f32 %v5551_v62, %v1111_v29  ;;  %v1126_v37 = vmul.f32 %v5552_v11, %v1110_v63 }
 0x4be   : > { %3613 = vpow2.f32 %v1802_v28  ;;  %vm2456_vm15 = vweird.f32 %v2407_v48 }
 0x4bf   : > { %3615 = vpow2.f32 %v1926_v10  ;;  %v5011_v12 = vpop.permute.xlu1 %2241 }
 0x4c0   : > { %3617 = vpow2.f32 %v1800_v15 }
 0x4c1   : > { %3619 = vrcp.f32 %v2411_v23 }
 0x4c2   : > { %v4984_v9 = vpop.eup %3609  ;;  %3621 = vrcp.f32 %v2407_v48 }
 0x4c3   : > { %2156 = vmatmul.f32.gmra.mxu3 %v4984_v9  ;;  %v4991_v46 = vpop.eup %3611 }
 0x4c4   : > { %v4997_v39 = vpop.eup %3613 }
 0x4c5   : > { %v1163_v61 = vpop.xlane.xlu0 %1162  ;;  %v5001_v47 = vpop.eup %3615 }
 0x4c6   : > { %v1179_v4 = vadd.f32 %v1163_v61, %v1131_v27  ;;  %v5007_v53 = vpop.eup %3617 }
 0x4c7   : > { %v3620_v57 = vpop.eup %3619 }
 0x4c8   : > { %1196 = vst.msk [vmem:[#allocation4 + $0x78] sm:$0xff] %vm569_vm1, %v1179_v4  ;;  %v2512_v28 = vmul.f32 %v3620_v57, %v2411_v23  ;;  %vm2517_vm10 = vweird.f32 %v3620_v57  ;;  %v3622_v15 = vpop.eup %3621 }
 0x4c9   : > { %vm2518_vm12 = vmor %vm2516_vm11, %vm2517_vm10  ;;  %v2452_v62 = vmul.f32 %v3622_v15, %v2407_v48  ;;  %vm2457_vm14 = vweird.f32 %v3622_v15 }
 0x4ca   : > { %v2513_v61 = vsub.f32 1.0, %v2512_v28  ;;  %vm2458_vm2 = vmor %vm2456_vm15, %vm2457_vm14 }
 0x4cb   : > { %2159 = vmatmul.f32.gmra.mxu3 %v4991_v46 }
 0x4cc   : > { %v2514_v10 = vmul.f32 %v3620_v57, %v2513_v61  ;;  %v2460_v61 = vand.u32 2147483647, %v2407_v48 }
 0x4cd   : > { %v1972_v5 = vpop.xlane.xlu0 %1971 }
 0x4ce   : > { %v2002_v32 = vadd.f32 %v1972_v5, %v1954_v7  ;;  %2261 = vperm.xlu2 %3495, %v4997_v39   ;;  %v2515_v36 = vadd.f32 %v3620_v57, %v2514_v10  ;;  %v2522_v7 = vand.u32 2147483648, %v2411_v23  ;;  %v2520_v5 = vand.u32 2147483647, %v2411_v23  ;;  %v2406_v23 = vld [vmem:[#allocation4 + $0x8] sm:$0xff] }
 0x4cf   : > { %vm2461_vm3 = vcmp.eq.f32.partialorder %v2460_v61, 8.507059e+37  ;;  %vm2441_vm5 = vweird.f32 %v2406_v23 }
 0x4d0   : > { %2018 = vst.msk [vmem:[#allocation4 + $0x88] sm:$0xff] %vm569_vm1, %v2002_v32  ;;  %v2519_v32 = vsel %vm2518_vm12, %v3620_v57, %v2515_v36  ;;  %vm2521_vm13 = vcmp.eq.f32.partialorder %v2520_v5, 8.507059e+37 }
 0x4d3   : > { %1885 = vperm.xlu1 %3494, %v4850_v30   ;;  %2162 = vmatmul.f32.gmra.mxu3 %v5001_v47 }
 0x4db   : > { %2256 = vperm.xlu1 %3494, %v5007_v53  }
 0x4e0   : > { %v1155_v6 = vpop.xlane.xlu2 %1154 }
 0x4e1   : > { %v1175_v58 = vadd.f32 %v1155_v6, %v1127_v56  ;;  %v2453_v56 = vsub.f32 1.0, %v2452_v62  ;;  %v5018_v6 = vpop.permute.xlu0 %2251 }
 0x4e3   : > { %1192 = vst.msk [vmem:[#allocation4 + $0x58] sm:$0xff] %vm569_vm1, %v1175_v58  ;;  %v2454_v28 = vmul.f32 %v3622_v15, %v2453_v56 }
 0x4e5   : > { %v2455_v57 = vadd.f32 %v3622_v15, %v2454_v28 }
 0x4e6   : > { %1983 = vadd.xlane.f32.xlu0 %v4954_v2  ;;  %v2523_v2 = vor.u32 1.1754944e-38, %v2522_v7 }
 0x4e8   : > { %v2524_v29 = vsel %vm2521_vm13, %v2523_v2, %v2519_v32  ;;  %v1876_v11 = vpop.permute.xlu2 %1875  ;;  %v5554_v32 = vld [vmem:[#allocation35_spill] sm:$0xff]  ;;  %v1941_v2 = vld [vmem:[#allocation4 + $0xa0] sm:$0xff] }
 0x4e9   : > { %v5023_v10 = vpop.permute.xlu0 %2266 }
 0x4ea   : > { %v1153_v27 = vpop.xlane.xlu1 %1152  ;;  %5553 = vst [vmem:[#allocation8_spill] sm:$0xff] %v5023_v10 }
 0x4eb   : > { %v1174_v4 = vadd.f32 %v1153_v27, %v1126_v37  ;;  %v2462_v27 = vand.u32 2147483648, %v2407_v48  ;;  %v1902_v48 = vsub.f32 %v5554_v32, %v4980_v44 }
 0x4ed   : > { %1191 = vst.msk [vmem:[#allocation4 + $0x50] sm:$0xff] %vm569_vm1, %v1174_v4  ;;  %v2463_v36 = vor.u32 1.1754944e-38, %v2462_v27  ;;  %v1932_v56 = vmul.f32 1.442695, %v1902_v48  ;;  %v5555_v27 = vld [vmem:[#allocation36_spill] sm:$0xff] }
 0x4f7   : > { %1975 = vadd.xlane.f32.xlu2 %v4900_v19  ;;  %v1901_v19 = vsub.f32 %v4664_v50, %v1876_v11 }
 0x4f9   : > { %v1930_v4 = vmul.f32 1.442695, %v1901_v19 }
 0x4fa   : > { %2709 = vperm.xlu0 %3496, %v2524_v29  }
 0x502   : > { %v1871_v58 = vpop.permute.xlu1 %1870 }
 0x503   : > { %v1900_v63 = vsub.f32 %v4654_v8, %v1871_v58  ;;  %v2459_v8 = vsel %vm2458_vm2, %v3622_v15, %v2455_v57  ;;  %v1957_v15 = vmul.f32 %v4837_v33, %v1941_v2  ;;  %v1114_v33 = vld [vmem:[#allocation4 + $0x70] sm:$0xff]  ;;  %v2447_v57 = vand.u32 2147483648, %v2406_v23 }
 0x504   : > { %v2464_v50 = vsel %vm2461_vm3, %v2463_v36, %v2459_v8  ;;  %v1130_v61 = vmul.f32 %v5555_v27, %v1114_v33 }
 0x505   : > { %v1928_v37 = vmul.f32 1.442695, %v1900_v63  ;;  %1973 = vadd.xlane.f32.xlu1 %v4895_v25  ;;  %v1775_v25 = vsub.f32 %v4846_v13, %v4850_v30  ;;  %v2414_v30 = vld [vmem:[#allocation4 + $0x48] sm:$0xff]  ;;  %v2448_v32 = vor.u32 1.1754944e-38, %v2447_v57 }
 0x506   : > { %v2567_v57 = vand.u32 2147483648, %v2414_v30  ;;  %vm2561_vm9 = vweird.f32 %v2414_v30  ;;  %v2565_v27 = vand.u32 2147483647, %v2414_v30 }
 0x507   : > { %3623 = vpow2.f32 %v1928_v37  ;;  %v1806_v29 = vmul.f32 1.442695, %v1775_v25 }
 0x508   : > { %3625 = vrcp.f32 %v2406_v23  ;;  %vm2566_vm11 = vcmp.eq.f32.partialorder %v2565_v27, 8.507059e+37 }
 0x509   : > { %3627 = vpow2.f32 %v1930_v4  ;;  %v2445_v4 = vand.u32 2147483647, %v2406_v23 }
 0x50a   : > { %3629 = vpow2.f32 %v1806_v29  ;;  %v1937_v29 = vld [vmem:[#allocation4 + $0x80] sm:$0xff] }
 0x50b   : > { %3631 = vpow2.f32 %v1932_v56  ;;  %vm2446_vm7 = vcmp.eq.f32.partialorder %v2445_v4, 8.507059e+37 }
 0x50c   : > { %3633 = vrcp.f32 %v2414_v30 }
 0x50d   : > { %v5025_v7 = vpop.eup %3623 }
 0x50e   : > { %2165 = vmatmul.f32.gmra.mxu3 %v5025_v7  ;;  %v3626_v5 = vpop.eup %3625 }
 0x50f   : > { %2689 = vperm.xlu2 %3495, %v2464_v50   ;;  %v2437_v62 = vmul.f32 %v3626_v5, %v2406_v23  ;;  %v5033_v28 = vpop.eup %3627  ;;  %vm2442_vm4 = vweird.f32 %v3626_v5  ;;  %v1113_v23 = vld [vmem:[#allocation4 + $0x68] sm:$0xff] }
 0x510   : > { %v5037_v11 = vpop.eup %3629  ;;  %vm2443_vm6 = vmor %vm2441_vm5, %vm2442_vm4 }
 0x511   : > { %v2438_v13 = vsub.f32 1.0, %v2437_v62  ;;  %v5039_v37 = vpop.eup %3631 }
 0x512   : > { %v3634_v8 = vpop.eup %3633 }
 0x513   : > { %v1978_v58 = vpop.xlane.xlu0 %1977  ;;  %v2439_v44 = vmul.f32 %v3626_v5, %v2438_v13  ;;  %v2557_v48 = vmul.f32 %v3634_v8, %v2414_v30  ;;  %vm2562_vm8 = vweird.f32 %v3634_v8 }
 0x514   : > { %v2005_v63 = vadd.f32 %v1978_v58, %v1957_v15  ;;  %v1953_v15 = vmul.f32 %v4787_v22, %v1937_v29  ;;  %vm2563_vm10 = vmor %vm2561_vm9, %vm2562_vm8 }
 0x515   : > { %v2440_v19 = vadd.f32 %v3626_v5, %v2439_v44  ;;  %v2558_v62 = vsub.f32 1.0, %v2557_v48 }
 0x516   : > { %2021 = vst.msk [vmem:[#allocation4 + $0xa0] sm:$0xff] %vm569_vm1, %v2005_v63  ;;  %2168 = vmatmul.f32.gmra.mxu3 %v5033_v28  ;;  %v5556_v63 = vld [vmem:[#allocation34_spill] sm:$0xff] }
 0x517   : > { %v2444_v50 = vsel %vm2443_vm6, %v3626_v5, %v2440_v19  ;;  %v1129_v5 = vmul.f32 %v5556_v63, %v1113_v23  ;;  %v2559_v13 = vmul.f32 %v3634_v8, %v2558_v62  ;;  %v2410_v19 = vld [vmem:[#allocation4 + $0x28] sm:$0xff] }
 0x518   : > { %v2449_v2 = vsel %vm2446_vm7, %v2448_v32, %v2444_v50  ;;  %3635 = vrcp.f32 %v2410_v19  ;;  %v2507_v62 = vand.u32 2147483648, %v2410_v19  ;;  %vm2501_vm13 = vweird.f32 %v2410_v19 }
 0x51a   : > { %v2508_v23 = vor.u32 1.1754944e-38, %v2507_v62 }
 0x51e   : > { %2271 = vperm.xlu1 %3494, %v5037_v11   ;;  %2171 = vmatmul.f32.gmra.mxu3 %v5039_v37 }
 0x521   : > { %v1161_v36 = vpop.xlane.xlu2 %1160 }
 0x522   : > { %v1178_v25 = vadd.f32 %v1161_v36, %v1130_v61  ;;  %v2568_v61 = vor.u32 1.1754944e-38, %v2567_v57  ;;  %v3636_v36 = vpop.eup %3635 }
 0x523   : > { %vm2502_vm12 = vweird.f32 %v3636_v36 }
 0x524   : > { %1195 = vst.msk [vmem:[#allocation4 + $0x70] sm:$0xff] %vm569_vm1, %v1178_v25  ;;  %1989 = vadd.xlane.f32.xlu0 %v4991_v46  ;;  %v2560_v46 = vadd.f32 %v3634_v8, %v2559_v13  ;;  %v2497_v25 = vmul.f32 %v3636_v36, %v2410_v19  ;;  %vm2503_vm14 = vmor %vm2501_vm13, %vm2502_vm12  ;;  %v1944_v13 = vld [vmem:[#allocation4 + $0xb8] sm:$0xff] }
 0x526   : > { %2684 = vperm.xlu1 %3494, %v2449_v2   ;;  %v2564_v22 = vsel %vm2563_vm10, %v3634_v8, %v2560_v46  ;;  %v2498_v50 = vsub.f32 1.0, %v2497_v25  ;;  %v5052_v29 = vpop.permute.xlu0 %2679  ;;  %v2409_v8 = vld [vmem:[#allocation4 + $0x20] sm:$0xff]  ;;  %v1960_v46 = vmul.f32 %v4871_v26, %v1944_v13 }
 0x527   : > { %v2569_v4 = vsel %vm2566_vm11, %v2568_v61, %v2564_v22  ;;  %vm2486_vm3 = vweird.f32 %v2409_v8 }
 0x528   : > { %v2499_v32 = vmul.f32 %v3636_v36, %v2498_v50  ;;  %v2490_v50 = vand.u32 2147483647, %v2409_v8 }
 0x529   : > { %v1970_v56 = vpop.xlane.xlu2 %1969 }
 0x52a   : > { %v2001_v58 = vadd.f32 %v1970_v56, %v1953_v15  ;;  %v2500_v30 = vadd.f32 %v3636_v36, %v2499_v32  ;;  %v2505_v56 = vand.u32 2147483647, %v2410_v19  ;;  %vm2491_vm5 = vcmp.eq.f32.partialorder %v2490_v50, 8.507059e+37 }
 0x52c   : > { %2017 = vst.msk [vmem:[#allocation4 + $0x80] sm:$0xff] %vm569_vm1, %v2001_v58  ;;  %vm2506_vm15 = vcmp.eq.f32.partialorder %v2505_v56, 8.507059e+37 }
 0x52d   : > { %v1159_v44 = vpop.xlane.xlu1 %1158 }
 0x52e   : > { %v1177_v33 = vadd.f32 %v1159_v44, %v1129_v5 }
 0x530   : > { %1194 = vst.msk [vmem:[#allocation4 + $0x68] sm:$0xff] %vm569_vm1, %v1177_v33  ;;  %v2417_v33 = vld [vmem:[#allocation4 + $0x60] sm:$0xff] }
 0x531   : > { %vm2606_vm7 = vweird.f32 %v2417_v33  ;;  %v2610_v13 = vand.u32 2147483647, %v2417_v33 }
 0x533   : > { %vm2611_vm9 = vcmp.eq.f32.partialorder %v2610_v13, 8.507059e+37 }
 0x538   : > { %1981 = vadd.xlane.f32.xlu2 %v4949_v40  ;;  %2724 = vperm.xlu0 %3496, %v2569_v4   ;;  %v2504_v40 = vsel %vm2503_vm14, %v3636_v36, %v2500_v30  ;;  %v2492_v36 = vand.u32 2147483648, %v2409_v8 }
 0x539   : > { %v2509_v58 = vsel %vm2506_vm15, %v2508_v23, %v2504_v40 }
 0x53a   : > { %v2493_v32 = vor.u32 1.1754944e-38, %v2492_v36 }
 0x545   : > { %v1886_v48 = vpop.permute.xlu1 %1885 }
 0x546   : > { %v1903_v2 = vsub.f32 %v4743_v51, %v1886_v48  ;;  %v5057_v51 = vpop.permute.xlu0 %2694  ;;  %v1940_v48 = vld [vmem:[#allocation4 + $0x98] sm:$0xff] }
 0x547   : > { %v1956_v62 = vmul.f32 %v4842_v52, %v1940_v48  ;;  %v1939_v52 = vld [vmem:[#allocation4 + $0x90] sm:$0xff] }
 0x548   : > { %v1934_v15 = vmul.f32 1.442695, %v1903_v2  ;;  %v1955_v36 = vmul.f32 %v4753_v34, %v1939_v52  ;;  %v2412_v52 = vld [vmem:[#allocation4 + $0x38] sm:$0xff] }
 0x54a   : > { %3637 = vpow2.f32 %v1934_v15  ;;  %v2420_v15 = vld [vmem:[#allocation4 + $0x78] sm:$0xff] }
 0x54b   : > { %3639 = vrcp.f32 %v2409_v8  ;;  %vm2651_vm11 = vweird.f32 %v2420_v15 }
 0x54c   : > { %3641 = vrcp.f32 %v2417_v33 }
 0x54d   : > { %3643 = vrcp.f32 %v2420_v15 }
 0x550   : > { %v5054_v63 = vpop.eup %3637  ;;  %2704 = vperm.xlu2 %3495, %v2509_v58   ;;  %1979 = vadd.xlane.f32.xlu1 %v4916_v0  ;;  %v5062_v0 = vpop.permute.xlu2 %2261  ;;  %v2612_v58 = vand.u32 2147483648, %v2417_v33 }
 0x551   : > { %2174 = vmatmul.f32.gmra.mxu3 %v5054_v63  ;;  %v3640_v5 = vpop.eup %3639 }
 0x552   : > { %v2482_v44 = vmul.f32 %v3640_v5, %v2409_v8  ;;  %v3642_v61 = vpop.eup %3641  ;;  %vm2487_vm2 = vweird.f32 %v3640_v5 }
 0x553   : > { %v2602_v25 = vmul.f32 %v3642_v61, %v2417_v33  ;;  %vm2488_vm4 = vmor %vm2486_vm3, %vm2487_vm2  ;;  %vm2607_vm6 = vweird.f32 %v3642_v61  ;;  %v3644_v8 = vpop.eup %3643 }
 0x554   : > { %v2483_v57 = vsub.f32 1.0, %v2482_v44  ;;  %vm2608_vm8 = vmor %vm2606_vm7, %vm2607_vm6  ;;  %v2413_v44 = vld [vmem:[#allocation4 + $0x40] sm:$0xff]  ;;  %vm2652_vm10 = vweird.f32 %v3644_v8 }
 0x555   : > { %v2603_v2 = vsub.f32 1.0, %v2602_v25  ;;  %3645 = vrcp.f32 %v2413_v44  ;;  %vm2653_vm12 = vmor %vm2651_vm11, %vm2652_vm10  ;;  %vm2546_vm15 = vweird.f32 %v2413_v44 }
 0x556   : > { %v2484_v22 = vmul.f32 %v3640_v5, %v2483_v57  ;;  %v2613_v57 = vor.u32 1.1754944e-38, %v2612_v58 }
 0x557   : > { %v2604_v40 = vmul.f32 %v3642_v61, %v2603_v2  ;;  %v2657_v2 = vand.u32 2147483648, %v2420_v15 }
 0x558   : > { %v2485_v4 = vadd.f32 %v3640_v5, %v2484_v22 }
 0x559   : > { %v1984_v19 = vpop.xlane.xlu0 %1983 }
 0x55a   : > { %v2008_v27 = vadd.f32 %v1984_v19, %v1960_v46  ;;  %v2489_v26 = vsel %vm2488_vm4, %v3640_v5, %v2485_v4  ;;  %v5067_v5 = vpop.permute.xlu1 %2256  ;;  %v2647_v19 = vmul.f32 %v3644_v8, %v2420_v15 }
 0x55b   : > { %v2494_v30 = vsel %vm2491_vm5, %v2493_v32, %v2489_v26  ;;  %v3646_v33 = vpop.eup %3645 }
 0x55c   : > { %2024 = vst.msk [vmem:[#allocation4 + $0xb8] sm:$0xff] %vm569_vm1, %v2008_v27  ;;  %v5069_v27 = vpop.f32.mrf.mxu3  ;;  %v2648_v4 = vsub.f32 1.0, %v2647_v19  ;;  %v2542_v32 = vmul.f32 %v3646_v33, %v2413_v44  ;;  %vm2547_vm14 = vweird.f32 %v3646_v33 }
 0x55d   : > { %vm2548_vm2 = vmor %vm2546_vm15, %vm2547_vm14 }
 0x55e   : > { %v2649_v26 = vmul.f32 %v3644_v8, %v2648_v4 }
 0x560   : > { %v2650_v48 = vadd.f32 %v3644_v8, %v2649_v26 }
 0x562   : > { %1995 = vadd.xlane.f32.xlu0 %v5033_v28  ;;  %v2605_v28 = vadd.f32 %v3642_v61, %v2604_v40  ;;  %v2654_v34 = vsel %vm2653_vm12, %v3644_v8, %v2650_v48  ;;  %v2658_v40 = vor.u32 1.1754944e-38, %v2657_v2  ;;  %v1947_v2 = vld [vmem:[#allocation4 + $0xd0] sm:$0xff] }
 0x563   : > { %v5177_v10 = vld [vmem:[#allocation4 + $0xb8] sm:$0xff] }
 0x564   : > { %v2609_v46 = vsel %vm2608_vm8, %v3642_v61, %v2605_v28  ;;  %v2133_v61 = vpop.f32.mrf.mxu3 }
 0x565   : > { %v2614_v22 = vsel %vm2611_vm9, %v2613_v57, %v2609_v46  ;;  %v2552_v46 = vand.u32 2147483648, %v2413_v44  ;;  %v2550_v57 = vand.u32 2147483647, %v2413_v44  ;;  %vm2531_vm9 = vweird.f32 %v2412_v52 }
 0x567   : > { %v2553_v4 = vor.u32 1.1754944e-38, %v2552_v46  ;;  %vm2551_vm4 = vcmp.eq.f32.partialorder %v2550_v57, 8.507059e+37  ;;  %v1943_v57 = vld [vmem:[#allocation4 + $0xb0] sm:$0xff] }
 0x569   : > { %2699 = vperm.xlu1 %3494, %v2494_v30   ;;  %v2655_v30 = vand.u32 2147483647, %v2420_v15 }
 0x56a   : > { %v1976_v56 = vpop.xlane.xlu2 %1975 }
 0x56b   : > { %v2004_v23 = vadd.f32 %v1976_v56, %v1956_v62  ;;  %v2543_v62 = vsub.f32 1.0, %v2542_v32  ;;  %vm2656_vm13 = vcmp.eq.f32.partialorder %v2655_v30, 8.507059e+37 }
 0x56c   : > { %v5075_v28 = vpop.f32.mrf.mxu3 }
 0x56d   : > { %2020 = vst.msk [vmem:[#allocation4 + $0x98] sm:$0xff] %vm569_vm1, %v2004_v23  ;;  %v2544_v23 = vmul.f32 %v3646_v33, %v2543_v62  ;;  %v1963_v62 = vmul.f32 %v4914_v16, %v1947_v2 }
 0x56f   : > { %v2545_v13 = vadd.f32 %v3646_v33, %v2544_v23 }
 0x571   : > { %v2549_v8 = vsel %vm2548_vm2, %v3646_v33, %v2545_v13 }
 0x572   : > { %v2554_v26 = vsel %vm2551_vm4, %v2553_v4, %v2549_v8  ;;  %v1959_v8 = vmul.f32 %v4879_v43, %v1943_v57 }
 0x574   : > { %v5079_v32 = vpop.f32.mrf.mxu3 }
 0x576   : > { %2739 = vperm.xlu0 %3496, %v2614_v22  }
 0x578   : > { %v1974_v25 = vpop.xlane.xlu1 %1973 }
 0x579   : > { %v2003_v50 = vadd.f32 %v1974_v25, %v1955_v36  ;;  %1987 = vadd.xlane.f32.xlu2 %v4984_v9  ;;  %v2659_v9 = vsel %vm2656_vm13, %v2658_v40, %v2654_v34 }
 0x57b   : > { %2019 = vst.msk [vmem:[#allocation4 + $0x90] sm:$0xff] %vm569_vm1, %v2003_v50  ;;  %v5077_v50 = vpop.permute.xlu0 %2709 }
 0x57e   : > { %2308 = vrot.lane.b32.xlu0 %v2133_v61, %s3729_s12 }
 0x582   : > { %v2775_v56 = vld [vmem:[#allocation4 + $0x90] sm:$0xff] }
 0x583   : > { %3647 = vrcp.f32 %v2775_v56  ;;  %v2830_v22 = vand.u32 2147483648, %v2775_v56  ;;  %v2828_v25 = vand.u32 2147483647, %v2775_v56  ;;  %vm2824_vm5 = vweird.f32 %v2775_v56 }
 0x584   : > { %3649 = vrcp.f32 %v2412_v52 }
 0x585   : > { %v2831_v44 = vor.u32 1.1754944e-38, %v2830_v22  ;;  %vm2829_vm7 = vcmp.eq.f32.partialorder %v2828_v25, 8.507059e+37 }
 0x586   : > { %2754 = vperm.xlu0 %3496, %v2659_v9  }
 0x589   : > { %v3648_v58 = vpop.eup %3647 }
 0x58a   : > { %v2820_v19 = vmul.f32 %v3648_v58, %v2775_v56  ;;  %vm2825_vm3 = vweird.f32 %v3648_v58  ;;  %v3650_v30 = vpop.eup %3649  ;;  %v2142_v56 = vpop.f32.mrf.mxu3 }
 0x58b   : > { %vm2826_vm6 = vmor %vm2824_vm5, %vm2825_vm3  ;;  %v2527_v9 = vmul.f32 %v3650_v30, %v2412_v52  ;;  %vm2532_vm8 = vweird.f32 %v3650_v30 }
 0x58c   : > { %v2821_v15 = vsub.f32 1.0, %v2820_v19  ;;  %v2535_v19 = vand.u32 2147483647, %v2412_v52  ;;  %vm2533_vm10 = vmor %vm2531_vm9, %vm2532_vm8 }
 0x58d   : > { %v2528_v23 = vsub.f32 1.0, %v2527_v9 }
 0x58e   : > { %v2822_v36 = vmul.f32 %v3648_v58, %v2821_v15  ;;  %vm2536_vm11 = vcmp.eq.f32.partialorder %v2535_v19, 8.507059e+37 }
 0x58f   : > { %v2529_v13 = vmul.f32 %v3650_v30, %v2528_v23 }
 0x590   : > { %v2823_v61 = vadd.f32 %v3648_v58, %v2822_v36  ;;  %v5089_v25 = vpop.permute.xlu1 %2271 }
 0x591   : > { %2719 = vperm.xlu2 %3495, %v2554_v26   ;;  %v2530_v46 = vadd.f32 %v3650_v30, %v2529_v13  ;;  %v2416_v26 = vld [vmem:[#allocation4 + $0x58] sm:$0xff] }
 0x592   : > { %v2827_v48 = vsel %vm2826_vm6, %v3648_v58, %v2823_v61  ;;  %v5085_v58 = vpop.permute.xlu2 %2689  ;;  %3651 = vrcp.f32 %v2416_v26  ;;  %vm2591_vm13 = vweird.f32 %v2416_v26  ;;  %v2595_v9 = vand.u32 2147483647, %v2416_v26  ;;  %v5098_v57 = vpop.f32.mrf.mxu3 }
 0x593   : > { %1985 = vadd.xlane.f32.xlu1 %v4961_v20  ;;  %v2832_v33 = vsel %vm2829_vm7, %v2831_v44, %v2827_v48  ;;  %v2537_v20 = vand.u32 2147483648, %v2412_v52  ;;  %v2534_v16 = vsel %vm2533_vm10, %v3650_v30, %v2530_v46  ;;  %v1942_v48 = vld [vmem:[#allocation4 + $0xa8] sm:$0xff]  ;;  %v2415_v46 = vld [vmem:[#allocation4 + $0x50] sm:$0xff] }
 0x594   : > { %3041 = vperm.xlu0 %3496, %v2832_v33   ;;  %v1958_v43 = vmul.f32 %v4781_v21, %v1942_v48  ;;  %vm2596_vm15 = vcmp.eq.f32.partialorder %v2595_v9, 8.507059e+37  ;;  %vm2576_vm7 = vweird.f32 %v2415_v46 }
 0x595   : > { %v2538_v15 = vor.u32 1.1754944e-38, %v2537_v20  ;;  %v1950_v20 = vld [vmem:[#allocation4 + $0xe8] sm:$0xff] }
 0x597   : > { %v1990_v34 = vpop.xlane.xlu0 %1989  ;;  %v2539_v4 = vsel %vm2536_vm11, %v2538_v15, %v2534_v16  ;;  %v1966_v16 = vmul.f32 %v4997_v39, %v1950_v20 }
 0x598   : > { %v2011_v40 = vadd.f32 %v1990_v34, %v1963_v62  ;;  %v3652_v52 = vpop.eup %3651  ;;  %v5092_v61 = vpop.permute.xlu1 %2684 }
 0x599   : > { %v2587_v44 = vmul.f32 %v3652_v52, %v2416_v26  ;;  %vm2592_vm12 = vweird.f32 %v3652_v52 }
 0x59a   : > { %2027 = vst.msk [vmem:[#allocation4 + $0xd0] sm:$0xff] %vm569_vm1, %v2011_v40  ;;  %v2597_v40 = vand.u32 2147483648, %v2416_v26  ;;  %vm2593_vm14 = vmor %vm2591_vm13, %vm2592_vm12 }
 0x59b   : > { %v2588_v33 = vsub.f32 1.0, %v2587_v44 }
 0x59c   : > { %2314 = vrot.lane.b32.xlu0 %v2142_v56, %s3729_s12  ;;  %v2598_v13 = vor.u32 1.1754944e-38, %v2597_v40 }
 0x59d   : > { %v2589_v62 = vmul.f32 %v3652_v52, %v2588_v33  ;;  %v5103_v33 = vpop.f32.mrf.mxu3 }
 0x59f   : > { %v2590_v34 = vadd.f32 %v3652_v52, %v2589_v62 }
 0x5a1   : > { %v2594_v23 = vsel %vm2593_vm14, %v3652_v52, %v2590_v34 }
 0x5a2   : > { %v2599_v21 = vsel %vm2596_vm15, %v2598_v13, %v2594_v23  ;;  %v2582_v13 = vand.u32 2147483648, %v2415_v46 }
 0x5a5   : > { %v2151_v40 = vpop.f32.mrf.mxu3 }
 0x5aa   : > { %v5096_v56 = vpop.permute.xlu0 %2724 }
 0x5ab   : > { %v1982_v22 = vpop.xlane.xlu2 %1981 }
 0x5ac   : > { %v2007_v36 = vadd.f32 %v1982_v22, %v1959_v8  ;;  %2714 = vperm.xlu1 %3494, %v2539_v4  }
 0x5ae   : > { %2023 = vst.msk [vmem:[#allocation4 + $0xb0] sm:$0xff] %vm569_vm1, %v2007_v36 }
 0x5b3   : > { %v5105_v34 = vpop.permute.xlu2 %2704 }
 0x5ba   : > { %1993 = vadd.xlane.f32.xlu2 %v5025_v7 }
 0x5c3   : > { %v1980_v2 = vpop.xlane.xlu1 %1979 }
 0x5c4   : > { %v2006_v30 = vadd.f32 %v1980_v2, %v1958_v43 }
 0x5c6   : > { %2022 = vst.msk [vmem:[#allocation4 + $0xa8] sm:$0xff] %vm569_vm1, %v2006_v30 }
 0x5cd   : > { %v2778_v7 = vld [vmem:[#allocation4 + $0xa8] sm:$0xff] }
 0x5ce   : > { %3653 = vrcp.f32 %v2778_v7  ;;  %v2875_v26 = vand.u32 2147483648, %v2778_v7  ;;  %v2873_v44 = vand.u32 2147483647, %v2778_v7  ;;  %vm2869_vm3 = vweird.f32 %v2778_v7 }
 0x5cf   : > { %3655 = vrcp.f32 %v2415_v46 }
 0x5d0   : > { %v2876_v39 = vor.u32 1.1754944e-38, %v2875_v26  ;;  %vm2874_vm5 = vcmp.eq.f32.partialorder %v2873_v44, 8.507059e+37 }
 0x5d2   : > { %2734 = vperm.xlu2 %3495, %v2599_v21   ;;  %v2580_v21 = vand.u32 2147483647, %v2415_v46 }
 0x5d4   : > { %v3654_v19 = vpop.eup %3653  ;;  %vm2581_vm9 = vcmp.eq.f32.partialorder %v2580_v21, 8.507059e+37 }
 0x5d5   : > { %v1996_v15 = vpop.xlane.xlu0 %1995  ;;  %v2865_v8 = vmul.f32 %v3654_v19, %v2778_v7  ;;  %v3656_v36 = vpop.eup %3655  ;;  %vm2870_vm2 = vweird.f32 %v3654_v19  ;;  %v1946_v7 = vld [vmem:[#allocation4 + $0xc8] sm:$0xff] }
 0x5d6   : > { %v2014_v22 = vadd.f32 %v1996_v15, %v1966_v16  ;;  %1991 = vadd.xlane.f32.xlu1 %v5001_v47  ;;  %v2572_v43 = vmul.f32 %v3656_v36, %v2415_v46  ;;  %vm2871_vm4 = vmor %vm2869_vm3, %vm2870_vm2  ;;  %vm2577_vm6 = vweird.f32 %v3656_v36  ;;  %v1962_v20 = vmul.f32 %v4924_v35, %v1946_v7 }
 0x5d7   : > { %v2866_v4 = vsub.f32 1.0, %v2865_v8  ;;  %vm2578_vm8 = vmor %vm2576_vm7, %vm2577_vm6  ;;  %v2583_v15 = vor.u32 1.1754944e-38, %v2582_v13 }
 0x5d8   : > { %2030 = vst.msk [vmem:[#allocation4 + $0xe8] sm:$0xff] %vm569_vm1, %v2014_v22  ;;  %v2573_v47 = vsub.f32 1.0, %v2572_v43 }
 0x5d9   : > { %v2867_v52 = vmul.f32 %v3654_v19, %v2866_v4  ;;  %v5557_v4 = vld [vmem:[#allocation13_spill] sm:$0xff] }
 0x5da   : > { %v2574_v62 = vmul.f32 %v3656_v36, %v2573_v47  ;;  %v1375_v26 = vmul.f32 0.0, %v5557_v4  ;;  %v5125_v47 = vld [vmem:[#allocation4 + $0x88] sm:$0xff] }
 0x5db   : > { %v2868_v48 = vadd.f32 %v3654_v19, %v2867_v52  ;;  %v2275_v52 = vmul.f32 0.0, %v4877_v42  ;;  %v1945_v42 = vld [vmem:[#allocation4 + $0xc0] sm:$0xff]  ;;  %vm2809_vm2 = vweird.f32 %v5125_v47 }
 0x5dc   : > { %v2575_v9 = vadd.f32 %v3656_v36, %v2574_v62 }
 0x5dd   : > { %v2872_v2 = vsel %vm2871_vm4, %v3654_v19, %v2868_v48  ;;  %v5558_v48 = vld [vmem:[#allocation29_spill] sm:$0xff] }
 0x5de   : > { %v2877_v30 = vsel %vm2874_vm5, %v2876_v39, %v2872_v2  ;;  %v2579_v19 = vsel %vm2578_vm8, %v3656_v36, %v2575_v9  ;;  %v1391_v43 = vadd.f32 %v1375_v26, %v5558_v48  ;;  %v2419_v36 = vld [vmem:[#allocation4 + $0x70] sm:$0xff]  ;;  %v2700_v2 = vpop.permute.xlu1 %2699  ;;  %v1961_v9 = vmul.f32 %v4831_v1, %v1945_v42  ;;  %v5140_v48 = vld [vmem:[#allocation4 + $0x68] sm:$0xff]  ;;  %v5147_v42 = vld [vmem:[#allocation4 + $0xa0] sm:$0xff] }
 0x5df   : > { %3056 = vperm.xlu0 %3496, %v2877_v30   ;;  %v2584_v22 = vsel %vm2581_vm9, %v2583_v15, %v2579_v19  ;;  %3657 = vrcp.f32 %v2419_v36  ;;  %v5560_v15 = vld [vmem:[#allocation26_spill] sm:$0xff]  ;;  %vm2636_vm11 = vweird.f32 %v2419_v36 }
 0x5e0   : > { %3659 = vrcp.f32 %v5125_v47 }
 0x5e5   : > { %v3658_v62 = vpop.eup %3657 }
 0x5e6   : > { %vm2637_vm10 = vweird.f32 %v3658_v62 }
 0x5e7   : > { %2320 = vrot.lane.b32.xlu0 %v2151_v40, %s3729_s12  ;;  %v5127_v40 = vpop.f32.mrf.mxu1  ;;  %vm2638_vm12 = vmor %vm2636_vm11, %vm2637_vm10  ;;  %vm2621_vm10 = vweird.f32 %v5140_v48 }
 0x5e8   : > { %v5108_v23 = vpop.permute.xlu0 %2739 }
 0x5ec   : > { %v1988_v16 = vpop.xlane.xlu2 %1987 }
 0x5ed   : > { %v2010_v8 = vadd.f32 %v1988_v16, %v1962_v20  ;;  %v5134_v20 = vpop.eup %3659  ;;  %v2278_v16 = vmul.f32 0.0, %v4921_v41 }
 0x5ee   : > { %v2805_v26 = vmul.f32 %v5134_v20, %v5125_v47  ;;  %vm2810_vm14 = vweird.f32 %v5134_v20 }
 0x5ef   : > { %2026 = vst.msk [vmem:[#allocation4 + $0xc8] sm:$0xff] %vm569_vm1, %v2010_v8  ;;  %2729 = vperm.xlu1 %3494, %v2584_v22   ;;  %v1242_v19 = vpop.f32.mrf.mxu1  ;;  %v1378_v8 = vmul.f32 0.0, %v5560_v15  ;;  %vm2811_vm4 = vmor %vm2809_vm2, %vm2810_vm14 }
 0x5f0   : > { %v2309_v44 = vpop.permute.xlu0 %2308 }
 0x5f1   : > { %v2355_v46 = vadd.f32 %v2309_v44, %v2275_v52  ;;  %v1394_v52 = vadd.f32 %v1378_v8, %v1242_v19 }
 0x5f3   : > { %v5116_v39 = vsel %vm698_vm0, %v1391_v43, %v2355_v46  ;;  %v2806_v46 = vsub.f32 1.0, %v2805_v26 }
 0x5f4   : > { %v5120_v35 = vmul.f32 %v5092_v61, %v5116_v39  ;;  %v5179_v45 = vpop.permute.xlu2 %2719 }
 0x5f5   : > { %v2807_v19 = vmul.f32 %v5134_v20, %v2806_v46 }
 0x5f8   : > { %v5123_v30 = vpop.permute.xlu0 %2754 }
 0x5f9   : > { %5559 = vst [vmem:[#allocation9_spill] sm:$0xff] %v5123_v30 }
 0x5fb   : > { %1999 = vadd.xlane.f32.xlu2 %v5054_v63  ;;  %v2632_v63 = vmul.f32 %v3658_v62, %v2419_v36 }
 0x5fd   : > { %v2633_v21 = vsub.f32 1.0, %v2632_v63 }
 0x5ff   : > { %v2634_v1 = vmul.f32 %v3658_v62, %v2633_v21  ;;  %v5154_v21 = vpop.f32.mrf.mxu3 }
 0x601   : > { %v2635_v41 = vadd.f32 %v3658_v62, %v2634_v1  ;;  %v2808_v1 = vadd.f32 %v5134_v20, %v2807_v19 }
 0x603   : > { %v2812_v19 = vsel %vm2811_vm4, %v5134_v20, %v2808_v1 }
 0x606   : > { %v1986_v7 = vpop.xlane.xlu1 %1985  ;;  %v5130_v13 = vpop.permute.xlu0 %3041 }
 0x607   : > { %v2009_v61 = vadd.f32 %v1986_v7, %v1961_v9  ;;  %v2642_v7 = vand.u32 2147483648, %v2419_v36 }
 0x609   : > { %2025 = vst.msk [vmem:[#allocation4 + $0xc0] sm:$0xff] %vm569_vm1, %v2009_v61  ;;  %v2640_v61 = vand.u32 2147483647, %v2419_v36 }
 0x60b   : > { %vm2641_vm13 = vcmp.eq.f32.partialorder %v2640_v61, 8.507059e+37  ;;  %v5172_v61 = vpop.f32.mrf.mxu3 }
 0x60e   : > { %v2315_v22 = vpop.permute.xlu0 %2314 }
 0x60f   : > { %v2358_v4 = vadd.f32 %v2315_v22, %v2278_v16  ;;  %v2643_v16 = vor.u32 1.1754944e-38, %v2642_v7  ;;  %v5158_v22 = vld [vmem:[#allocation4 + $0x80] sm:$0xff] }
 0x610   : > { %v2781_v44 = vld [vmem:[#allocation4 + $0xc0] sm:$0xff] }
 0x611   : > { %3661 = vrcp.f32 %v2781_v44  ;;  %v5143_v43 = vsel %vm698_vm0, %v1394_v52, %v2358_v4  ;;  %v2920_v4 = vand.u32 2147483648, %v2781_v44  ;;  %v2918_v52 = vand.u32 2147483647, %v2781_v44 }
 0x612   : > { %v5150_v9 = vmul.f32 %v2700_v2, %v5143_v43  ;;  %3663 = vrcp.f32 %v5140_v48  ;;  %vm2914_vm3 = vweird.f32 %v2781_v44 }
 0x613   : > { %2306 = vrot.lane.b32.xlu2 %v5069_v27, %s3729_s12  ;;  %3665 = vrcp.f32 %v5147_v42  ;;  %v2639_v27 = vsel %vm2638_vm12, %v3658_v62, %v2635_v41  ;;  %v2813_v41 = vand.u32 2147483647, %v5125_v47  ;;  %vm2919_vm6 = vcmp.eq.f32.partialorder %v2918_v52, 8.507059e+37  ;;  %v2160_v1 = vpop.f32.mrf.mxu3  ;;  %v1949_v52 = vld [vmem:[#allocation4 + $0xe0] sm:$0xff] }
 0x614   : > { %v2644_v2 = vsel %vm2641_vm13, %v2643_v16, %v2639_v27  ;;  %3667 = vrcp.f32 %v5158_v22  ;;  %v2921_v27 = vor.u32 1.1754944e-38, %v2920_v4  ;;  %vm2854_vm12 = vweird.f32 %v5147_v42 }
 0x615   : > { %vm2814_vm7 = vcmp.eq.f32.partialorder %v2813_v41, 8.507059e+37  ;;  %3669 = vrcp.f32 %v5177_v10 }
 0x617   : > { %v3662_v63 = vpop.eup %3661 }
 0x618   : > { %v2910_v15 = vmul.f32 %v3662_v63, %v2781_v44  ;;  %v5160_v36 = vpop.eup %3663  ;;  %vm2915_vm15 = vweird.f32 %v3662_v63 }
 0x619   : > { %1997 = vadd.xlane.f32.xlu1 %v5039_v37  ;;  %v5164_v62 = vpop.eup %3665  ;;  %v2815_v37 = vand.u32 2147483648, %v5125_v47  ;;  %v2617_v7 = vmul.f32 %v5160_v36, %v5140_v48  ;;  %vm2916_vm5 = vmor %vm2914_vm3, %vm2915_vm15  ;;  %vm2622_vm8 = vweird.f32 %v5160_v36  ;;  %vm2794_vm3 = vweird.f32 %v5158_v22 }
 0x61a   : > { %v2911_v8 = vsub.f32 1.0, %v2910_v15  ;;  %v2850_v16 = vmul.f32 %v5164_v62, %v5147_v42  ;;  %vm2855_vm9 = vweird.f32 %v5164_v62  ;;  %vm2623_vm11 = vmor %vm2621_vm10, %vm2622_vm8 }
 0x61b   : > { %2749 = vperm.xlu2 %3495, %v2644_v2   ;;  %v2816_v47 = vor.u32 1.1754944e-38, %v2815_v37  ;;  %vm2856_vm13 = vmor %vm2854_vm12, %vm2855_vm9 }
 0x61c   : > { %v2912_v26 = vmul.f32 %v3662_v63, %v2911_v8  ;;  %v2618_v8 = vsub.f32 1.0, %v2617_v7  ;;  %v2851_v30 = vsub.f32 1.0, %v2850_v16  ;;  %v2627_v7 = vand.u32 2147483648, %v5140_v48 }
 0x61d   : > { %v2817_v44 = vsel %vm2814_vm7, %v2816_v47, %v2812_v19  ;;  %v1965_v19 = vmul.f32 %v5007_v53, %v1949_v52  ;;  %v2625_v16 = vand.u32 2147483647, %v5140_v48  ;;  %vm2899_vm7 = vweird.f32 %v5177_v10 }
 0x61e   : > { %v2913_v46 = vadd.f32 %v3662_v63, %v2912_v26  ;;  %v3668_v26 = vpop.eup %3667  ;;  %v2619_v20 = vmul.f32 %v5160_v36, %v2618_v8  ;;  %v2628_v53 = vor.u32 1.1754944e-38, %v2627_v7 }
 0x61f   : > { %v2790_v4 = vmul.f32 %v3668_v26, %v5158_v22  ;;  %vm2626_vm14 = vcmp.eq.f32.partialorder %v2625_v16, 8.507059e+37  ;;  %vm2795_vm2 = vweird.f32 %v3668_v26 }
 0x620   : > { %v2917_v15 = vsel %vm2916_vm5, %v3662_v63, %v2913_v46  ;;  %v2852_v63 = vmul.f32 %v5164_v62, %v2851_v30  ;;  %v2620_v37 = vadd.f32 %v5160_v36, %v2619_v20  ;;  %v5188_v46 = vld [vmem:[#allocation4 + $0x98] sm:$0xff]  ;;  %v5195_v30 = vpop.eup %3669  ;;  %vm2796_vm4 = vmor %vm2794_vm3, %vm2795_vm2 }
 0x621   : > { %v2922_v2 = vsel %vm2919_vm6, %v2921_v27, %v2917_v15  ;;  %v2791_v41 = vsub.f32 1.0, %v2790_v4  ;;  %v2860_v15 = vand.u32 2147483648, %v5147_v42  ;;  %3671 = vrcp.f32 %v5188_v46 }
 0x622   : > { %3071 = vperm.xlu0 %3496, %v2922_v2   ;;  %v2853_v27 = vadd.f32 %v5164_v62, %v2852_v63  ;;  %v2895_v48 = vmul.f32 %v5195_v30, %v5177_v10  ;;  %vm2900_vm6 = vweird.f32 %v5195_v30 }
 0x623   : > { %3036 = vperm.xlu2 %3495, %v2817_v44   ;;  %v2624_v44 = vsel %vm2623_vm11, %v5160_v36, %v2620_v37  ;;  %v2792_v8 = vmul.f32 %v3668_v26, %v2791_v41  ;;  %v2861_v4 = vor.u32 1.1754944e-38, %v2860_v15  ;;  %v2800_v36 = vand.u32 2147483648, %v5158_v22  ;;  %v5210_v41 = vld [vmem:[#allocation4 + $0xd0] sm:$0xff]  ;;  %vm2901_vm8 = vmor %vm2899_vm7, %vm2900_vm6 }
 0x624   : > { %v2857_v20 = vsel %vm2856_vm13, %v5164_v62, %v2853_v27  ;;  %v2629_v63 = vsel %vm2626_vm14, %v2628_v53, %v2624_v44  ;;  %v2896_v37 = vsub.f32 1.0, %v2895_v48  ;;  %v2798_v62 = vand.u32 2147483647, %v5158_v22 }
 0x625   : > { %3673 = vrcp.f32 %v5210_v41  ;;  %v2903_v44 = vand.u32 2147483647, %v5177_v10  ;;  %vm2839_vm11 = vweird.f32 %v5188_v46 }
 0x626   : > { %v2897_v16 = vmul.f32 %v5195_v30, %v2896_v37  ;;  %vm2799_vm5 = vcmp.eq.f32.partialorder %v2798_v62, 8.507059e+37  ;;  %v2843_v37 = vand.u32 2147483647, %v5188_v46  ;;  %v1948_v62 = vld [vmem:[#allocation4 + $0xd8] sm:$0xff] }
 0x627   : > { %v3672_v52 = vpop.eup %3671  ;;  %vm2904_vm9 = vcmp.eq.f32.partialorder %v2903_v44, 8.507059e+37 }
 0x628   : > { %v2835_v27 = vmul.f32 %v3672_v52, %v5188_v46  ;;  %v2898_v22 = vadd.f32 %v5195_v30, %v2897_v16  ;;  %vm2840_vm10 = vweird.f32 %v3672_v52  ;;  %vm2844_vm13 = vcmp.eq.f32.partialorder %v2843_v37, 8.507059e+37 }
 0x629   : > { %vm2841_vm12 = vmor %vm2839_vm11, %vm2840_vm10 }
 0x62a   : > { %2326 = vrot.lane.b32.xlu0 %v2160_v1, %s3729_s12  ;;  %v2793_v1 = vadd.f32 %v3668_v26, %v2792_v8  ;;  %v5227_v8 = vpop.f32.mrf.mxu3 }
 0x62b   : > { %2312 = vrot.lane.b32.xlu2 %v5079_v32, %s3729_s12  ;;  %v2858_v32 = vand.u32 2147483647, %v5147_v42 }
 0x62c   : > { %v2797_v7 = vsel %vm2796_vm4, %v3668_v26, %v2793_v1  ;;  %v3674_v26 = vpop.eup %3673  ;;  %v5237_v1 = vpop.f32.mrf.mxu1 }
 0x62d   : > { %v1994_v47 = vpop.xlane.xlu2 %1993  ;;  %vm2859_vm15 = vcmp.eq.f32.partialorder %v2858_v32, 8.507059e+37  ;;  %v5217_v32 = vld [vmem:[#allocation4 + $0xb0] sm:$0xff]  ;;  %vm2945_vm14 = vweird.f32 %v3674_v26 }
 0x62e   : > { %v2013_v2 = vadd.f32 %v1994_v47, %v1965_v19  ;;  %v2862_v42 = vsel %vm2859_vm15, %v2861_v4, %v2857_v20  ;;  %v2801_v19 = vor.u32 1.1754944e-38, %v2800_v36  ;;  %v2836_v47 = vsub.f32 1.0, %v2835_v27  ;;  %v5231_v4 = vpop.permute.xlu1 %2714 }
 0x62f   : > { %3675 = vrcp.f32 %v5217_v32  ;;  %v2902_v20 = vsel %vm2901_vm8, %v5195_v30, %v2898_v22  ;;  %v2845_v36 = vand.u32 2147483648, %v5188_v46  ;;  %vm2944_vm15 = vweird.f32 %v5210_v41 }
 0x630   : > { %2029 = vst.msk [vmem:[#allocation4 + $0xe0] sm:$0xff] %vm569_vm1, %v2013_v2  ;;  %v2802_v15 = vsel %vm2799_vm5, %v2801_v19, %v2797_v7  ;;  %v2905_v2 = vand.u32 2147483648, %v5177_v10  ;;  %v2837_v53 = vmul.f32 %v3672_v52, %v2836_v47  ;;  %vm2946_vm2 = vmor %vm2944_vm15, %vm2945_vm14  ;;  %vm2884_vm5 = vweird.f32 %v5217_v32 }
 0x631   : > { %v2846_v19 = vor.u32 1.1754944e-38, %v2845_v36 }
 0x632   : > { %2744 = vperm.xlu1 %3494, %v2629_v63   ;;  %v2906_v48 = vor.u32 1.1754944e-38, %v2905_v2  ;;  %v2166_v7 = vpop.f32.mrf.mxu3 }
 0x633   : > { %3051 = vperm.xlu2 %3495, %v2862_v42   ;;  %v2838_v42 = vadd.f32 %v3672_v52, %v2837_v53  ;;  %v5245_v53 = vld [vmem:[#allocation4 + $0xc8] sm:$0xff] }
 0x634   : > { %v2907_v63 = vsel %vm2904_vm9, %v2906_v48, %v2902_v20  ;;  %v2950_v20 = vand.u32 2147483648, %v5210_v41  ;;  %3677 = vrcp.f32 %v5245_v53  ;;  %vm2929_vm14 = vweird.f32 %v5245_v53 }
 0x635   : > { %v5235_v10 = vpop.eup %3675  ;;  %v2842_v27 = vsel %vm2841_vm12, %v3672_v52, %v2838_v42  ;;  %v5249_v52 = vld [vmem:[#allocation4 + $0xe8] sm:$0xff] }
 0x636   : > { %v2847_v22 = vsel %vm2844_vm13, %v2846_v19, %v2842_v27  ;;  %3679 = vrcp.f32 %v5249_v52  ;;  %v2951_v42 = vor.u32 1.1754944e-38, %v2950_v20  ;;  %vm2885_vm4 = vweird.f32 %v5235_v10 }
 0x637   : > { %vm2886_vm6 = vmor %vm2884_vm5, %vm2885_vm4 }
 0x63a   : > { %3031 = vperm.xlu1 %3494, %v2802_v15   ;;  %v1964_v15 = vmul.f32 %v4940_v18, %v1948_v62  ;;  %v5253_v18 = vpop.f32.mrf.mxu1  ;;  %v5268_v37 = vpop.eup %3677  ;;  %v2890_v62 = vand.u32 2147483648, %v5217_v32 }
 0x63b   : > { %2318 = vrot.lane.b32.xlu2 %v5103_v33, %s3729_s12  ;;  %v2940_v33 = vmul.f32 %v3674_v26, %v5210_v41  ;;  %v2925_v19 = vmul.f32 %v5268_v37, %v5245_v53  ;;  %vm2930_vm11 = vweird.f32 %v5268_v37 }
 0x63c   : > { %v5271_v27 = vpop.eup %3679  ;;  %vm2931_vm15 = vmor %vm2929_vm14, %vm2930_vm11 }
 0x63d   : > { %v2941_v30 = vsub.f32 1.0, %v2940_v33  ;;  %v2948_v33 = vand.u32 2147483647, %v5210_v41  ;;  %vm2990_vm12 = vweird.f32 %v5271_v27 }
 0x63f   : > { %v2942_v16 = vmul.f32 %v3674_v26, %v2941_v30  ;;  %vm2949_vm3 = vcmp.eq.f32.partialorder %v2948_v33, 8.507059e+37 }
 0x641   : > { %v2943_v46 = vadd.f32 %v3674_v26, %v2942_v16 }
 0x642   : > { %2310 = vrot.lane.b32.xlu1 %v5075_v28, %s3729_s12  ;;  %v2880_v28 = vmul.f32 %v5235_v10, %v5217_v32  ;;  %v1251_v16 = vpop.f32.mrf.mxu1 }
 0x643   : > { %3066 = vperm.xlu2 %3495, %v2907_v63   ;;  %v5260_v63 = vpop.f32.mrf.mxu3 }
 0x644   : > { %v2881_v44 = vsub.f32 1.0, %v2880_v28  ;;  %v2888_v28 = vand.u32 2147483647, %v5217_v32 }
 0x646   : > { %v2882_v48 = vmul.f32 %v5235_v10, %v2881_v44  ;;  %v2281_v44 = vmul.f32 0.0, %v4965_v49  ;;  %vm2889_vm7 = vcmp.eq.f32.partialorder %v2888_v28, 8.507059e+37 }
 0x648   : > { %v2883_v41 = vadd.f32 %v5235_v10, %v2882_v48 }
 0x649   : > { %v1992_v47 = vpop.xlane.xlu1 %1991 }
 0x64a   : > { %v2012_v2 = vadd.f32 %v1992_v47, %v1964_v15  ;;  %3046 = vperm.xlu1 %3494, %v2847_v22   ;;  %v2891_v15 = vor.u32 1.1754944e-38, %v2890_v62  ;;  %v2985_v47 = vmul.f32 %v5271_v27, %v5249_v52  ;;  %v5561_v22 = vld [vmem:[#allocation31_spill] sm:$0xff] }
 0x64b   : > { %2324 = vrot.lane.b32.xlu2 %v5172_v61, %s3729_s12  ;;  %v2947_v61 = vsel %vm2946_vm2, %v3674_v26, %v2943_v46  ;;  %v5282_v48 = vpop.f32.mrf.mxu3  ;;  %vm2989_vm2 = vweird.f32 %v5249_v52 }
 0x64c   : > { %2028 = vst.msk [vmem:[#allocation4 + $0xd8] sm:$0xff] %vm569_vm1, %v2012_v2  ;;  %v2952_v30 = vsel %vm2949_vm3, %v2951_v42, %v2947_v61  ;;  %v1381_v2 = vmul.f32 0.0, %v5561_v22  ;;  %v2926_v61 = vsub.f32 1.0, %v2925_v19  ;;  %v5284_v42 = vld [vmem:[#allocation4 + $0xe0] sm:$0xff]  ;;  %vm2991_vm3 = vmor %vm2989_vm2, %vm2990_vm12 }
 0x64e   : > { %v1397_v33 = vadd.f32 %v1381_v2, %v1251_v16  ;;  %v2927_v16 = vmul.f32 %v5268_v37, %v2926_v61  ;;  %v2993_v61 = vand.u32 2147483647, %v5249_v52 }
 0x650   : > { %vm2994_vm5 = vcmp.eq.f32.partialorder %v2993_v61, 8.507059e+37 }
 0x651   : > { %v5262_v36 = vpop.permute.xlu0 %3056 }
 0x652   : > { %2316 = vrot.lane.b32.xlu1 %v5098_v57, %s3729_s12  ;;  %v2887_v57 = vsel %vm2886_vm6, %v5235_v10, %v2883_v41  ;;  %v2986_v41 = vsub.f32 1.0, %v2985_v47 }
 0x653   : > { %3081 = vperm.xlu2 %3495, %v2952_v30   ;;  %v2784_v26 = vld [vmem:[#allocation4 + $0xd8] sm:$0xff]  ;;  %v2892_v20 = vsel %vm2889_vm7, %v2891_v15, %v2887_v57  ;;  %v2175_v47 = vpop.f32.mrf.mxu3  ;;  %vm2974_vm7 = vweird.f32 %v5284_v42 }
 0x654   : > { %3681 = vrcp.f32 %v2784_v26  ;;  %v2965_v57 = vand.u32 2147483648, %v2784_v26  ;;  %v2963_v15 = vand.u32 2147483647, %v2784_v26  ;;  %vm2959_vm9 = vweird.f32 %v2784_v26 }
 0x655   : > { %3683 = vrcp.f32 %v5284_v42 }
 0x656   : > { %v2966_v2 = vor.u32 1.1754944e-38, %v2965_v57  ;;  %vm2964_vm13 = vcmp.eq.f32.partialorder %v2963_v15, 8.507059e+37  ;;  %v1952_v15 = vld [vmem:[#allocation4 + $0xf8] sm:$0xff] }
 0x659   : > { %v2321_v46 = vpop.permute.xlu0 %2320 }
 0x65a   : > { %v3682_v32 = vpop.eup %3681  ;;  %v2361_v10 = vadd.f32 %v2321_v46, %v2281_v44  ;;  %3061 = vperm.xlu1 %3494, %v2892_v20   ;;  %v2928_v44 = vadd.f32 %v5268_v37, %v2927_v16  ;;  %v2935_v20 = vand.u32 2147483648, %v5245_v53 }
 0x65b   : > { %2330 = vrot.lane.b32.xlu2 %v2166_v7, %s3729_s12  ;;  %v2955_v30 = vmul.f32 %v3682_v32, %v2784_v26  ;;  %vm2960_vm8 = vweird.f32 %v3682_v32  ;;  %v2987_v7 = vmul.f32 %v5271_v27, %v2986_v41 }
 0x65c   : > { %v5288_v62 = vsel %vm698_vm0, %v1397_v33, %v2361_v10  ;;  %vm2961_vm10 = vmor %vm2959_vm9, %vm2960_vm8  ;;  %v2995_v10 = vand.u32 2147483648, %v5249_v52 }
 0x65d   : > { %v2956_v49 = vsub.f32 1.0, %v2955_v30  ;;  %v5293_v28 = vmul.f32 %v5231_v4, %v5288_v62  ;;  %v3684_v4 = vpop.eup %3683  ;;  %v2988_v26 = vadd.f32 %v5271_v27, %v2987_v7  ;;  %v5310_v30 = vpop.permute.xlu2 %2734 }
 0x65e   : > { %v2970_v41 = vmul.f32 %v3684_v4, %v5284_v42  ;;  %v2996_v57 = vor.u32 1.1754944e-38, %v2995_v10  ;;  %vm2975_vm6 = vweird.f32 %v3684_v4 }
 0x65f   : > { %v2957_v19 = vmul.f32 %v3682_v32, %v2956_v49  ;;  %v2936_v49 = vor.u32 1.1754944e-38, %v2935_v20  ;;  %vm2976_vm8 = vmor %vm2974_vm7, %vm2975_vm6 }
 0x660   : > { %v2971_v52 = vsub.f32 1.0, %v2970_v41 }
 0x661   : > { %v2958_v22 = vadd.f32 %v3682_v32, %v2957_v19 }
 0x662   : > { %2322 = vrot.lane.b32.xlu1 %v5154_v21, %s3729_s12  ;;  %v2933_v21 = vand.u32 2147483647, %v5245_v53  ;;  %v2992_v53 = vsel %vm2991_vm3, %v5271_v27, %v2988_v26 }
 0x663   : > { %2336 = vrot.lane.b32.xlu2 %v2175_v47, %s3729_s12  ;;  %v2962_v46 = vsel %vm2961_vm10, %v3682_v32, %v2958_v22  ;;  %v2932_v32 = vsel %vm2931_vm15, %v5268_v37, %v2928_v44  ;;  %v2997_v19 = vsel %vm2994_vm5, %v2996_v57, %v2992_v53  ;;  %v1968_v37 = vmul.f32 %v5037_v11, %v1952_v15  ;;  %v5562_v11 = vld [vmem:[#allocation18_spill] sm:$0xff]  ;;  %v5336_v53 = vpop.f32.mrf.mxu1 }
 0x664   : > { %v2967_v33 = vsel %vm2964_vm13, %v2966_v2, %v2962_v46  ;;  %vm2934_vm4 = vcmp.eq.f32.partialorder %v2933_v21, 8.507059e+37  ;;  %v2972_v22 = vmul.f32 %v3684_v4, %v2971_v52  ;;  %v2980_v2 = vand.u32 2147483648, %v5284_v42 }
 0x665   : > { %3086 = vperm.xlu0 %3496, %v2967_v33   ;;  %v2937_v16 = vsel %vm2934_vm4, %v2936_v49, %v2932_v32  ;;  %v2978_v44 = vand.u32 2147483647, %v5284_v42  ;;  %v1374_v46 = vmul.f32 0.0, %v5562_v11 }
 0x666   : > { %v2973_v27 = vadd.f32 %v3684_v4, %v2972_v22  ;;  %v2981_v21 = vor.u32 1.1754944e-38, %v2980_v2 }
 0x667   : > { %vm2979_vm9 = vcmp.eq.f32.partialorder %v2978_v44, 8.507059e+37 }
 0x668   : > { %v2977_v26 = vsel %vm2976_vm8, %v3684_v4, %v2973_v27 }
 0x669   : > { %v2982_v32 = vsel %vm2979_vm9, %v2981_v21, %v2977_v26 }
 0x66a   : > { %3076 = vperm.xlu1 %3494, %v2937_v16   ;;  %v5340_v16 = vpop.permute.xlu1 %2729 }
 0x66b   : > { %3096 = vperm.xlu2 %3495, %v2997_v19  }
 0x66d   : > { %2332 = vrot.lane.b32.xlu0 %v5260_v63, %s3729_s12  ;;  %v2274_v63 = vmul.f32 0.0, %v4881_v55 }
 0x66e   : > { %v2000_v7 = vpop.xlane.xlu2 %1999 }
 0x66f   : > { %v2016_v47 = vadd.f32 %v2000_v7, %v1968_v37 }
 0x671   : > { %2032 = vst.msk [vmem:[#allocation4 + $0xf8] sm:$0xff] %vm569_vm1, %v2016_v47  ;;  %v1951_v47 = vld [vmem:[#allocation4 + $0xf0] sm:$0xff] }
 0x672   : > { %2328 = vrot.lane.b32.xlu1 %v5227_v8, %s3729_s12  ;;  %v5563_v8 = vld [vmem:[#allocation28_spill] sm:$0xff]  ;;  %v1967_v44 = vmul.f32 %v4946_v14, %v1951_v47 }
 0x673   : > { %v1390_v10 = vadd.f32 %v1374_v46, %v5563_v8 }
 0x676   : > { %v2307_v20 = vpop.permute.xlu2 %2306 }
 0x677   : > { %v2354_v33 = vadd.f32 %v2307_v20, %v2274_v63  ;;  %v1257_v63 = vpop.f32.mrf.mxu1 }
 0x678   : > { %v2788_v61 = vld [vmem:[#allocation4 + $0xf8] sm:$0xff] }
 0x679   : > { %3685 = vrcp.f32 %v2788_v61  ;;  %v5330_v41 = vsel %vm698_vm0, %v1390_v10, %v2354_v33  ;;  %v3025_v57 = vand.u32 2147483648, %v2788_v61  ;;  %v3023_v15 = vand.u32 2147483647, %v2788_v61  ;;  %v5564_v10 = vld [vmem:[#allocation37_spill] sm:$0xff] }
 0x67a   : > { %3091 = vperm.xlu1 %3494, %v2982_v32   ;;  %vm3019_vm11 = vweird.f32 %v2788_v61  ;;  %v1384_v14 = vmul.f32 0.0, %v5564_v10 }
 0x67b   : > { %vm3024_vm13 = vcmp.eq.f32.partialorder %v3023_v15, 8.507059e+37 }
 0x67e   : > { %v5333_v55 = vpop.permute.xlu2 %2749 }
 0x67f   : > { %v3686_v42 = vpop.eup %3685  ;;  %v1260_v26 = vpop.f32.mrf.mxu1 }
 0x680   : > { %v3015_v49 = vmul.f32 %v3686_v42, %v2788_v61  ;;  %vm3020_vm10 = vweird.f32 %v3686_v42  ;;  %v2284_v61 = vmul.f32 0.0, %v5005_v31 }
 0x681   : > { %vm3021_vm12 = vmor %vm3019_vm11, %vm3020_vm10 }
 0x682   : > { %2334 = vrot.lane.b32.xlu1 %v5282_v48, %s3729_s12  ;;  %v3016_v4 = vsub.f32 1.0, %v3015_v49  ;;  %v3026_v48 = vor.u32 1.1754944e-38, %v3025_v57  ;;  %v5565_v49 = vld [vmem:[#allocation32_spill] sm:$0xff]  ;;  %v1400_v57 = vadd.f32 %v1384_v14, %v1260_v26  ;;  %v5566_v14 = vld [vmem:[#allocation38_spill] sm:$0xff] }
 0x684   : > { %v3017_v19 = vmul.f32 %v3686_v42, %v3016_v4  ;;  %v1380_v4 = vmul.f32 0.0, %v5565_v49 }
 0x686   : > { %v3037_v52 = vpop.permute.xlu2 %3036  ;;  %v3018_v37 = vadd.f32 %v3686_v42, %v3017_v19  ;;  %v2280_v19 = vmul.f32 0.0, %v4969_v59 }
 0x687   : > { %v3110_v7 = vmul.f32 %v3037_v52, %v5116_v39  ;;  %v5363_v52 = vpop.f32.mrf.mxu1 }
 0x688   : > { %v3022_v22 = vsel %vm3021_vm12, %v3686_v42, %v3018_v37 }
 0x689   : > { %v3126_v27 = vsel %vm698_vm0, %v5120_v35, %v3110_v7  ;;  %v3027_v2 = vsel %vm3024_vm13, %v3026_v48, %v3022_v22  ;;  %v1396_v7 = vadd.f32 %v1380_v4, %v5253_v18 }
 0x68a   : > { %3142 = vst [vmem:[%s5345_s4 + $0x8] sm:$0xff] %v3126_v27  ;;  %3106 = vperm.xlu1 %3494, %v3027_v2  }
 0x68c   : > { %v1998_v11 = vpop.xlane.xlu1 %1997 }
 0x68d   : > { %v2015_v46 = vadd.f32 %v1998_v11, %v1967_v44 }
 0x68e   : > { %v2313_v20 = vpop.permute.xlu2 %2312 }
 0x68f   : > { %2031 = vst.msk [vmem:[#allocation4 + $0xf0] sm:$0xff] %vm569_vm1, %v2015_v46 }
 0x694   : > { %v5353_v39 = vpop.permute.xlu0 %3071 }
 0x696   : > { %v3052_v33 = vpop.permute.xlu2 %3051  ;;  %v2787_v21 = vld [vmem:[#allocation4 + $0xf0] sm:$0xff] }
 0x697   : > { %v3113_v8 = vmul.f32 %v3052_v33, %v5143_v43  ;;  %3687 = vrcp.f32 %v2787_v21  ;;  %v3010_v47 = vand.u32 2147483648, %v2787_v21  ;;  %v3008_v2 = vand.u32 2147483647, %v2787_v21 }
 0x698   : > { %vm3004_vm14 = vweird.f32 %v2787_v21 }
 0x699   : > { %v3129_v35 = vsel %vm698_vm0, %v5150_v9, %v3113_v8  ;;  %v3011_v11 = vor.u32 1.1754944e-38, %v3010_v47  ;;  %vm3009_vm2 = vcmp.eq.f32.partialorder %v3008_v2, 8.507059e+37  ;;  %v1266_v8 = vpop.f32.mrf.mxu1 }
 0x69a   : > { %3145 = vst [vmem:[%s5345_s4 + $0x20] sm:$0xff] %v3129_v35 }
 0x69c   : > { %v2327_v32 = vpop.permute.xlu0 %2326 }
 0x69d   : > { %v3688_v42 = vpop.eup %3687  ;;  %v2364_v15 = vadd.f32 %v2327_v32, %v2284_v61  ;;  %v1383_v61 = vmul.f32 0.0, %v5566_v14  ;;  %v2757_v32 = vmul.f32 %v5052_v29, %v5330_v41  ;;  %v5569_v14 = vld [vmem:[#allocation23_spill] sm:$0xff] }
 0x69e   : > { %v2319_v43 = vpop.permute.xlu2 %2318  ;;  %v3000_v37 = vmul.f32 %v3688_v42, %v2787_v21  ;;  %vm3005_vm1 = vweird.f32 %v3688_v42  ;;  %v2283_v21 = vmul.f32 0.0, %v5011_v12  ;;  %v2277_v12 = vmul.f32 0.0, %v4926_v17 }
 0x69f   : > { %v2360_v9 = vadd.f32 %v2319_v43, %v2280_v19  ;;  %v2380_v48 = vsel %vm698_vm0, %v1400_v57, %v2364_v15  ;;  %vm3006_vm15 = vmor %vm3004_vm14, %vm3005_vm1  ;;  %v1399_v4 = vadd.f32 %v1383_v61, %v1257_v63  ;;  %v2276_v15 = vmul.f32 0.0, %v4861_v54 }
 0x6a0   : > { %v3001_v22 = vsub.f32 1.0, %v3000_v37  ;;  %v2357_v63 = vadd.f32 %v2313_v20, %v2277_v12  ;;  %v2767_v47 = vmul.f32 %v5340_v16, %v2380_v48  ;;  %v1386_v16 = vmul.f32 0.0, %v4807_v3 }
 0x6a1   : > { %v5368_v31 = vsel %vm698_vm0, %v1396_v7, %v2360_v9  ;;  %v5568_v9 = vld [vmem:[#allocation30_spill] sm:$0xff]  ;;  %v1379_v61 = vmul.f32 0.0, %v5569_v14 }
 0x6a2   : > { %v3002_v27 = vmul.f32 %v3688_v42, %v3001_v22 }
 0x6a4   : > { %v5370_v59 = vpop.permute.xlu1 %2744  ;;  %v3003_v44 = vadd.f32 %v3688_v42, %v3002_v27 }
 0x6a6   : > { %v3067_v46 = vpop.permute.xlu2 %3066  ;;  %v3007_v18 = vsel %vm3006_vm15, %v3688_v42, %v3003_v44 }
 0x6a7   : > { %v3116_v26 = vmul.f32 %v3067_v46, %v5288_v62  ;;  %v3012_v33 = vsel %vm3009_vm2, %v3011_v11, %v3007_v18 }
 0x6a8   : > { %3101 = vperm.xlu0 %3496, %v3012_v33  }
 0x6a9   : > { %v3132_v35 = vsel %vm698_vm0, %v5293_v28, %v3116_v26  ;;  %v5386_v28 = vpop.f32.mrf.mxu1  ;;  %v1402_v26 = vadd.f32 %v1386_v16, %v1266_v8  ;;  %v2289_v8 = vmul.f32 0.0, %v5089_v25  ;;  %v2763_v25 = vmul.f32 %v5077_v50, %v5368_v31  ;;  %v5572_v16 = vld [vmem:[#allocation39_spill] sm:$0xff] }
 0x6aa   : > { %3148 = vst [vmem:[%s5345_s4 + $0x38] sm:$0xff] %v3132_v35 }
 0x6ac   : > { %v3032_v10 = vpop.permute.xlu1 %3031 }
 0x6ad   : > { %v3109_v42 = vmul.f32 %v3032_v10, %v5330_v41  ;;  %v5567_v41 = vld [vmem:[#allocation22_spill] sm:$0xff] }
 0x6ae   : > { %v2325_v49 = vpop.permute.xlu2 %2324  ;;  %v1377_v37 = vmul.f32 0.0, %v5567_v41  ;;  %v5570_v41 = vld [vmem:[#allocation33_spill] sm:$0xff] }
 0x6af   : > { %v3125_v62 = vsel %vm698_vm0, %v2757_v32, %v3109_v42  ;;  %v2363_v57 = vadd.f32 %v2325_v49, %v2283_v21  ;;  %v2279_v21 = vmul.f32 0.0, %v4874_v24 }
 0x6b0   : > { %3141 = vst [vmem:[%s5345_s4] sm:$0xff] %v3125_v62  ;;  %v1393_v2 = vadd.f32 %v1377_v37, %v5127_v40  ;;  %v2286_v40 = vmul.f32 0.0, %v5067_v5  ;;  %v1395_v5 = vadd.f32 %v1379_v61, %v5237_v1  ;;  %v1382_v37 = vmul.f32 0.0, %v5570_v41 }
 0x6b1   : > { %v5384_v19 = vsel %vm698_vm0, %v1399_v4, %v2363_v57  ;;  %v5398_v11 = vpop.f32.mrf.mxu1 }
 0x6b2   : > { %v2373_v46 = vsel %vm698_vm0, %v1393_v2, %v2357_v63  ;;  %v1398_v63 = vadd.f32 %v1382_v37, %v5336_v53  ;;  %v2766_v2 = vmul.f32 %v5096_v56, %v5384_v19  ;;  %v1385_v56 = vmul.f32 0.0, %v5572_v16 }
 0x6b4   : > { %v2311_v43 = vpop.permute.xlu1 %2310 }
 0x6b5   : > { %v2356_v29 = vadd.f32 %v2311_v43, %v2276_v15 }
 0x6b6   : > { %v3082_v7 = vpop.permute.xlu2 %3081 }
 0x6b7   : > { %v2372_v22 = vsel %vm698_vm0, %v5568_v9, %v2356_v29  ;;  %v3119_v27 = vmul.f32 %v3082_v7, %v2380_v48 }
 0x6b8   : > { %v2759_v54 = vmul.f32 %v5085_v58, %v2372_v22  ;;  %v3111_v44 = vmul.f32 %v5130_v13, %v2372_v22  ;;  %v2760_v58 = vmul.f32 %v5057_v51, %v2373_v46  ;;  %v1389_v51 = vmul.f32 0.0, %v4869_v38 }
 0x6b9   : > { %v3135_v17 = vsel %vm698_vm0, %v2767_v47, %v3119_v27  ;;  %v1275_v32 = vpop.f32.mrf.mxu1 }
 0x6ba   : > { %v3127_v20 = vsel %vm698_vm0, %v2759_v54, %v3111_v44  ;;  %3151 = vst [vmem:[%s5345_s4 + $0x50] sm:$0xff] %v3135_v17  ;;  %v1405_v4 = vadd.f32 %v1389_v51, %v1275_v32  ;;  %v5571_v54 = vld [vmem:[#allocation40_spill] sm:$0xff]  ;;  %v2287_v44 = vmul.f32 0.0, %v5062_v0 }
 0x6bb   : > { %3143 = vst [vmem:[%s5345_s4 + $0x10] sm:$0xff] %v3127_v20  ;;  %v1387_v53 = vmul.f32 0.0, %v5571_v54 }
 0x6bc   : > { %v3047_v18 = vpop.permute.xlu1 %3046 }
 0x6bd   : > { %v3112_v48 = vmul.f32 %v3047_v18, %v2373_v46 }
 0x6be   : > { %v2331_v13 = vpop.permute.xlu2 %2330 }
 0x6bf   : > { %v3128_v33 = vsel %vm698_vm0, %v2760_v58, %v3112_v48  ;;  %v2366_v35 = vadd.f32 %v2331_v13, %v2286_v40  ;;  %v1401_v48 = vadd.f32 %v1385_v56, %v5363_v52  ;;  %v5573_v52 = vld [vmem:[#allocation41_spill] sm:$0xff] }
 0x6c0   : > { %3144 = vst [vmem:[%s5345_s4 + $0x18] sm:$0xff] %v3128_v33  ;;  %v1388_v32 = vmul.f32 0.0, %v5573_v52 }
 0x6c1   : > { %v2382_v10 = vsel %vm698_vm0, %v1402_v26, %v2366_v35 }
 0x6c4   : > { %v2317_v3 = vpop.permute.xlu1 %2316 }
 0x6c5   : > { %v2359_v42 = vadd.f32 %v2317_v3, %v2279_v21  ;;  %v5574_v3 = vld [vmem:[#allocation8_spill] sm:$0xff] }
 0x6c6   : > { %v2337_v49 = vpop.permute.xlu2 %2336 }
 0x6c7   : > { %v2375_v62 = vsel %vm698_vm0, %v1395_v5, %v2359_v42  ;;  %v2369_v57 = vadd.f32 %v2337_v49, %v2289_v8  ;;  %v2288_v5 = vmul.f32 0.0, %v5574_v3 }
 0x6c8   : > { %v2762_v15 = vmul.f32 %v5105_v34, %v2375_v62  ;;  %v3114_v12 = vmul.f32 %v5262_v36, %v2375_v62  ;;  %v2282_v34 = vmul.f32 0.0, %v4912_v60 }
 0x6c9   : > { %v2385_v24 = vsel %vm698_vm0, %v1405_v4, %v2369_v57  ;;  %v5575_v4 = vld [vmem:[#allocation9_spill] sm:$0xff] }
 0x6ca   : > { %v3130_v43 = vsel %vm698_vm0, %v2762_v15, %v3114_v12  ;;  %v2772_v62 = vmul.f32 %v5575_v4, %v2385_v24 }
 0x6cb   : > { %3146 = vst [vmem:[%s5345_s4 + $0x28] sm:$0xff] %v3130_v43 }
 0x6cc   : > { %v3062_v38 = vpop.permute.xlu1 %3061 }
 0x6cd   : > { %v3115_v1 = vmul.f32 %v3062_v38, %v5368_v31 }
 0x6ce   : > { %v3097_v46 = vpop.permute.xlu2 %3096 }
 0x6cf   : > { %v3131_v29 = vsel %vm698_vm0, %v2763_v25, %v3115_v1 }
 0x6d0   : > { %3147 = vst [vmem:[%s5345_s4 + $0x30] sm:$0xff] %v3131_v29 }
 0x6d4   : > { %v2323_v36 = vpop.permute.xlu1 %2322 }
 0x6d5   : > { %v2362_v7 = vadd.f32 %v2323_v36, %v2282_v34 }
 0x6d7   : > { %v2378_v9 = vsel %vm698_vm0, %v1398_v63, %v2362_v7  ;;  %v3087_v22 = vpop.permute.xlu0 %3086 }
 0x6d8   : > { %v2765_v47 = vmul.f32 %v5179_v45, %v2378_v9  ;;  %v3117_v50 = vmul.f32 %v5353_v39, %v2378_v9  ;;  %v1403_v45 = vadd.f32 %v1387_v53, %v5386_v28 }
 0x6da   : > { %v3133_v31 = vsel %vm698_vm0, %v2765_v47, %v3117_v50 }
 0x6db   : > { %3149 = vst [vmem:[%s5345_s4 + $0x40] sm:$0xff] %v3133_v31 }
 0x6dc   : > { %v3077_v27 = vpop.permute.xlu1 %3076 }
 0x6dd   : > { %v3118_v60 = vmul.f32 %v3077_v27, %v5384_v19  ;;  %v2285_v19 = vmul.f32 0.0, %v5018_v6 }
 0x6df   : > { %v3134_v17 = vsel %vm698_vm0, %v2766_v2, %v3118_v60  ;;  %v2333_v20 = vpop.permute.xlu0 %2332 }
 0x6e0   : > { %3150 = vst [vmem:[%s5345_s4 + $0x48] sm:$0xff] %v3134_v17  ;;  %v2367_v39 = vadd.f32 %v2333_v20, %v2287_v44 }
 0x6e2   : > { %v2383_v18 = vsel %vm698_vm0, %v1403_v45, %v2367_v39 }
 0x6e3   : > { %v2770_v40 = vmul.f32 %v5370_v59, %v2383_v18  ;;  %v3122_v0 = vmul.f32 %v3097_v46, %v2383_v18  ;;  %v2769_v59 = vmul.f32 %v5108_v23, %v2382_v10 }
 0x6e4   : > { %v2329_v58 = vpop.permute.xlu1 %2328 }
 0x6e5   : > { %v3138_v13 = vsel %vm698_vm0, %v2770_v40, %v3122_v0  ;;  %v2365_v28 = vadd.f32 %v2329_v58, %v2285_v19 }
 0x6e6   : > { %3154 = vst [vmem:[%s5345_s4 + $0x68] sm:$0xff] %v3138_v13 }
 0x6e7   : > { %v2381_v26 = vsel %vm698_vm0, %v1401_v48, %v2365_v28 }
 0x6e8   : > { %v2768_v33 = vmul.f32 %v5310_v30, %v2381_v26  ;;  %v3120_v35 = vmul.f32 %v3087_v22, %v2381_v26  ;;  %v1404_v30 = vadd.f32 %v1388_v32, %v5398_v11 }
 0x6ea   : > { %v3136_v14 = vsel %vm698_vm0, %v2768_v33, %v3120_v35 }
 0x6eb   : > { %3152 = vst [vmem:[%s5345_s4 + $0x58] sm:$0xff] %v3136_v14 }
 0x6ec   : > { %v3092_v6 = vpop.permute.xlu1 %3091 }
 0x6ed   : > { %v3121_v61 = vmul.f32 %v3092_v6, %v2382_v10 }
 0x6ef   : > { %v3137_v21 = vsel %vm698_vm0, %v2769_v59, %v3121_v61 }
 0x6f0   : > { %3153 = vst [vmem:[%s5345_s4 + $0x60] sm:$0xff] %v3137_v21 }
 0x6f4   : > { %v2335_v51 = vpop.permute.xlu1 %2334 }
 0x6f5   : > { %v2368_v8 = vadd.f32 %v2335_v51, %v2288_v5 }
 0x6f7   : > { %v2384_v42 = vsel %vm698_vm0, %v1404_v30, %v2368_v8 }
 0x6f8   : > { %v2771_v15 = vmul.f32 %v5333_v55, %v2384_v42 }
 0x6fc   : > { %v3107_v49 = vpop.permute.xlu1 %3106 }
 0x6fd   : > { %v3124_v57 = vmul.f32 %v3107_v49, %v2385_v24 }
 0x6ff   : > { %v3140_v23 = vsel %vm698_vm0, %v2772_v62, %v3124_v57 }
 0x700   : > { %3156 = vst [vmem:[%s5345_s4 + $0x78] sm:$0xff] %v3140_v23 }
 0x71a   : > { %v3102_v10 = vpop.permute.xlu0 %3101 }
 0x71b   : > { %v3123_v12 = vmul.f32 %v3102_v10, %v2384_v42 }
 0x71d   : > { %v3139_v43 = vsel %vm698_vm0, %v2771_v15, %v3123_v12 }
 0x71e   : > { %3155 = vst [vmem:[%s5345_s4 + $0x70] sm:$0xff] %v3139_v43 }
 0x71f PF: > { %s13_s16 = sadd.s32 1, %s3727_s16   ;;  %s5576_s12 = smov %s3715_s13 }
 0x720   : > { %p10_p10 = scmp.ge.s32.totalorder %s13_s16, 4   ;;  %s5577_s13 = smov %s3792_s21 }
 0x721   : > { %s5578_s14 = smov %s3723_s15  ;;  %s5579_s15 = smov %s5581_s17 }
 0x722   :  { %12 = sbr.rel (!%p10_p10) target bundleno = 3 (0x3), region = 207 }

</bundles_post_ra>
